<compile_context>
chip_gen: v7x
topology: tpu7x:2x2x1
jax: 0.10.0
libtpu: 0.0.40
codegen_flags: <defaults>
</compile_context>

<pallas_src>
import numpy as np
import jax
import jax.numpy as jnp
from jax.experimental import pallas as pl
from jax.experimental.pallas import tpu as pltpu


def _erf_poly(x):
    # Abramowitz & Stegun 7.1.26, max abs error ~1.5e-7 (~float32 eps).
    # TODO(synk): Mosaic has no native lax.erf lowering; this polynomial stands
    # in for the exact erf used by nn.GELU() (error is below f32 resolution).
    a1 = 0.254829592
    a2 = -0.284496736
    a3 = 1.421413741
    a4 = -1.453152027
    a5 = 1.061405429
    p = 0.3275911
    sgn = jnp.where(x >= 0.0, 1.0, -1.0)
    ax = jnp.abs(x)
    # approx reciprocal rides the EUP slot; residual error is attenuated by the
    # alpha=0.01 output scaling (review correctness concern 1 - kept in CI).
    t = pl.reciprocal(1.0 + p * ax, approx=True)
    poly = ((((a5 * t + a4) * t + a3) * t + a2) * t + a1) * t
    return sgn * (1.0 - poly * jnp.exp(-ax * ax))


def _gelu_exact(x):
    # nn.GELU() default: x * 0.5 * (1 + erf(x / sqrt(2)))
    # TODO(synk): tanh-form GELU (single EUP tanh, review item 10) would shrink
    # the VALU chain but changes numerics; re-validate before adopting.
    inv_sqrt2 = 0.7071067811865476
    return 0.5 * x * (1.0 + _erf_poly(x * inv_sqrt2))


def _embedder_kernel(x_ref, wm_ref, w1_ref, b1_ref, w2_ref, b2_ref, pool_ref,
                     out_ref):
    block_b, c_blk, t_len = x_ref.shape
    d_len = wm_ref.shape[-1]
    h_len = w1_ref.shape[1]

    # ---- conv1 neighbour taps via XLU rotate + edge mask (review item 1) ----
    wm_c = wm_ref[...]                                   # [Bb, 1, D]
    wm2 = wm_ref[:, 0, :]                                # [Bb, D]
    lane = jax.lax.broadcasted_iota(jnp.int32, (block_b, d_len), 1)
    # The k=3 / pad=1 zero padding is the zeroed wrap-around element.
    wm_prev = jnp.where(lane == 0, 0.0,
                        pltpu.roll(wm2, shift=1, axis=1))[:, None, :]
    wm_next = jnp.where(lane == d_len - 1, 0.0,
                        pltpu.roll(wm2, shift=d_len - 1, axis=1))[:, None, :]

    # ---- Conv1d(1 -> H, k=3, pad=1) fused over the whole batch block --------
    w1 = w1_ref[...]                                     # [3, H, 1] (tap-major)
    b1 = b1_ref[...]                                     # [H, 1]
    h1 = (w1[0] * wm_prev                                # [Bb, H, D]
          + w1[1] * wm_c
          + w1[2] * wm_next
          + b1)
    g1 = _gelu_exact(h1)                                 # [Bb, H, D]

    # ---- adaptive_avg_pool1d commuted before the 1x1 conv, one fused matmul -
    # pool(W2 g + b2) == W2 pool(g) + b2  (pool rows sum to 1, conv2 is 1x1),
    # and the whole batch block rides a single MXU dot (review item 2).
    g1_slab = g1.reshape(block_b * h_len, d_len)         # merge majors; H % 8 == 0
    gp = jnp.dot(g1_slab, pool_ref[...],
                 preferred_element_type=jnp.float32)     # [Bb*H, T]
    # TODO(synk): bf16 operands for the two MXU dots (review item 9, v5e) need
    # empirical re-validation against the 1e-4 tolerance before adoption.

    # ---- 1x1 conv (alpha already folded into w2/b2) + residual --------------
    w2a = w2_ref[...]                                    # [Cblk, H]  (alpha*W2)
    b2a = jnp.broadcast_to(b2_ref[...], (c_blk, t_len))  # hoisted (review item 3)
    # The H-contraction uses a weight shared across the batch, so it cannot be
    # fused over Bb without a (H,T)->(T,H) minor transpose; keep a short static
    # unroll (Bb == 1 at the real module shape, so this is straight-line code).
    # All loop-invariant broadcasts are hoisted above, so nothing is re-emitted
    # per iteration; a lax.fori_loop(unroll=True) form is equivalent here.
    for b in range(block_b):
        gp_b = gp[b * h_len:(b + 1) * h_len, :]          # static, sublane-aligned
        wsig = jnp.dot(w2a, gp_b, preferred_element_type=jnp.float32) + b2a
        # TODO(synk): T < 128 makes this a masked (vst.msk) store; a lane-dense
        # [B, T, C] layout (review item 5) would require an NTC module boundary
        # or wrapper transposes costing more HBM traffic than the store saves.
        out_ref[b] = x_ref[b] + wsig


def _multi_tensorcore_chip():
    """True on chips exposing >1 TensorCore per device (v7x; v4/v5p megacore)."""
    try:
        kind = jax.devices()[0].device_kind.lower()
    except Exception:
        return False
    return any(tag in kind for tag in ("v7", "v4", "v5p"))


def watermark_embedder(x, watermark, params, *, max_batch_block=64,
                       c_blocks=None):
    x = x.astype(jnp.float32)
    watermark = watermark.astype(jnp.float32)
    B, C, T = x.shape
    D = watermark.shape[1]
    H = params["conv1_w"].shape[0]            # watermark_dim // 2
    assert params["conv2_w"].shape[0] == C, "conv2 out-channels must match x channels"

    # --- parameter plumbing (glue) ---
    # [H,1,3] -> [3,H,1]: tap-major so w1[k] broadcasts directly against [Bb,1,D].
    w1 = jnp.transpose(params["conv1_w"][:, 0, :].astype(jnp.float32),
                       (1, 0))[:, :, None]                              # [3, H, 1]
    b1 = params["conv1_b"].astype(jnp.float32)[:, None]                 # [H, 1]
    # alpha folded into the 1x1 conv (exact parameter rescaling, review item 4).
    alpha = jnp.asarray(params["alpha"], jnp.float32)
    w2a = alpha * params["conv2_w"][:, :, 0].astype(jnp.float32)        # [C, H]
    b2a = (alpha * params["conv2_b"].astype(jnp.float32))[:, None]      # [C, 1]

    # adaptive_avg_pool1d(D -> T) as a [D, T] averaging matrix (identity when
    # D == T), matching torch's windows start=floor(i*D/T), end=ceil((i+1)*D/T).
    pool_np = np.zeros((D, T), np.float32)
    for i in range(T):
        start = (i * D) // T
        end = -((-(i + 1) * D) // T)
        pool_np[start:end, i] = 1.0 / (end - start)
    pool = jnp.asarray(pool_np)

    wm3 = watermark[:, None, :]                                         # [B, 1, D]

    # --- block sizing ---------------------------------------------------------
    # VMEM is not the binding resource at the real module shape; the fallback
    # assumes the smallest per-core VMEM of the supported generations (64 MiB,
    # v7x), which only makes the block choice conservative, never incorrect
    # (review correctness concern 3).
    try:
        vmem_cap = int(pltpu.get_tpu_info().vmem_capacity_bytes)
    except Exception:
        vmem_cap = 64 << 20
    vmem_budget = min(vmem_cap * 3 // 4, 48 << 20)

    def _vmem_bytes(bb, cb):
        pipelined = 2 * (2 * bb * cb * T                 # x + out (double-buffered)
                         + bb * D                        # watermark block
                         + 4 * H + cb * H + cb + D * T)  # grid-invariant operands
        temps = 4 * bb * H * D + bb * H * T + 3 * cb * T  # h1/g1/GELU temps, gp, wsig
        return 4 * (pipelined + temps)

    # Largest divisor of B whose block fits the budget (raised cap, item 7).
    # TODO(synk): a pl.cdiv grid with a masked tail block would lift the
    # divisibility requirement for awkward batch sizes.
    bblk = 1
    for cand in range(min(B, max_batch_block), 0, -1):
        if B % cand == 0 and _vmem_bytes(cand, C) <= vmem_budget:
            bblk = cand
            break

    if c_blocks is None:
        # Give the pipeline (and the second TensorCore on v7x) >=2 independent
        # grid steps when the batch axis alone has only one (review item 6).
        # Splitting C duplicates the small watermark-encoder math per tile, so
        # only do it automatically on multi-TensorCore chips.
        single_step = (B // bblk) == 1
        c_blocks = 2 if (single_step and _multi_tensorcore_chip()
                         and C % 16 == 0) else 1
    assert C % c_blocks == 0, "c_blocks must divide the channel count"
    cblk = C // c_blocks
    assert cblk == C or cblk % 8 == 0, "channel tile must be sublane-aligned"

    grid = (B // bblk, c_blocks)
    vmem_limit = min(vmem_cap * 7 // 8,
                     max(vmem_budget, 2 * _vmem_bytes(bblk, cblk)))

    # TODO(synk): pipeline_mode=pl.Buffered(1) on the grid-invariant operands
    # (review item 8) would halve their VMEM footprint on v7x; left out because
    # VMEM is far from binding at these shapes.
    out = pl.pallas_call(
        _embedder_kernel,
        out_shape=jax.ShapeDtypeStruct((B, C, T), jnp.float32),
        grid=grid,
        in_specs=[
            pl.BlockSpec((bblk, cblk, T), lambda i, j: (i, j, 0)),   # x
            pl.BlockSpec((bblk, 1, D),    lambda i, j: (i, 0, 0)),   # watermark
            pl.BlockSpec((3, H, 1),       lambda i, j: (0, 0, 0)),   # conv1 weight (tap-major)
            pl.BlockSpec((H, 1),          lambda i, j: (0, 0)),      # conv1 bias
            pl.BlockSpec((cblk, H),       lambda i, j: (j, 0)),      # alpha * conv2 weight
            pl.BlockSpec((cblk, 1),       lambda i, j: (j, 0)),      # alpha * conv2 bias
            pl.BlockSpec((D, T),          lambda i, j: (0, 0)),      # pooling matrix
        ],
        out_specs=pl.BlockSpec((bblk, cblk, T), lambda i, j: (i, j, 0)),
        compiler_params=pltpu.CompilerParams(
            dimension_semantics=("parallel", "parallel"),
            vmem_limit_bytes=vmem_limit),
    )(x, wm3, w1, b1, w2a, b2a, pool)
    return out


def _reference(x, watermark, params):
    """Pure-JAX (non-Pallas) reference matching the PyTorch forward."""
    B, C, T = x.shape
    D = watermark.shape[1]
    wm = watermark[:, None, :]                                  # [B, 1, D]
    h1 = jax.lax.conv_general_dilated(
        wm, params["conv1_w"], window_strides=(1,), padding=((1, 1),),
        dimension_numbers=("NCH", "OIH", "NCH"))
    h1 = h1 + params["conv1_b"][None, :, None]
    g1 = jax.nn.gelu(h1, approximate=False)
    h2 = jax.lax.conv_general_dilated(
        g1, params["conv2_w"], window_strides=(1,), padding=((0, 0),),
        dimension_numbers=("NCH", "OIH", "NCH"))
    h2 = h2 + params["conv2_b"][None, :, None]
    cols = []
    for i in range(T):
        start = (i * D) // T
        end = -((-(i + 1) * D) // T)
        cols.append(h2[..., start:end].mean(-1))
    pooled = jnp.stack(cols, axis=-1)                           # [B, C, T]
    return x + params["alpha"] * pooled


if __name__ == "__main__":
    # Small shapes consistent with the module (real module: watermark_dim=512,
    # x=[1,512,156]).  Here: watermark_dim=128 (so C=D=128, H=64), batch=8 and
    # carrier length T=36 != D (exercises the adaptive-pool path).  The demo
    # forces max_batch_block=4 and c_blocks=2 so the 2-D grid (2 batch steps x
    # 2 channel tiles) and both index_maps are exercised at small scale.
    B, T = 8, 36
    watermark_dim = 128
    C = watermark_dim
    D = watermark_dim
    H = watermark_dim // 2

    key = jax.random.PRNGKey(0)
    kx, kw, k1, k2, k3, k4 = jax.random.split(key, 6)

    x = jax.random.normal(kx, (B, C, T), jnp.float32)
    watermark = jax.random.normal(kw, (B, D), jnp.float32)

    params = {
        "conv1_w": 0.3 * jax.random.normal(k1, (H, 1, 3), jnp.float32),
        "conv1_b": 0.1 * jax.random.normal(k2, (H,), jnp.float32),
        "conv2_w": 0.2 * jax.random.normal(k3, (C, H, 1), jnp.float32),
        "conv2_b": 0.1 * jax.random.normal(k4, (C,), jnp.float32),
        "alpha": jnp.asarray(0.01, jnp.float32),
    }

    out = watermark_embedder(x, watermark, params,
                             max_batch_block=4, c_blocks=2)
    out = jax.block_until_ready(out)

    ref = _reference(x, watermark, params)
    np.testing.assert_allclose(np.asarray(out), np.asarray(ref),
                               rtol=1e-4, atol=1e-4)
    print("KERNEL_OK")
</pallas_src>

<mosaic_0001>
module attributes {stable_mosaic.version = 11 : i64} {
  func.func @_embedder_kernel(%arg0: i32, %arg1: i32, %arg2: memref<4x64x36xf32, #tpu.memory_space<vmem>>, %arg3: memref<4x1x128xf32, #tpu.memory_space<vmem>>, %arg4: memref<3x64x1xf32, #tpu.memory_space<vmem>>, %arg5: memref<64x1xf32, #tpu.memory_space<vmem>>, %arg6: memref<64x64xf32, #tpu.memory_space<vmem>>, %arg7: memref<64x1xf32, #tpu.memory_space<vmem>>, %arg8: memref<128x36xf32, #tpu.memory_space<vmem>>, %arg9: memref<4x64x36xf32, #tpu.memory_space<vmem>>) attributes {dimension_semantics = [#tpu.dimension_semantics<parallel>, #tpu.dimension_semantics<parallel>], iteration_bounds = array<i64: 2, 2>, scalar_prefetch = 0 : i64, scratch_operands = 0 : i64, tpu.core_type = #tpu.core_type<tc>, window_params = [{transform_indices = @transform_0, window_bounds = array<i64: 4, 64, 36>}, {transform_indices = @transform_1, window_bounds = array<i64: 4, 1, 128>}, {pipeline_mode = #tpu.pipeline_mode<synchronous>, transform_indices = @transform_2, window_bounds = array<i64: 3, 64, 1>}, {pipeline_mode = #tpu.pipeline_mode<synchronous>, transform_indices = @transform_3, window_bounds = array<i64: 64, 1>}, {transform_indices = @transform_4, window_bounds = array<i64: 64, 64>}, {transform_indices = @transform_5, window_bounds = array<i64: 64, 1>}, {pipeline_mode = #tpu.pipeline_mode<synchronous>, transform_indices = @transform_6, window_bounds = array<i64: 128, 36>}, {transform_indices = @transform_7, window_bounds = array<i64: 4, 64, 36>}]} {
    %c0 = arith.constant 0 : index
    %c0_0 = arith.constant 0 : index
    %c0_1 = arith.constant 0 : index
    %0 = vector.load %arg3[%c0, %c0_0, %c0_1] : memref<4x1x128xf32, #tpu.memory_space<vmem>>, vector<4x1x128xf32>
    %c0_2 = arith.constant 0 : index
    %c0_3 = arith.constant 0 : index
    %c0_4 = arith.constant 0 : index
    %1 = vector.load %arg3[%c0_2, %c0_3, %c0_4] : memref<4x1x128xf32, #tpu.memory_space<vmem>>, vector<4x1x128xf32>
    %2 = vector.shape_cast %1 : vector<4x1x128xf32> to vector<4x128xf32>
    %3 = tpu.iota {dimensions = array<i32: 1>} : vector<4x128xi32>
    %c0_i32 = arith.constant 0 : i32
    %4 = vector.broadcast %c0_i32 : i32 to vector<4x128xi32>
    %5 = arith.cmpi eq, %3, %4 : vector<4x128xi32>
    %c1_i32 = arith.constant 1 : i32
    %6 = tpu.dynamic_rotate %2 by %c1_i32 dim 1 : vector<4x128xf32>, i32 -> vector<4x128xf32>
    %cst = arith.constant 0.000000e+00 : f32
    %7 = vector.broadcast %cst : f32 to vector<4x128xf32>
    %8 = arith.select %5, %7, %6 : vector<4x128xi1>, vector<4x128xf32>
    %9 = vector.shape_cast %8 : vector<4x128xf32> to vector<4x1x128xf32>
    %c127_i32 = arith.constant 127 : i32
    %10 = vector.broadcast %c127_i32 : i32 to vector<4x128xi32>
    %11 = arith.cmpi eq, %3, %10 : vector<4x128xi32>
    %c127_i32_5 = arith.constant 127 : i32
    %12 = tpu.dynamic_rotate %2 by %c127_i32_5 dim 1 : vector<4x128xf32>, i32 -> vector<4x128xf32>
    %cst_6 = arith.constant 0.000000e+00 : f32
    %13 = vector.broadcast %cst_6 : f32 to vector<4x128xf32>
    %14 = arith.select %11, %13, %12 : vector<4x128xi1>, vector<4x128xf32>
    %15 = vector.shape_cast %14 : vector<4x128xf32> to vector<4x1x128xf32>
    %c0_7 = arith.constant 0 : index
    %c0_8 = arith.constant 0 : index
    %c0_9 = arith.constant 0 : index
    %16 = vector.load %arg4[%c0_7, %c0_8, %c0_9] : memref<3x64x1xf32, #tpu.memory_space<vmem>>, vector<3x64x1xf32>
    %c0_10 = arith.constant 0 : index
    %c0_11 = arith.constant 0 : index
    %17 = vector.load %arg5[%c0_10, %c0_11] : memref<64x1xf32, #tpu.memory_space<vmem>>, vector<64x1xf32>
    %18 = vector.extract_strided_slice %16 {offsets = [0, 0, 0], sizes = [1, 64, 1], strides = [1, 1, 1]} : vector<3x64x1xf32> to vector<1x64x1xf32>
    %19 = vector.shape_cast %18 : vector<1x64x1xf32> to vector<64x1xf32>
    %20 = vector.shape_cast %19 : vector<64x1xf32> to vector<1x64x1xf32>
    %21 = vector.broadcast %20 : vector<1x64x1xf32> to vector<4x64x128xf32>
    %22 = vector.broadcast %9 : vector<4x1x128xf32> to vector<4x64x128xf32>
    %23 = arith.mulf %21, %22 : vector<4x64x128xf32>
    %24 = vector.extract_strided_slice %16 {offsets = [1, 0, 0], sizes = [1, 64, 1], strides = [1, 1, 1]} : vector<3x64x1xf32> to vector<1x64x1xf32>
    %25 = vector.shape_cast %24 : vector<1x64x1xf32> to vector<64x1xf32>
    %26 = vector.shape_cast %25 : vector<64x1xf32> to vector<1x64x1xf32>
    %27 = vector.broadcast %26 : vector<1x64x1xf32> to vector<4x64x128xf32>
    %28 = vector.broadcast %0 : vector<4x1x128xf32> to vector<4x64x128xf32>
    %29 = arith.mulf %27, %28 : vector<4x64x128xf32>
    %30 = arith.addf %23, %29 : vector<4x64x128xf32>
    %31 = vector.extract_strided_slice %16 {offsets = [2, 0, 0], sizes = [1, 64, 1], strides = [1, 1, 1]} : vector<3x64x1xf32> to vector<1x64x1xf32>
    %32 = vector.shape_cast %31 : vector<1x64x1xf32> to vector<64x1xf32>
    %33 = vector.shape_cast %32 : vector<64x1xf32> to vector<1x64x1xf32>
    %34 = vector.broadcast %33 : vector<1x64x1xf32> to vector<4x64x128xf32>
    %35 = vector.broadcast %15 : vector<4x1x128xf32> to vector<4x64x128xf32>
    %36 = arith.mulf %34, %35 : vector<4x64x128xf32>
    %37 = arith.addf %30, %36 : vector<4x64x128xf32>
    %38 = vector.shape_cast %17 : vector<64x1xf32> to vector<1x64x1xf32>
    %39 = vector.broadcast %38 : vector<1x64x1xf32> to vector<4x64x128xf32>
    %40 = arith.addf %37, %39 : vector<4x64x128xf32>
    %cst_12 = arith.constant 5.000000e-01 : f32
    %41 = vector.broadcast %cst_12 : f32 to vector<4x64x128xf32>
    %42 = arith.mulf %41, %40 : vector<4x64x128xf32>
    %cst_13 = arith.constant 0.707106769 : f32
    %43 = vector.broadcast %cst_13 : f32 to vector<4x64x128xf32>
    %44 = arith.mulf %40, %43 : vector<4x64x128xf32>
    %cst_14 = arith.constant 0.000000e+00 : f32
    %45 = vector.broadcast %cst_14 : f32 to vector<4x64x128xf32>
    %46 = arith.cmpf oge, %44, %45 : vector<4x64x128xf32>
    %cst_15 = arith.constant 1.000000e+00 : f32
    %cst_16 = arith.constant -1.000000e+00 : f32
    %47 = vector.broadcast %cst_15 : f32 to vector<4x64x128xf32>
    %48 = vector.broadcast %cst_16 : f32 to vector<4x64x128xf32>
    %49 = arith.select %46, %47, %48 : vector<4x64x128xi1>, vector<4x64x128xf32>
    %50 = math.absf %44 : vector<4x64x128xf32>
    %cst_17 = arith.constant 0.327591091 : f32
    %51 = vector.broadcast %cst_17 : f32 to vector<4x64x128xf32>
    %52 = arith.mulf %51, %50 : vector<4x64x128xf32>
    %cst_18 = arith.constant 1.000000e+00 : f32
    %53 = vector.broadcast %cst_18 : f32 to vector<4x64x128xf32>
    %54 = arith.addf %53, %52 : vector<4x64x128xf32>
    %55 = tpu.reciprocal %54 {approx = true} : vector<4x64x128xf32> -> vector<4x64x128xf32>
    %cst_19 = arith.constant 1.06140542 : f32
    %56 = vector.broadcast %cst_19 : f32 to vector<4x64x128xf32>
    %57 = arith.mulf %56, %55 : vector<4x64x128xf32>
    %cst_20 = arith.constant -1.45315206 : f32
    %58 = vector.broadcast %cst_20 : f32 to vector<4x64x128xf32>
    %59 = arith.addf %57, %58 : vector<4x64x128xf32>
    %60 = arith.mulf %59, %55 : vector<4x64x128xf32>
    %cst_21 = arith.constant 1.42141378 : f32
    %61 = vector.broadcast %cst_21 : f32 to vector<4x64x128xf32>
    %62 = arith.addf %60, %61 : vector<4x64x128xf32>
    %63 = arith.mulf %62, %55 : vector<4x64x128xf32>
    %cst_22 = arith.constant -0.284496725 : f32
    %64 = vector.broadcast %cst_22 : f32 to vector<4x64x128xf32>
    %65 = arith.addf %63, %64 : vector<4x64x128xf32>
    %66 = arith.mulf %65, %55 : vector<4x64x128xf32>
    %cst_23 = arith.constant 0.254829586 : f32
    %67 = vector.broadcast %cst_23 : f32 to vector<4x64x128xf32>
    %68 = arith.addf %66, %67 : vector<4x64x128xf32>
    %69 = arith.mulf %68, %55 : vector<4x64x128xf32>
    %cst_24 = arith.constant 0.000000e+00 : f32
    %70 = vector.broadcast %cst_24 : f32 to vector<4x64x128xf32>
    %71 = arith.subf %70, %50 : vector<4x64x128xf32>
    %72 = arith.mulf %71, %50 : vector<4x64x128xf32>
    %73 = math.exp %72 : vector<4x64x128xf32>
    %74 = arith.mulf %69, %73 : vector<4x64x128xf32>
    %cst_25 = arith.constant 1.000000e+00 : f32
    %75 = vector.broadcast %cst_25 : f32 to vector<4x64x128xf32>
    %76 = arith.subf %75, %74 : vector<4x64x128xf32>
    %77 = arith.mulf %49, %76 : vector<4x64x128xf32>
    %cst_26 = arith.constant 1.000000e+00 : f32
    %78 = vector.broadcast %cst_26 : f32 to vector<4x64x128xf32>
    %79 = arith.addf %78, %77 : vector<4x64x128xf32>
    %80 = arith.mulf %42, %79 : vector<4x64x128xf32>
    %81 = vector.shape_cast %80 : vector<4x64x128xf32> to vector<256x128xf32>
    %c0_27 = arith.constant 0 : index
    %c0_28 = arith.constant 0 : index
    %82 = vector.load %arg8[%c0_27, %c0_28] : memref<128x36xf32, #tpu.memory_space<vmem>>, vector<128x36xf32>
    %cst_29 = arith.constant dense<0.000000e+00> : vector<256x36xf32>
    %83 = tpu.matmul %81, %82, %cst_29 {dimension_numbers = #tpu.dot_dimension_numbers<[1], [0], [0], [1], [0, 0, 1, 1], [], []>} : vector<256x128xf32>, vector<128x36xf32>, vector<256x36xf32> -> vector<256x36xf32>
    %c0_30 = arith.constant 0 : index
    %c0_31 = arith.constant 0 : index
    %84 = vector.load %arg6[%c0_30, %c0_31] : memref<64x64xf32, #tpu.memory_space<vmem>>, vector<64x64xf32>
    %c0_32 = arith.constant 0 : index
    %c0_33 = arith.constant 0 : index
    %85 = vector.load %arg7[%c0_32, %c0_33] : memref<64x1xf32, #tpu.memory_space<vmem>>, vector<64x1xf32>
    %86 = vector.shape_cast %85 : vector<64x1xf32> to vector<64x1xf32>
    %87 = vector.broadcast %86 : vector<64x1xf32> to vector<64x36xf32>
    %88 = vector.extract_strided_slice %83 {offsets = [0, 0], sizes = [64, 36], strides = [1, 1]} : vector<256x36xf32> to vector<64x36xf32>
    %cst_34 = arith.constant dense<0.000000e+00> : vector<64x36xf32>
    %89 = tpu.matmul %84, %88, %cst_34 {dimension_numbers = #tpu.dot_dimension_numbers<[1], [0], [0], [1], [0, 0, 1, 1], [], []>} : vector<64x64xf32>, vector<64x36xf32>, vector<64x36xf32> -> vector<64x36xf32>
    %90 = arith.addf %89, %87 : vector<64x36xf32>
    %c0_35 = arith.constant 0 : index
    %c0_36 = arith.constant 0 : index
    %c0_37 = arith.constant 0 : index
    %91 = vector.load %arg2[%c0_35, %c0_36, %c0_37] : memref<4x64x36xf32, #tpu.memory_space<vmem>>, vector<1x64x36xf32>
    %92 = vector.shape_cast %91 : vector<1x64x36xf32> to vector<64x36xf32>
    %93 = arith.addf %92, %90 : vector<64x36xf32>
    %c0_38 = arith.constant 0 : index
    %c0_39 = arith.constant 0 : index
    %c0_40 = arith.constant 0 : index
    %94 = vector.load %arg9[%c0_38, %c0_39, %c0_40] : memref<4x64x36xf32, #tpu.memory_space<vmem>>, vector<1x64x36xf32>
    %95 = vector.shape_cast %94 : vector<1x64x36xf32> to vector<64x36xf32>
    %96 = vector.shape_cast %93 : vector<64x36xf32> to vector<1x64x36xf32>
    tpu.vector_store %arg9[%c0_38, %c0_39, %c0_40], %96 {strides = array<i32>} : memref<4x64x36xf32, #tpu.memory_space<vmem>>, vector<1x64x36xf32>,
    %97 = vector.extract_strided_slice %83 {offsets = [64, 0], sizes = [64, 36], strides = [1, 1]} : vector<256x36xf32> to vector<64x36xf32>
    %cst_41 = arith.constant dense<0.000000e+00> : vector<64x36xf32>
    %98 = tpu.matmul %84, %97, %cst_41 {dimension_numbers = #tpu.dot_dimension_numbers<[1], [0], [0], [1], [0, 0, 1, 1], [], []>} : vector<64x64xf32>, vector<64x36xf32>, vector<64x36xf32> -> vector<64x36xf32>
    %99 = arith.addf %98, %87 : vector<64x36xf32>
    %c1 = arith.constant 1 : index
    %c0_42 = arith.constant 0 : index
    %c0_43 = arith.constant 0 : index
    %100 = vector.load %arg2[%c1, %c0_42, %c0_43] : memref<4x64x36xf32, #tpu.memory_space<vmem>>, vector<1x64x36xf32>
    %101 = vector.shape_cast %100 : vector<1x64x36xf32> to vector<64x36xf32>
    %102 = arith.addf %101, %99 : vector<64x36xf32>
    %c1_44 = arith.constant 1 : index
    %c0_45 = arith.constant 0 : index
    %c0_46 = arith.constant 0 : index
    %103 = vector.load %arg9[%c1_44, %c0_45, %c0_46] : memref<4x64x36xf32, #tpu.memory_space<vmem>>, vector<1x64x36xf32>
    %104 = vector.shape_cast %103 : vector<1x64x36xf32> to vector<64x36xf32>
    %105 = vector.shape_cast %102 : vector<64x36xf32> to vector<1x64x36xf32>
    tpu.vector_store %arg9[%c1_44, %c0_45, %c0_46], %105 {strides = array<i32>} : memref<4x64x36xf32, #tpu.memory_space<vmem>>, vector<1x64x36xf32>,
    %106 = vector.extract_strided_slice %83 {offsets = [128, 0], sizes = [64, 36], strides = [1, 1]} : vector<256x36xf32> to vector<64x36xf32>
    %cst_47 = arith.constant dense<0.000000e+00> : vector<64x36xf32>
    %107 = tpu.matmul %84, %106, %cst_47 {dimension_numbers = #tpu.dot_dimension_numbers<[1], [0], [0], [1], [0, 0, 1, 1], [], []>} : vector<64x64xf32>, vector<64x36xf32>, vector<64x36xf32> -> vector<64x36xf32>
    %108 = arith.addf %107, %87 : vector<64x36xf32>
    %c2 = arith.constant 2 : index
    %c0_48 = arith.constant 0 : index
    %c0_49 = arith.constant 0 : index
    %109 = vector.load %arg2[%c2, %c0_48, %c0_49] : memref<4x64x36xf32, #tpu.memory_space<vmem>>, vector<1x64x36xf32>
    %110 = vector.shape_cast %109 : vector<1x64x36xf32> to vector<64x36xf32>
    %111 = arith.addf %110, %108 : vector<64x36xf32>
    %c2_50 = arith.constant 2 : index
    %c0_51 = arith.constant 0 : index
    %c0_52 = arith.constant 0 : index
    %112 = vector.load %arg9[%c2_50, %c0_51, %c0_52] : memref<4x64x36xf32, #tpu.memory_space<vmem>>, vector<1x64x36xf32>
    %113 = vector.shape_cast %112 : vector<1x64x36xf32> to vector<64x36xf32>
    %114 = vector.shape_cast %111 : vector<64x36xf32> to vector<1x64x36xf32>
    tpu.vector_store %arg9[%c2_50, %c0_51, %c0_52], %114 {strides = array<i32>} : memref<4x64x36xf32, #tpu.memory_space<vmem>>, vector<1x64x36xf32>,
    %115 = vector.extract_strided_slice %83 {offsets = [192, 0], sizes = [64, 36], strides = [1, 1]} : vector<256x36xf32> to vector<64x36xf32>
    %cst_53 = arith.constant dense<0.000000e+00> : vector<64x36xf32>
    %116 = tpu.matmul %84, %115, %cst_53 {dimension_numbers = #tpu.dot_dimension_numbers<[1], [0], [0], [1], [0, 0, 1, 1], [], []>} : vector<64x64xf32>, vector<64x36xf32>, vector<64x36xf32> -> vector<64x36xf32>
    %117 = arith.addf %116, %87 : vector<64x36xf32>
    %c3 = arith.constant 3 : index
    %c0_54 = arith.constant 0 : index
    %c0_55 = arith.constant 0 : index
    %118 = vector.load %arg2[%c3, %c0_54, %c0_55] : memref<4x64x36xf32, #tpu.memory_space<vmem>>, vector<1x64x36xf32>
    %119 = vector.shape_cast %118 : vector<1x64x36xf32> to vector<64x36xf32>
    %120 = arith.addf %119, %117 : vector<64x36xf32>
    %c3_56 = arith.constant 3 : index
    %c0_57 = arith.constant 0 : index
    %c0_58 = arith.constant 0 : index
    %121 = vector.load %arg9[%c3_56, %c0_57, %c0_58] : memref<4x64x36xf32, #tpu.memory_space<vmem>>, vector<1x64x36xf32>
    %122 = vector.shape_cast %121 : vector<1x64x36xf32> to vector<64x36xf32>
    %123 = vector.shape_cast %120 : vector<64x36xf32> to vector<1x64x36xf32>
    tpu.vector_store %arg9[%c3_56, %c0_57, %c0_58], %123 {strides = array<i32>} : memref<4x64x36xf32, #tpu.memory_space<vmem>>, vector<1x64x36xf32>,
    return
  }
  func.func @transform_0(%arg0: i32, %arg1: i32) -> (i32, i32, i32) {
    %c0_i32 = arith.constant 0 : i32
    %c0_i32_0 = arith.constant 0 : i32
    return %arg0, %arg1, %c0_i32 : i32, i32, i32
  }
  func.func @transform_1(%arg0: i32, %arg1: i32) -> (i32, i32, i32) {
    %c0_i32 = arith.constant 0 : i32
    %c0_i32_0 = arith.constant 0 : i32
    %c0_i32_1 = arith.constant 0 : i32
    return %arg0, %c0_i32, %c0_i32_0 : i32, i32, i32
  }
  func.func @transform_2(%arg0: i32, %arg1: i32) -> (i32, i32, i32) {
    %c0_i32 = arith.constant 0 : i32
    %c0_i32_0 = arith.constant 0 : i32
    %c0_i32_1 = arith.constant 0 : i32
    %c0_i32_2 = arith.constant 0 : i32
    return %c0_i32, %c0_i32_0, %c0_i32_1 : i32, i32, i32
  }
  func.func @transform_3(%arg0: i32, %arg1: i32) -> (i32, i32) {
    %c0_i32 = arith.constant 0 : i32
    %c0_i32_0 = arith.constant 0 : i32
    %c0_i32_1 = arith.constant 0 : i32
    return %c0_i32, %c0_i32_0 : i32, i32
  }
  func.func @transform_4(%arg0: i32, %arg1: i32) -> (i32, i32) {
    %c0_i32 = arith.constant 0 : i32
    %c0_i32_0 = arith.constant 0 : i32
    return %arg1, %c0_i32 : i32, i32
  }
  func.func @transform_5(%arg0: i32, %arg1: i32) -> (i32, i32) {
    %c0_i32 = arith.constant 0 : i32
    %c0_i32_0 = arith.constant 0 : i32
    return %arg1, %c0_i32 : i32, i32
  }
  func.func @transform_6(%arg0: i32, %arg1: i32) -> (i32, i32) {
    %c0_i32 = arith.constant 0 : i32
    %c0_i32_0 = arith.constant 0 : i32
    %c0_i32_1 = arith.constant 0 : i32
    return %c0_i32, %c0_i32_0 : i32, i32
  }
  func.func @transform_7(%arg0: i32, %arg1: i32) -> (i32, i32, i32) {
    %c0_i32 = arith.constant 0 : i32
    %c0_i32_0 = arith.constant 0 : i32
    return %arg0, %arg1, %c0_i32 : i32, i32, i32
  }
}

</mosaic_0001>

<bundles_post_ra>
// kernel: tpu_custom_call.1
= control target key start
LH: loop header
LB: loop body
LE: loop exit
PB: predicated region body
PF: predicated region fallthrough
CT: control target
= control target key end

     0   :  { %s3806_s24 = smov 0   ;;  %s3808_s25 = smov 0   ;;  %s5483_s0 = inlined_call_operand.vmem [shape: f32[8,128,36], index: 0, kind: input, shape index: {}]   ;;  %s5484_s1 = inlined_call_operand.vmem [shape: f32[8,1,128], index: 1, kind: input, shape index: {}]   ;;  %s5485_s2 = inlined_call_operand.vmem [shape: f32[3,64,1], index: 2, kind: input, shape index: {}]   ;;  %s5486_s3 = inlined_call_operand.vmem [shape: f32[64,1], index: 3, kind: input, shape index: {}]   ;;  %s5487_s4 = inlined_call_operand.vmem [shape: f32[128,64], index: 4, kind: input, shape index: {}]   ;;  %s5488_s5 = inlined_call_operand.vmem [shape: f32[128,1], index: 5, kind: input, shape index: {}]   ;;  %s5489_s6 = inlined_call_operand.vmem [shape: f32[128,36], index: 6, kind: input, shape index: {}]   ;;  %s5490_s7 = inlined_call_operand.vmem [shape: f32[8,128,36], index: 7, kind: output, shape index: {}]  }
   0x1   :  { %s3810_s26 = smov 0   ;;  %s3812_s27 = smov 0  }
   0x2   :  { %s3814_s28 = smov 0   ;;  %s3816_s29 = smov 0  }
   0x3   :  { %s3818_s30 = smov 0  }
   0x4 LB: > { %s26_s8 = sadd.s32 1, %s3751_s28  ;;  %s29_s9 = sadd.s32 1, %s3755_s29  ;;  %s3759_s30 = sphi %s3818_s30, %s17_s30   ;;  %s3755_s29 = sphi %s3816_s29, %s5764_s29   ;;  %s3751_s28 = sphi %s3814_s28, %s5763_s28   ;;  %s3747_s27 = sphi %s3812_s27, %s5762_s27   ;;  %s3743_s26 = sphi %s3810_s26, %s5761_s26   ;;  %s3739_s25 = sphi %s3808_s25, %s5760_s25   ;;  %s3735_s24 = sphi %s3806_s24, %s5759_s24  }
   0x5   : > { %p27_p0 = scmp.ge.s32.totalorder %s26_s8, 2  ;;  %s3008_s10 = sadd.s32 4294967295, %s3759_s30  }
   0x6   : > { %p45_p1 = scmp.ne.s32.totalorder %s3739_s25, %s3735_s24  ;;  %p46_p2 = scmp.eq.s32.totalorder %s3759_s30, 0 }
   0x7   : > { %s5766_s8 = smov (%p27_p0, %s26_s8), 0  ;;  %s5768_s9 = smov (!%p27_p0, %s29_s9), %s3755_s29 }
   0x8   : > { %p31_p3 = scmp.ge.s32.totalorder %s5768_s9, 2  ;;  %p218_p4 = scmp.eq.s32.totalorder %s3008_s10, 3 }
   0x9   : > { %s34_s11 = ssub.s32 %s3751_s28, %s5766_s8  ;;  %p47_p5 = por %p46_p2, %p45_p1 }
   0xa   : > { %s5770_s9 = smov (%p31_p3, %s5768_s9), 0  ;;  %p3854_p6 = por %p218_p4, %p45_p1 }
   0xb   : > { %s33_s13 = ssub.s32 %s3755_s29, %s5770_s9  ;;  %s38_s15 = sadd.s32 1, %s3739_s25 }
   0xc   : > { %s35_s14 = sor.u32 %s34_s11, %s33_s13  ;;  %p3011_p8 = scmp.ge.s32.totalorder %s3759_s30, 4 }
   0xd   : > { %p36_p7 = scmp.eq.s32.totalorder %s35_s14, 0 }
   0xe   : > { %249 = sbr.rel (%p3011_p8) target bundleno = 44 (0x2c), region = 28 }
   0xf   : > { %s3862_s16 = scalar_select %p36_p7, %s3739_s25, %s38_s15  }
  0x15   : > { %252 = sbr.rel (!%p47_p5) target bundleno = 44 (0x2c), region = 32  ;;  %s254_s17 = sand.u32 (%p47_p5), 1, %s3739_s25  }
  0x16   : > { %s3014_s18 = sshll.u32 (%p47_p5), %s3751_s28, 3  ;;  %s3012_s19 = sshll.u32 (%p47_p5), %s254_s17, 8 }
  0x17   : > { %s3112_s20 = sshll.u32 (%p47_p5), %s3755_s29, 6  ;;  %s3876_s13 = scalar_lea.vmem (%p47_p5), [#allocation2], %s3012_s19 }
  0x18   : > { %s260_s21 = sadd.s32 (%p47_p5), %s3112_s20, %s3014_s18 }
  0x19   : > { %s3016_s22 = sshll.u32 (%p47_p5), %s260_s21, 3 }
  0x1a   : > { %s3871_s11 = scalar_lea.vmem (%p47_p5), %s5483_s0, %s3016_s22 }
  0x1b   : > { %v352_v0 = vld [vmem:[%s3871_s11] sm:$0xff] (%p47_p5)  ;;  %v354_v1 = vld [vmem:[%s3871_s11 + $0x8] sm:$0xff] (%p47_p5)  ;;  %v356_v2 = vld [vmem:[%s3871_s11 + $0x10] sm:$0xff] (%p47_p5) }
  0x1c   : > { %353 = vst [vmem:[%s3876_s13] sm:$0xff] %v352_v0  ;;  %355 = vst [vmem:[%s3876_s13 + $0x8] sm:$0xff] %v354_v1  ;;  %v358_v3 = vld [vmem:[%s3871_s11 + $0x18] sm:$0xff]  ;;  %v360_v4 = vld [vmem:[%s3871_s11 + $0x20] sm:$0xff] }
  0x1d   : > { %357 = vst [vmem:[%s3876_s13 + $0x10] sm:$0xff] %v356_v2  ;;  %v362_v5 = vld [vmem:[%s3871_s11 + $0x28] sm:$0xff]  ;;  %359 = vst [vmem:[%s3876_s13 + $0x18] sm:$0xff] %v358_v3  ;;  %v364_v6 = vld [vmem:[%s3871_s11 + $0x30] sm:$0xff] }
  0x1e   : > { %361 = vst [vmem:[%s3876_s13 + $0x20] sm:$0xff] %v360_v4  ;;  %363 = vst [vmem:[%s3876_s13 + $0x28] sm:$0xff] %v362_v5  ;;  %v366_v7 = vld [vmem:[%s3871_s11 + $0x38] sm:$0xff]  ;;  %v368_v8 = vld [vmem:[%s3871_s11 + $0x80] sm:$0xff] }
  0x1f   : > { %365 = vst [vmem:[%s3876_s13 + $0x30] sm:$0xff] %v364_v6  ;;  %367 = vst [vmem:[%s3876_s13 + $0x38] sm:$0xff] %v366_v7  ;;  %v370_v9 = vld [vmem:[%s3871_s11 + $0x88] sm:$0xff]  ;;  %v372_v10 = vld [vmem:[%s3871_s11 + $0x90] sm:$0xff] }
  0x20   : > { %369 = vst [vmem:[%s3876_s13 + $0x40] sm:$0xff] %v368_v8  ;;  %v374_v11 = vld [vmem:[%s3871_s11 + $0x98] sm:$0xff]  ;;  %371 = vst [vmem:[%s3876_s13 + $0x48] sm:$0xff] %v370_v9  ;;  %v376_v12 = vld [vmem:[%s3871_s11 + $0xa0] sm:$0xff] }
  0x21   : > { %373 = vst [vmem:[%s3876_s13 + $0x50] sm:$0xff] %v372_v10  ;;  %375 = vst [vmem:[%s3876_s13 + $0x58] sm:$0xff] %v374_v11  ;;  %v378_v13 = vld [vmem:[%s3871_s11 + $0xa8] sm:$0xff]  ;;  %v380_v14 = vld [vmem:[%s3871_s11 + $0xb0] sm:$0xff] }
  0x22   : > { %377 = vst [vmem:[%s3876_s13 + $0x60] sm:$0xff] %v376_v12  ;;  %379 = vst [vmem:[%s3876_s13 + $0x68] sm:$0xff] %v378_v13  ;;  %v382_v15 = vld [vmem:[%s3871_s11 + $0xb8] sm:$0xff]  ;;  %v384_v16 = vld [vmem:[%s3871_s11 + $0x100] sm:$0xff] }
  0x23   : > { %381 = vst [vmem:[%s3876_s13 + $0x70] sm:$0xff] %v380_v14  ;;  %v386_v17 = vld [vmem:[%s3871_s11 + $0x108] sm:$0xff]  ;;  %383 = vst [vmem:[%s3876_s13 + $0x78] sm:$0xff] %v382_v15  ;;  %v388_v18 = vld [vmem:[%s3871_s11 + $0x110] sm:$0xff] }
  0x24   : > { %385 = vst [vmem:[%s3876_s13 + $0x80] sm:$0xff] %v384_v16  ;;  %387 = vst [vmem:[%s3876_s13 + $0x88] sm:$0xff] %v386_v17  ;;  %v390_v19 = vld [vmem:[%s3871_s11 + $0x118] sm:$0xff]  ;;  %v392_v20 = vld [vmem:[%s3871_s11 + $0x120] sm:$0xff] }
  0x25   : > { %389 = vst [vmem:[%s3876_s13 + $0x90] sm:$0xff] %v388_v18  ;;  %391 = vst [vmem:[%s3876_s13 + $0x98] sm:$0xff] %v390_v19  ;;  %v394_v21 = vld [vmem:[%s3871_s11 + $0x128] sm:$0xff]  ;;  %v396_v22 = vld [vmem:[%s3871_s11 + $0x130] sm:$0xff] }
  0x26   : > { %393 = vst [vmem:[%s3876_s13 + $0xa0] sm:$0xff] %v392_v20  ;;  %v398_v23 = vld [vmem:[%s3871_s11 + $0x138] sm:$0xff]  ;;  %395 = vst [vmem:[%s3876_s13 + $0xa8] sm:$0xff] %v394_v21  ;;  %v400_v24 = vld [vmem:[%s3871_s11 + $0x180] sm:$0xff] }
  0x27   : > { %397 = vst [vmem:[%s3876_s13 + $0xb0] sm:$0xff] %v396_v22  ;;  %399 = vst [vmem:[%s3876_s13 + $0xb8] sm:$0xff] %v398_v23  ;;  %v402_v25 = vld [vmem:[%s3871_s11 + $0x188] sm:$0xff]  ;;  %v404_v26 = vld [vmem:[%s3871_s11 + $0x190] sm:$0xff] }
  0x28   : > { %401 = vst [vmem:[%s3876_s13 + $0xc0] sm:$0xff] %v400_v24  ;;  %403 = vst [vmem:[%s3876_s13 + $0xc8] sm:$0xff] %v402_v25  ;;  %v406_v27 = vld [vmem:[%s3871_s11 + $0x198] sm:$0xff]  ;;  %v408_v28 = vld [vmem:[%s3871_s11 + $0x1a0] sm:$0xff] }
  0x29   : > { %405 = vst [vmem:[%s3876_s13 + $0xd0] sm:$0xff] %v404_v26  ;;  %v410_v29 = vld [vmem:[%s3871_s11 + $0x1a8] sm:$0xff]  ;;  %407 = vst [vmem:[%s3876_s13 + $0xd8] sm:$0xff] %v406_v27  ;;  %v412_v30 = vld [vmem:[%s3871_s11 + $0x1b0] sm:$0xff] }
  0x2a   : > { %409 = vst [vmem:[%s3876_s13 + $0xe0] sm:$0xff] %v408_v28  ;;  %411 = vst [vmem:[%s3876_s13 + $0xe8] sm:$0xff] %v410_v29  ;;  %v414_v31 = vld [vmem:[%s3871_s11 + $0x1b8] sm:$0xff] }
  0x2b   : > { %413 = vst [vmem:[%s3876_s13 + $0xf0] sm:$0xff] %v412_v30  ;;  %415 = vst [vmem:[%s3876_s13 + $0xf8] sm:$0xff] %v414_v31 }
  0x2c PF: > { %p3017_p9 = scmp.ge.s32.totalorder %s3759_s30, 1  ;;  %p446_p10 = scmp.lt.s32.totalorder %s3759_s30, 5 }
  0x2e   : > { %p447_p11 = pnand %p3017_p9, %p446_p10 }
  0x30   : > { %450 = sbr.rel (%p447_p11) target bundleno = 927 (0x39f), region = 82 }
  0x37   : > { %v619_v32 = vld [vmem:[%s5485_s2 + $0x40] sm:$0xff]  ;;  %s3020_s19 = sshll.u32 %s3747_s27, 2  ;;  %v522_v34 = vlaneseq  ;;  %v3761_v35 = vmov 0   ;;  %v3762_v36 = vmov 1966171168   ;;  %v612_v39 = vld [vmem:[%s5485_s2 + $0x8] sm:$0xff] }
  0x38   : > { %v611_v33 = vld [vmem:[%s5485_s2] sm:$0xff]  ;;  %3576 = vset.pattern.permute.xlu1 %v3761_v35  ;;  %3575 = vset.pattern.permute.xlu0 %v3761_v35  ;;  %p500_p12 = scmp.lt.s32.totalorder %s3020_s19, 7  ;;  %v532_v37 = vunpack.c.l.s4 %v3762_v36  ;;  %v620_v45 = vld [vmem:[%s5485_s2 + $0x48] sm:$0xff]  ;;  %v613_v54 = vld [vmem:[%s5485_s2 + $0x10] sm:$0xff]  ;;  %s3764_s22 = smov 127  }
  0x39   : > { %737 = vperm.xlu1 %3576, %v619_v32   ;;  %645 = vperm.xlu0 %3575, %v611_v33   ;;  %v3949_v38 = vshrl.u32 %v522_v34, 7  ;;  %v627_v51 = vld [vmem:[%s5485_s2 + $0x80] sm:$0xff]  ;;  %v614_v55 = vld [vmem:[%s5485_s2 + $0x18] sm:$0xff]  ;;  %v628_v56 = vld [vmem:[%s5485_s2 + $0x88] sm:$0xff]  ;;  %s4033_s17 = sshll.u32 %s3743_s26, 3 }
  0x3a   : > { %s5772_s19 = smov (!%p500_p12, %s3020_s19), 7  ;;  %v533_v40 = vunpack.c.0.s8 %v532_v37  ;;  %v629_v57 = vld [vmem:[%s5485_s2 + $0x90] sm:$0xff]  ;;  %v630_v59 = vld [vmem:[%s5485_s2 + $0x98] sm:$0xff]  ;;  %v615_v61 = vld [vmem:[%s5485_s2 + $0x20] sm:$0xff]  ;;  %p505_p13 = scmp.lt.s32.totalorder %s4033_s17, 15 }
  0x3b   : > { %s502_s10 = scalar_lea.vmem %s5484_s1, %s5772_s19  ;;  %s3763_s19 = smov 1   ;;  %v621_v58 = vld [vmem:[%s5485_s2 + $0x50] sm:$0xff]  ;;  %v622_v60 = vld [vmem:[%s5485_s2 + $0x58] sm:$0xff]  ;;  %v635_v62 = vld [vmem:[%s5486_s3] sm:$0xff] }
  0x3c   : > { %v3957_v41 = vld [vmem:[%s502_s10] sm:$0x1]  ;;  %v3959_v42 = vld [vmem:[%s502_s10 + $0x1] sm:$0x1]  ;;  %v3961_v43 = vld [vmem:[%s502_s10 + $0x2] sm:$0x1]  ;;  %v3964_v44 = vsub.s32 %v533_v40, %v3949_v38 }
  0x3d   : > { %650 = vperm.xlu1 %3576, %v612_v39   ;;  %v3969_v46 = vld [vmem:[%s502_s10 + $0x3] sm:$0x1]  ;;  %v529_v47 = vcombine.low %v3957_v41, %v3959_v42  ;;  %v616_v63 = vld [vmem:[%s5485_s2 + $0x28] sm:$0xff]  ;;  %v617_v5 = vld [vmem:[%s5485_s2 + $0x30] sm:$0xff]  ;;  %s4049_s11 = scalar_select %p505_p13, %s4033_s17, 15  ;;  %v4110_v39 = vsub.s32 0, %v3949_v38 }
  0x3e   : > { %v530_v48 = vcombine.low %v3961_v43, %v3969_v46  ;;  %v636_v0 = vld [vmem:[%s5486_s3 + $0x8] sm:$0xff]  ;;  %v631_v1 = vld [vmem:[%s5485_s2 + $0xa0] sm:$0xff]  ;;  %v637_v6 = vld [vmem:[%s5486_s3 + $0x10] sm:$0xff] }
  0x3f   : > { %v537_v49 = vrot.slane %v529_v47, %v3964_v44  ;;  %v623_v2 = vld [vmem:[%s5485_s2 + $0x60] sm:$0xff]  ;;  %v632_v3 = vld [vmem:[%s5485_s2 + $0xa8] sm:$0xff]  ;;  %v618_v7 = vld [vmem:[%s5485_s2 + $0x38] sm:$0xff]  ;;  %v4114_v40 = vrot.slane %v3961_v43, %v4110_v39  ;;  %v523_v47 = vand.u32 127, %v522_v34 }
  0x40   : > { %v544_v50 = vrot.slane %v530_v48, %v3964_v44  ;;  %v624_v4 = vld [vmem:[%s5485_s2 + $0x68] sm:$0xff]  ;;  %v638_v8 = vld [vmem:[%s5486_s3 + $0x18] sm:$0xff]  ;;  %v633_v9 = vld [vmem:[%s5485_s2 + $0xb0] sm:$0xff] }
  0x41   : > { %742 = vperm.xlu1 %3576, %v620_v45   ;;  %v625_v10 = vld [vmem:[%s5485_s2 + $0x70] sm:$0xff]  ;;  %v634_v11 = vld [vmem:[%s5485_s2 + $0xb8] sm:$0xff]  ;;  %v639_v14 = vld [vmem:[%s5486_s3 + $0x20] sm:$0xff]  ;;  %v4118_v45 = vrot.slane %v3969_v46, %v4110_v39  ;;  %vm524_vm0 = vcmp.eq.s32.totalorder %v523_v47, 0  ;;  %vm582_vm1 = vcmp.eq.s32.totalorder %v523_v47, 127 }
  0x42   : > { %v545_v52 = vcombine.low %v537_v49, %v544_v50  ;;  %v626_v12 = vld [vmem:[%s5485_s2 + $0x78] sm:$0xff]  ;;  %v641_v13 = vld [vmem:[%s5486_s3 + $0x30] sm:$0xff]  ;;  %v640_v16 = vld [vmem:[%s5486_s3 + $0x28] sm:$0xff] }
  0x43   : > { %v642_v18 = vld [vmem:[%s5486_s3 + $0x38] sm:$0xff]  ;;  %v1887_v19 = vld [vmem:[%s5489_s6] sm:$0xff]  ;;  %v1888_v20 = vld [vmem:[%s5489_s6 + $0x8] sm:$0xff] }
  0x44   : > { %v552_v53 = vrot.slane %v545_v52, %v3964_v44  ;;  %v3418_v22 = vpack.c.bf16 %v1888_v20, %v1887_v19  ;;  %v1889_v26 = vld [vmem:[%s5489_s6 + $0x10] sm:$0xff]  ;;  %v1890_v27 = vld [vmem:[%s5489_s6 + $0x18] sm:$0xff]  ;;  %v1891_v30 = vld [vmem:[%s5489_s6 + $0x20] sm:$0xff] }
  0x45   : > { %861 = vperm.xlu1 %3576, %v627_v51   ;;  %v3422_v28 = vpack.c.bf16 %v1890_v27, %v1889_v26  ;;  %v1892_v31 = vld [vmem:[%s5489_s6 + $0x28] sm:$0xff]  ;;  %v1893_v35 = vld [vmem:[%s5489_s6 + $0x30] sm:$0xff]  ;;  %v1894_v36 = vld [vmem:[%s5489_s6 + $0x38] sm:$0xff] }
  0x46   : > { %554 = vrot.lane.b32.xlu0 %v552_v53, %s3763_s19  ;;  %s3022_s19 = sshll.u32 %s4049_s11, 3  ;;  %3419 = vmatprep.subr.bf16.mxu0 %v3418_v22  ;;  %v3426_v32 = vpack.c.bf16 %v1892_v31, %v1891_v30  ;;  %v3430_v37 = vpack.c.bf16 %v1894_v36, %v1893_v35  ;;  %v1895_v48 = vld [vmem:[%s5489_s6 + $0x40] sm:$0xff]  ;;  %v1896_v49 = vld [vmem:[%s5489_s6 + $0x48] sm:$0xff]  ;;  %v1897_v46 = vld [vmem:[%s5489_s6 + $0x50] sm:$0xff]  ;;  %s453_s11 = sand.u32 1, %s3735_s24  }
  0x47   : > { %s4066_s26 = scalar_lea.vmem %s5488_s5, %s3022_s19  ;;  %3421 = vmatpush3.bf16.msra.mxu0 %v3418_v22  ;;  %v3434_v43 = vpack.c.bf16 %v1896_v49, %v1895_v48  ;;  %v1898_v52 = vld [vmem:[%s5489_s6 + $0x58] sm:$0xff]  ;;  %s5149_s14 = scalar_lea.vmem %s5487_s4, %s3022_s19 }
  0x48   : > { %v2136_v15 = vld [vmem:[%s4066_s26] sm:$0xff]  ;;  %v2138_v17 = vld [vmem:[%s4066_s26 + $0x10] sm:$0xff]  ;;  %v2137_v23 = vld [vmem:[%s4066_s26 + $0x8] sm:$0xff]  ;;  %3423 = vmatprep.subr.bf16.mxu0 %v3422_v28  ;;  %s3018_s19 = sshll.u32 %s453_s11, 8 }
  0x49   : > { %655 = vperm.xlu1 %3576, %v613_v54   ;;  %v2140_v21 = vld [vmem:[%s4066_s26 + $0x20] sm:$0xff]  ;;  %v2142_v24 = vld [vmem:[%s4066_s26 + $0x30] sm:$0xff]  ;;  %v2139_v25 = vld [vmem:[%s4066_s26 + $0x18] sm:$0xff]  ;;  %s5247_s15 = scalar_lea.vmem [#allocation2], %s3018_s19  ;;  %s5256_s24 = scalar_lea.vmem [#allocation3], %s3018_s19 }
  0x4a   : > { %583 = vrot.lane.b32.xlu0 %v552_v53, %s3764_s22  ;;  %v2141_v29 = vld [vmem:[%s4066_s26 + $0x28] sm:$0xff]  ;;  %v2143_v33 = vld [vmem:[%s4066_s26 + $0x38] sm:$0xff]  ;;  %s3113_s26 = sshll.u32 (%p3854_p6), %s3747_s27, 6 }
  0x4b   : > { %3425 = vmatpush3.bf16.msra.mxu0 %v3422_v28  ;;  %s2742_s12 = sadd.s32 (%p3854_p6), %s3113_s26, %s4033_s17 }
  0x4c   : > { %3427 = vmatprep.subr.bf16.mxu0 %v3426_v32  ;;  %s3109_s18 = sshll.u32 (%p3854_p6), %s2742_s12, 3 }
  0x4d   : > { %660 = vperm.xlu1 %3576, %v614_v55   ;;  %v3438_v55 = vpack.c.bf16 %v1898_v52, %v1897_v46  ;;  %s5405_s22 = scalar_lea.vmem (%p3854_p6), %s5490_s7, %s3109_s18 }
  0x4e   : > { %866 = vperm.xlu0 %3575, %v628_v56  }
  0x4f   : > { %3429 = vmatpush3.bf16.msra.mxu0 %v3426_v32 }
  0x50   : > { %3431 = vmatprep.subr.bf16.mxu0 %v3430_v37 }
  0x51   : > { %871 = vperm.xlu1 %3576, %v629_v57  }
  0x52   : > { %747 = vperm.xlu0 %3575, %v621_v58   ;;  %v4148_v58 = vrot.slane %v3957_v41, %v4110_v39  ;;  %v4159_v41 = vrot.slane %v3959_v42, %v4110_v39  ;;  %v1902_v42 = vld [vmem:[%s5489_s6 + $0x78] sm:$0xff] }
  0x53   : > { %3433 = vmatpush3.bf16.msra.mxu0 %v3430_v37 }
  0x54   : > { %3435 = vmatprep.subr.bf16.mxu0 %v3434_v43 }
  0x55   : > { %876 = vperm.xlu1 %3576, %v630_v59   ;;  %v1899_v59 = vld [vmem:[%s5489_s6 + $0x60] sm:$0xff] }
  0x56   : > { %752 = vperm.xlu0 %3575, %v622_v60   ;;  %v1900_v60 = vld [vmem:[%s5489_s6 + $0x68] sm:$0xff] }
  0x57   : > { %3437 = vmatpush3.bf16.msra.mxu0 %v3434_v43 }
  0x58   : > { %3439 = vmatprep.subr.bf16.mxu0 %v3438_v55 }
  0x59   : > { %665 = vperm.xlu1 %3576, %v615_v61  }
  0x5a   : > { %985 = vperm.xlu0 %3575, %v635_v62  }
  0x5b   : > { %3441 = vmatpush3.bf16.msra.mxu0 %v3438_v55 }
  0x5d   : > { %670 = vperm.xlu1 %3576, %v616_v63  }
  0x5e   : > { %990 = vperm.xlu0 %3575, %v636_v0  }
  0x61   : > { %881 = vperm.xlu1 %3576, %v631_v1   ;;  %v3442_v1 = vpack.c.bf16 %v1900_v60, %v1899_v59 }
  0x62   : > { %757 = vperm.xlu0 %3575, %v623_v2  }
  0x63   : > { %3443 = vmatprep.subr.bf16.mxu0 %v3442_v1 }
  0x64   : > { %3445 = vmatpush3.bf16.msra.mxu0 %v3442_v1 }
  0x65   : > { %886 = vperm.xlu1 %3576, %v632_v3  }
  0x66   : > { %762 = vperm.xlu0 %3575, %v624_v4  }
  0x69   : > { %675 = vperm.xlu1 %3576, %v617_v5  }
  0x6a   : > { %995 = vperm.xlu0 %3575, %v637_v6  }
  0x6d   : > { %680 = vperm.xlu1 %3576, %v618_v7  }
  0x6e   : > { %1000 = vperm.xlu0 %3575, %v638_v8   ;;  %v1901_v8 = vld [vmem:[%s5489_s6 + $0x70] sm:$0xff] }
  0x71   : > { %891 = vperm.xlu1 %3576, %v633_v9  }
  0x72   : > { %767 = vperm.xlu0 %3575, %v625_v10  }
  0x75   : > { %896 = vperm.xlu1 %3576, %v634_v11   ;;  %v3446_v11 = vpack.c.bf16 %v1902_v42, %v1901_v8 }
  0x76   : > { %772 = vperm.xlu0 %3575, %v626_v12  }
  0x77   : > { %3447 = vmatprep.subr.bf16.mxu0 %v3446_v11 }
  0x78   : > { %3449 = vmatpush3.bf16.msra.mxu0 %v3446_v11 }
  0x79   : > { %1015 = vperm.xlu1 %3576, %v641_v13  }
  0x7a   : > { %1005 = vperm.xlu0 %3575, %v639_v14  }
  0x7d   : > { %2146 = vperm.xlu1 %3576, %v2136_v15  }
  0x7e   : > { %1010 = vperm.xlu0 %3575, %v640_v16  }
  0x81   : > { %2156 = vperm.xlu1 %3576, %v2138_v17  }
  0x82   : > { %1020 = vperm.xlu0 %3575, %v642_v18  }
  0x85   : > { %2166 = vperm.xlu1 %3576, %v2140_v21  }
  0x86   : > { %2151 = vperm.xlu0 %3575, %v2137_v23  }
  0x89   : > { %2176 = vperm.xlu1 %3576, %v2142_v24  }
  0x8a   : > { %2161 = vperm.xlu0 %3575, %v2139_v25  }
  0x8e   : > { %2171 = vperm.xlu0 %3575, %v2141_v29  }
  0x92   : > { %2181 = vperm.xlu0 %3575, %v2143_v33  }
  0xb8   : > { %v4127_v38 = vpop.permute.xlu1 %737  ;;  %v4129_v50 = vpop.permute.xlu0 %645 }
  0xb9   : > { %v4133_v51 = vmul.f32 %v4114_v40, %v4127_v38  ;;  %v4137_v34 = vmul.f32 %v4118_v45, %v4127_v38  ;;  %v795_v35 = vmul.f32 %v4148_v58, %v4127_v38  ;;  %v803_v47 = vmul.f32 %v4159_v41, %v4127_v38 }
  0xbc   : > { %v651_v53 = vpop.permute.xlu1 %650  ;;  %v555_v54 = vpop.permute.xlu0 %554 }
  0xbd   : > { %v556_v56 = vsel %vm524_vm0, 0.0, %v555_v54 }
  0xbe   : > { %v564_v57 = vrot.slane %v556_v56, %v3964_v44 }
  0xc0   : > { %v565_v61 = vcombine.high %v564_v57, %v564_v57  ;;  %v572_v62 = vrot.slane %v564_v57, %v3964_v44  ;;  %v743_v63 = vpop.permute.xlu1 %742  ;;  %v584_v0 = vpop.permute.xlu0 %583 }
  0xc1   : > { %v812_v2 = vmul.f32 %v4114_v40, %v743_v63  ;;  %v820_v3 = vmul.f32 %v4118_v45, %v743_v63  ;;  %v585_v7 = vsel %vm582_vm1, 0.0, %v584_v0  ;;  %v796_v9 = vmul.f32 %v4148_v58, %v743_v63 }
  0xc2   : > { %v579_v4 = vrot.slane %v565_v61, %v3964_v44  ;;  %v580_v5 = vcombine.high %v572_v62, %v572_v62  ;;  %v4165_v6 = vrot.slane %v572_v62, %v4110_v39  ;;  %v593_v10 = vrot.slane %v585_v7, %v3964_v44 }
  0xc3   : > { %v804_v17 = vmul.f32 %v4159_v41, %v743_v63 }
  0xc4   : > { %v581_v12 = vcombine.high %v579_v4, %v579_v4  ;;  %v4176_v13 = vrot.slane %v579_v4, %v4110_v39  ;;  %v4179_v14 = vrot.slane %v580_v5, %v4110_v39  ;;  %v704_v15 = vmul.f32 %v4165_v6, %v651_v53  ;;  %v862_v16 = vpop.permute.xlu1 %861 }
  0xc5   : > { %v594_v18 = vcombine.high %v593_v10, %v593_v10  ;;  %v601_v19 = vrot.slane %v593_v10, %v3964_v44  ;;  %v703_v20 = vmul.f32 %v4165_v6, %v4129_v50 }
  0xc6   : > { %v4187_v21 = vrot.slane %v581_v12, %v4110_v39  ;;  %v712_v22 = vmul.f32 %v4176_v13, %v651_v53  ;;  %v720_v23 = vmul.f32 %v4179_v14, %v651_v53  ;;  %v828_v24 = vadd.f32 %v796_v9, %v704_v15 }
  0xc7   : > { %v608_v25 = vrot.slane %v594_v18, %v3964_v44  ;;  %v609_v26 = vcombine.high %v601_v19, %v601_v19  ;;  %v4193_v27 = vrot.slane %v601_v19, %v4110_v39  ;;  %v711_v28 = vmul.f32 %v4176_v13, %v4129_v50 }
  0xc8   : > { %v728_v29 = vmul.f32 %v4187_v21, %v651_v53  ;;  %v836_v30 = vadd.f32 %v804_v17, %v712_v22  ;;  %v844_v31 = vadd.f32 %v812_v2, %v720_v23  ;;  %v656_v32 = vpop.permute.xlu1 %655  ;;  %v719_v33 = vmul.f32 %v4179_v14, %v4129_v50 }
  0xc9   : > { %v610_v44 = vcombine.high %v608_v25, %v608_v25  ;;  %v4203_v36 = vrot.slane %v608_v25, %v4110_v39  ;;  %v4206_v37 = vrot.slane %v609_v26, %v4110_v39  ;;  %v919_v49 = vmul.f32 %v4193_v27, %v862_v16 }
  0xca   : > { %v852_v48 = vadd.f32 %v820_v3, %v728_v29  ;;  %v721_v43 = vmul.f32 %v4179_v14, %v656_v32  ;;  %v729_v54 = vmul.f32 %v4187_v21, %v656_v32  ;;  %v727_v56 = vmul.f32 %v4187_v21, %v4129_v50 }
  0xcb   : > { %v4213_v46 = vrot.slane %v610_v44, %v4110_v39  ;;  %v927_v52 = vmul.f32 %v4203_v36, %v862_v16  ;;  %v935_v53 = vmul.f32 %v4206_v37, %v862_v16  ;;  %v835_v57 = vadd.f32 %v803_v47, %v711_v28 }
  0xcc   : > { %v661_v55 = vpop.permute.xlu1 %660  ;;  %v843_v38 = vadd.f32 %v4133_v51, %v719_v33  ;;  %v827_v59 = vadd.f32 %v795_v35, %v703_v20  ;;  %v851_v63 = vadd.f32 %v4137_v34, %v727_v56  ;;  %v705_v8 = vmul.f32 %v4165_v6, %v656_v32 }
  0xcd   : > { %v943_v60 = vmul.f32 %v4213_v46, %v862_v16  ;;  %v722_v61 = vmul.f32 %v4179_v14, %v661_v55  ;;  %v730_v39 = vmul.f32 %v4187_v21, %v661_v55  ;;  %v867_v62 = vpop.permute.xlu0 %866  ;;  %v959_v0 = vadd.f32 %v927_v52, %v835_v57 }
  0xce   : > { %v967_v1 = vadd.f32 %v935_v53, %v843_v38  ;;  %v920_v2 = vmul.f32 %v4193_v27, %v867_v62  ;;  %v928_v3 = vmul.f32 %v4203_v36, %v867_v62  ;;  %v936_v50 = vmul.f32 %v4206_v37, %v867_v62 }
  0xcf   : > { %v944_v51 = vmul.f32 %v4213_v46, %v867_v62  ;;  %v975_v5 = vadd.f32 %v943_v60, %v851_v63  ;;  %v4229_v7 = vadd.f32 %v919_v49, %v827_v59  ;;  %v713_v42 = vmul.f32 %v4176_v13, %v656_v32 }
  0xd0   : > { %v872_v4 = vpop.permute.xlu1 %871  ;;  %v952_v11 = vadd.f32 %v920_v2, %v828_v24  ;;  %v960_v12 = vadd.f32 %v928_v3, %v836_v30  ;;  %v968_v15 = vadd.f32 %v936_v50, %v844_v31  ;;  %v706_v22 = vmul.f32 %v4165_v6, %v661_v55 }
  0xd1   : > { %v937_v34 = vmul.f32 %v4206_v37, %v872_v4  ;;  %v945_v9 = vmul.f32 %v4213_v46, %v872_v4  ;;  %v748_v10 = vpop.permute.xlu0 %747  ;;  %v976_v16 = vadd.f32 %v944_v51, %v852_v48  ;;  %v714_v23 = vmul.f32 %v4176_v13, %v661_v55 }
  0xd2   : > { %v797_v17 = vmul.f32 %v4148_v58, %v748_v10  ;;  %v805_v18 = vmul.f32 %v4159_v41, %v748_v10  ;;  %v813_v19 = vmul.f32 %v4114_v40, %v748_v10  ;;  %v821_v20 = vmul.f32 %v4118_v45, %v748_v10 }
  0xd3   : > { %v921_v25 = vmul.f32 %v4193_v27, %v872_v4  ;;  %v929_v31 = vmul.f32 %v4203_v36, %v872_v4 }
  0xd4   : > { %v877_v26 = vpop.permute.xlu1 %876  ;;  %v829_v28 = vadd.f32 %v797_v17, %v705_v8  ;;  %v837_v24 = vadd.f32 %v805_v18, %v713_v42  ;;  %v845_v29 = vadd.f32 %v813_v19, %v721_v43  ;;  %v853_v30 = vadd.f32 %v821_v20, %v729_v54 }
  0xd5   : > { %v922_v32 = vmul.f32 %v4193_v27, %v877_v26  ;;  %v938_v33 = vmul.f32 %v4206_v37, %v877_v26  ;;  %v946_v35 = vmul.f32 %v4213_v46, %v877_v26  ;;  %v753_v44 = vpop.permute.xlu0 %752  ;;  %v930_v62 = vmul.f32 %v4203_v36, %v877_v26 }
  0xd6   : > { %v798_v47 = vmul.f32 %v4148_v58, %v753_v44  ;;  %v806_v48 = vmul.f32 %v4159_v41, %v753_v44  ;;  %v814_v49 = vmul.f32 %v4114_v40, %v753_v44  ;;  %v822_v52 = vmul.f32 %v4118_v45, %v753_v44 }
  0xd7   : > { %v4250_v43 = vadd.f32 %v921_v25, %v829_v28  ;;  %v4252_v54 = vadd.f32 %v929_v31, %v837_v24  ;;  %v4254_v55 = vadd.f32 %v937_v34, %v845_v29  ;;  %v4256_v56 = vadd.f32 %v945_v9, %v853_v30 }
  0xd8   : > { %v666_v53 = vpop.permute.xlu1 %665  ;;  %v830_v57 = vadd.f32 %v798_v47, %v706_v22  ;;  %v838_v38 = vadd.f32 %v806_v48, %v714_v23  ;;  %v846_v59 = vadd.f32 %v814_v49, %v722_v61  ;;  %v854_v60 = vadd.f32 %v822_v52, %v730_v39 }
  0xd9   : > { %v4260_v63 = vmul.f32 %v4179_v14, %v666_v53  ;;  %v4263_v2 = vmul.f32 %v4187_v21, %v666_v53  ;;  %v4265_v3 = vpop.permute.xlu0 %985 }
  0xda   : > { %v4268_v50 = vadd.f32 %v4265_v3, %v959_v0  ;;  %v4271_v51 = vadd.f32 %v4265_v3, %v967_v1  ;;  %v4274_v4 = vadd.f32 %v4265_v3, %v975_v5  ;;  %v4276_v61 = vadd.f32 %v922_v32, %v830_v57 }
  0xdb   : > { %v4278_v8 = vadd.f32 %v930_v62, %v838_v38  ;;  %v4280_v42 = vadd.f32 %v938_v33, %v846_v59  ;;  %v4282_v34 = vadd.f32 %v946_v35, %v854_v60 }
  0xdc   : > { %5573 = vst [vmem:[#allocation4_spill] sm:$0xff] %v4268_v50  ;;  %5574 = vst [vmem:[#allocation5_spill] sm:$0xff] %v4271_v51  ;;  %v671_v39 = vpop.permute.xlu1 %670  ;;  %v4285_v9 = vmul.f32 0.70710677, %v4268_v50  ;;  %v4288_v0 = vmul.f32 0.70710677, %v4271_v51 }
  0xdd   : > { %5575 = vst [vmem:[#allocation6_spill] sm:$0xff] %v4274_v4  ;;  %v4291_v1 = vmul.f32 0.70710677, %v4274_v4  ;;  %v4294_v5 = vmul.f32 %v4179_v14, %v671_v39  ;;  %v4297_v10 = vmul.f32 %v4187_v21, %v671_v39  ;;  %v991_v17 = vpop.permute.xlu0 %990 }
  0xde   : > { %5576 = vst [vmem:[#allocation7_spill] sm:$0xff] %v4285_v9  ;;  %5577 = vst [vmem:[#allocation8_spill] sm:$0xff] %v4288_v0  ;;  %v1191_v18 = vand.u32 2147483647, %v4285_v9  ;;  %v1199_v19 = vand.u32 2147483647, %v4288_v0  ;;  %v4302_v22 = vadd.f32 %v991_v17, %v952_v11  ;;  %v4304_v23 = vadd.f32 %v991_v17, %v960_v12 }
  0xdf   : > { %5578 = vst [vmem:[#allocation9_spill] sm:$0xff] %v4291_v1  ;;  %v1207_v20 = vand.u32 2147483647, %v4291_v1  ;;  %v4306_v25 = vadd.f32 %v991_v17, %v968_v15  ;;  %v4308_v26 = vadd.f32 %v991_v17, %v976_v16 }
  0xe0   : > { %5579 = vst [vmem:[#allocation10_spill] sm:$0xff] %v4302_v22  ;;  %5580 = vst [vmem:[#allocation11_spill] sm:$0xff] %v4304_v23  ;;  %v1223_v28 = vmul.f32 0.3275911, %v1191_v18  ;;  %v1231_v24 = vmul.f32 0.3275911, %v1199_v19  ;;  %v4313_v35 = vpop.permute.xlu1 %881 }
  0xe1   : > { %5581 = vst [vmem:[#allocation12_spill] sm:$0xff] %v4306_v25  ;;  %5582 = vst [vmem:[#allocation13_spill] sm:$0xff] %v4308_v26  ;;  %v1239_v29 = vmul.f32 0.3275911, %v1207_v20  ;;  %v1607_v30 = vsub.f32 0.0, %v1191_v18  ;;  %v1615_v31 = vsub.f32 0.0, %v1199_v19  ;;  %v758_v16 = vpop.permute.xlu0 %757 }
  0xe2   : > { %v1623_v32 = vsub.f32 0.0, %v1207_v20  ;;  %v4311_v33 = vmul.f32 0.70710677, %v4302_v22  ;;  %v4316_v11 = vmul.f32 0.70710677, %v4304_v23  ;;  %v1255_v12 = vadd.f32 1.0, %v1223_v28 }
  0xe3   : > { %v1639_v44 = vmul.f32 %v1607_v30, %v1191_v18  ;;  %v4319_v15 = vmul.f32 0.70710677, %v4306_v25  ;;  %v1647_v47 = vmul.f32 %v1615_v31, %v1199_v19  ;;  %v4322_v48 = vmul.f32 0.70710677, %v4308_v26 }
  0xe4   : > { %5583 = vst [vmem:[#allocation14_spill] sm:$0xff] %v4311_v33  ;;  %5584 = vst [vmem:[#allocation15_spill] sm:$0xff] %v4316_v11  ;;  %v1184_v49 = vand.u32 2147483647, %v4311_v33  ;;  %v1192_v52 = vand.u32 2147483647, %v4316_v11  ;;  %v1655_v59 = vmul.f32 %v1623_v32, %v1207_v20  ;;  %v4328_v30 = vpop.permute.xlu1 %886  ;;  %v707_v19 = vmul.f32 %v4165_v6, %v666_v53 }
  0xe5   : > { %5585 = vst [vmem:[#allocation16_spill] sm:$0xff] %v4319_v15  ;;  %5586 = vst [vmem:[#allocation17_spill] sm:$0xff] %v4322_v48  ;;  %v1263_v57 = vadd.f32 1.0, %v1231_v24  ;;  %v1271_v38 = vadd.f32 1.0, %v1239_v29  ;;  %v1200_v60 = vand.u32 2147483647, %v4319_v15  ;;  %v715_v31 = vmul.f32 %v4176_v13, %v666_v53  ;;  %v763_v20 = vpop.permute.xlu0 %762 }
  0xe6   : > { %v1208_v62 = vand.u32 2147483647, %v4322_v48  ;;  %v1216_v17 = vmul.f32 0.3275911, %v1184_v49  ;;  %v1679_v18 = vmul.f32 1.442695, %v1639_v44  ;;  %3577 = vrcp.f32 %v1255_v12 }
  0xe7   : > { %v1224_v28 = vmul.f32 0.3275911, %v1192_v52  ;;  %v1695_v26 = vmul.f32 1.442695, %v1647_v47  ;;  %3579 = vrcp.f32 %v1263_v57  ;;  %v1711_v4 = vmul.f32 1.442695, %v1655_v59 }
  0xe8   : > { %v1232_v24 = vmul.f32 0.3275911, %v1200_v60  ;;  %v1240_v29 = vmul.f32 0.3275911, %v1208_v62  ;;  %3581 = vrcp.f32 %v1271_v38  ;;  %v708_v32 = vmul.f32 %v4165_v6, %v671_v39 }
  0xe9   : > { %v716_v48 = vmul.f32 %v4176_v13, %v671_v39  ;;  %v1248_v44 = vadd.f32 1.0, %v1216_v17  ;;  %3583 = vpow2.f32 %v1679_v18  ;;  %v1256_v1 = vadd.f32 1.0, %v1224_v28  ;;  %v4342_v39 = vpop.permute.xlu1 %675 }
  0xea   : > { %v1600_v25 = vsub.f32 0.0, %v1184_v49  ;;  %v4336_v15 = vmul.f32 %v4193_v27, %v4313_v35  ;;  %3585 = vpow2.f32 %v1695_v26  ;;  %v1608_v53 = vsub.f32 0.0, %v1192_v52 }
  0xeb   : > { %v1616_v12 = vsub.f32 0.0, %v1200_v60  ;;  %v4340_v47 = vmul.f32 %v4206_v37, %v4313_v35  ;;  %3587 = vpow2.f32 %v1711_v4  ;;  %v1264_v57 = vadd.f32 1.0, %v1232_v24  ;;  %v996_v24 = vpop.permute.xlu0 %995 }
  0xec   : > { %v1272_v38 = vadd.f32 1.0, %v1240_v29  ;;  %v1624_v59 = vsub.f32 0.0, %v1208_v62  ;;  %3589 = vrcp.f32 %v1248_v44  ;;  %v4346_v17 = vmul.f32 %v4213_v46, %v4313_v35 }
  0xed   : > { %v799_v18 = vmul.f32 %v4148_v58, %v758_v16  ;;  %v807_v26 = vmul.f32 %v4159_v41, %v758_v16  ;;  %3591 = vrcp.f32 %v1256_v1  ;;  %v1632_v28 = vmul.f32 %v1600_v25, %v1184_v49 }
  0xee   : > { %v815_v51 = vmul.f32 %v4114_v40, %v758_v16  ;;  %v823_v4 = vmul.f32 %v4118_v45, %v758_v16  ;;  %v1640_v29 = vmul.f32 %v1608_v53, %v1192_v52  ;;  %v1648_v0 = vmul.f32 %v1616_v12, %v1200_v60 }
  0xef   : > { %v4352_v11 = vadd.f32 %v799_v18, %v707_v19  ;;  %v4354_v44 = vadd.f32 %v807_v26, %v715_v31  ;;  %v1656_v23 = vmul.f32 %v1624_v59, %v1208_v62  ;;  %v4364_v1 = vmul.f32 %v4206_v37, %v4328_v30  ;;  %v4382_v19 = vpop.permute.xlu1 %680 }
  0xf0   : > { %v4357_v50 = vadd.f32 %v815_v51, %v4260_v63  ;;  %v4360_v9 = vadd.f32 %v823_v4, %v4263_v2  ;;  %v4366_v25 = vpop.eup %3577  ;;  %v4370_v16 = vmul.f32 %v4213_v46, %v4328_v30  ;;  %v800_v49 = vmul.f32 %v4148_v58, %v763_v20 }
  0xf1   : > { %5587 = vst [vmem:[#allocation18_spill] sm:$0xff] %v4366_v25  ;;  %v808_v52 = vmul.f32 %v4159_v41, %v763_v20  ;;  %v816_v63 = vmul.f32 %v4114_v40, %v763_v20  ;;  %v4375_v51 = vpop.eup %3579  ;;  %3593 = vrcp.f32 %v1264_v57  ;;  %v1665_v2 = vmul.f32 1.442695, %v1632_v28 }
  0xf2   : > { %5588 = vst [vmem:[#allocation19_spill] sm:$0xff] %v4370_v16  ;;  %5589 = vst [vmem:[#allocation20_spill] sm:$0xff] %v4375_v51  ;;  %v824_v60 = vmul.f32 %v4118_v45, %v763_v20  ;;  %v4380_v62 = vmul.f32 %v4179_v14, %v4342_v39  ;;  %v4384_v31 = vpop.eup %3581  ;;  %v4386_v53 = vadd.f32 %v800_v49, %v708_v32  ;;  %v1681_v4 = vmul.f32 1.442695, %v1640_v29 }
  0xf3   : > { %5590 = vst [vmem:[#allocation21_spill] sm:$0xff] %v4384_v31  ;;  %v4388_v12 = vadd.f32 %v808_v52, %v716_v48  ;;  %v4391_v59 = vadd.f32 %v816_v63, %v4294_v5  ;;  %v4395_v57 = vmul.f32 %v4187_v21, %v4342_v39  ;;  %v4397_v20 = vpop.eup %3583  ;;  %v4403_v26 = vadd.f32 %v996_v24, %v4250_v43  ;;  %v1001_v5 = vpop.permute.xlu0 %1000 }
  0xf4   : > { %5591 = vst [vmem:[#allocation22_spill] sm:$0xff] %v4397_v20  ;;  %v4400_v18 = vadd.f32 %v824_v60, %v4297_v10  ;;  %v4406_v32 = vadd.f32 %v996_v24, %v4252_v54  ;;  %v4409_v48 = vadd.f32 %v996_v24, %v4254_v55  ;;  %v4411_v28 = vpop.eup %3585  ;;  %v4415_v49 = vmul.f32 %v4203_v36, %v4313_v35 }
  0xf5   : > { %5593 = vst [vmem:[#allocation24_spill] sm:$0xff] %v4403_v26  ;;  %5596 = vst [vmem:[#allocation27_spill] sm:$0xff] %v4411_v28  ;;  %v4418_v10 = vadd.f32 %v996_v24, %v4256_v56  ;;  %v4422_v43 = vmul.f32 %v4179_v14, %v4382_v19  ;;  %v4424_v54 = vpop.eup %3587  ;;  %v4427_v55 = vmul.f32 0.70710677, %v4403_v26  ;;  %v4437_v35 = vmul.f32 %v4187_v21, %v4382_v19 }
  0xf6   : > { %5592 = vst [vmem:[#allocation23_spill] sm:$0xff] %v4400_v18  ;;  %5594 = vst [vmem:[#allocation25_spill] sm:$0xff] %v4406_v32  ;;  %v4430_v52 = vmul.f32 0.70710677, %v4406_v32  ;;  %v4433_v29 = vmul.f32 0.70710677, %v4409_v48  ;;  %v4439_v56 = vpop.eup %3589  ;;  %v4445_v24 = vadd.f32 %v1001_v5, %v4276_v61  ;;  %v4448_v63 = vadd.f32 %v1001_v5, %v4278_v8 }
  0xf7   : > { %5595 = vst [vmem:[#allocation26_spill] sm:$0xff] %v4409_v48  ;;  %5597 = vst [vmem:[#allocation28_spill] sm:$0xff] %v4418_v10  ;;  %v4442_v14 = vmul.f32 0.70710677, %v4418_v10  ;;  %v4451_v60 = vadd.f32 %v1001_v5, %v4280_v42  ;;  %v1185_v31 = vand.u32 2147483647, %v4427_v55  ;;  %v4459_v10 = vadd.f32 %v1001_v5, %v4282_v34 }
  0xf8   : > { %5598 = vst [vmem:[#allocation29_spill] sm:$0xff] %v4424_v54  ;;  %5599 = vst [vmem:[#allocation30_spill] sm:$0xff] %v4427_v55  ;;  %v4453_v54 = vpop.eup %3591  ;;  %v1193_v21 = vand.u32 2147483647, %v4430_v52  ;;  %v1201_v48 = vand.u32 2147483647, %v4433_v29  ;;  %3595 = vrcp.f32 %v1272_v38 }
  0xf9   : > { %5600 = vst [vmem:[#allocation31_spill] sm:$0xff] %v4430_v52  ;;  %5601 = vst [vmem:[#allocation32_spill] sm:$0xff] %v4433_v29  ;;  %v1697_v61 = vmul.f32 1.442695, %v1648_v0  ;;  %v1713_v28 = vmul.f32 1.442695, %v1656_v23  ;;  %3597 = vpow2.f32 %v1665_v2  ;;  %v4472_v23 = vmul.f32 %v4193_v27, %v4328_v30 }
  0xfa   : > { %5602 = vst [vmem:[#allocation33_spill] sm:$0xff] %v4439_v56  ;;  %5603 = vst [vmem:[#allocation34_spill] sm:$0xff] %v4442_v14  ;;  %v1209_v8 = vand.u32 2147483647, %v4442_v14  ;;  %v1217_v51 = vmul.f32 0.3275911, %v1185_v31  ;;  %3599 = vpow2.f32 %v1681_v4  ;;  %v4482_v4 = vmul.f32 %v4203_v36, %v4328_v30 }
  0xfb   : > { %5604 = vst [vmem:[#allocation35_spill] sm:$0xff] %v4445_v24  ;;  %5605 = vst [vmem:[#allocation36_spill] sm:$0xff] %v4448_v63  ;;  %v1225_v42 = vmul.f32 0.3275911, %v1193_v21  ;;  %v4463_v20 = vmul.f32 0.70710677, %v4445_v24  ;;  %v4465_v26 = vpop.eup %3593  ;;  %3601 = vpow2.f32 %v1697_v61  ;;  %v709_v30 = vmul.f32 %v4165_v6, %v4342_v39 }
  0xfc   : > { %5606 = vst [vmem:[#allocation37_spill] sm:$0xff] %v4451_v60  ;;  %5607 = vst [vmem:[#allocation38_spill] sm:$0xff] %v4453_v54  ;;  %v1233_v32 = vmul.f32 0.3275911, %v1201_v48  ;;  %v1601_v54 = vsub.f32 0.0, %v1185_v31  ;;  %v1609_v25 = vsub.f32 0.0, %v1193_v21  ;;  %3603 = vpow2.f32 %v1713_v28  ;;  %v892_v28 = vpop.permute.xlu1 %891 }
  0xfd   : > { %5608 = vst [vmem:[#allocation39_spill] sm:$0xff] %v4459_v10  ;;  %5609 = vst [vmem:[#allocation40_spill] sm:$0xff] %v4463_v20  ;;  %v1617_v52 = vsub.f32 0.0, %v1201_v48  ;;  %v1241_v34 = vmul.f32 0.3275911, %v1209_v8  ;;  %v1625_v5 = vsub.f32 0.0, %v1209_v8 }
  0xfe   : > { %5610 = vst [vmem:[#allocation41_spill] sm:$0xff] %v4465_v26  ;;  %v4468_v0 = vmul.f32 0.70710677, %v4448_v63  ;;  %v1249_v38 = vadd.f32 1.0, %v1217_v51  ;;  %v1633_v2 = vmul.f32 %v1601_v54, %v1185_v31  ;;  %v1257_v14 = vadd.f32 1.0, %v1225_v42 }
  0xff   : > { %v1641_v29 = vmul.f32 %v1609_v25, %v1193_v21  ;;  %v4475_v24 = vmul.f32 0.70710677, %v4451_v60  ;;  %v4478_v26 = vmul.f32 0.70710677, %v4459_v10  ;;  %v1265_v61 = vadd.f32 1.0, %v1233_v32 }
 0x100   : > { %5611 = vst [vmem:[#allocation42_spill] sm:$0xff] %v4468_v0  ;;  %v1649_v63 = vmul.f32 %v1617_v52, %v1201_v48  ;;  %v1273_v55 = vadd.f32 1.0, %v1241_v34  ;;  %v1657_v33 = vmul.f32 %v1625_v5, %v1209_v8  ;;  %v1186_v51 = vand.u32 2147483647, %v4463_v20 }
 0x101   : > { %5612 = vst [vmem:[#allocation43_spill] sm:$0xff] %v4475_v24  ;;  %5613 = vst [vmem:[#allocation44_spill] sm:$0xff] %v4478_v26  ;;  %v1194_v31 = vand.u32 2147483647, %v4468_v0  ;;  %3605 = vrcp.f32 %v1249_v38  ;;  %v1667_v25 = vmul.f32 1.442695, %v1633_v2  ;;  %v717_v8 = vmul.f32 %v4176_v13, %v4342_v39 }
 0x102   : > { %v1202_v54 = vand.u32 2147483647, %v4475_v24  ;;  %v4488_v21 = vand.u32 2147483647, %v4478_v26  ;;  %3607 = vrcp.f32 %v1257_v14  ;;  %v1683_v32 = vmul.f32 1.442695, %v1641_v29  ;;  %v4492_v52 = vpop.eup %3595  ;;  %v768_v29 = vpop.permute.xlu0 %767 }
 0x103   : > { %v1218_v48 = vmul.f32 0.3275911, %v1186_v51  ;;  %5614 = vst [vmem:[#allocation45_spill] sm:$0xff] %v4492_v52  ;;  %3609 = vrcp.f32 %v1265_v61  ;;  %v1699_v42 = vmul.f32 1.442695, %v1649_v63  ;;  %v710_v34 = vmul.f32 %v4165_v6, %v4382_v19  ;;  %v4498_v5 = vpop.eup %3597 }
 0x104   : > { %5615 = vst [vmem:[#allocation46_spill] sm:$0xff] %v4498_v5  ;;  %3611 = vrcp.f32 %v1273_v55  ;;  %v1715_v38 = vmul.f32 1.442695, %v1657_v33  ;;  %v718_v2 = vmul.f32 %v4176_v13, %v4382_v19  ;;  %v1226_v14 = vmul.f32 0.3275911, %v1194_v31  ;;  %v4504_v61 = vpop.eup %3599 }
 0x105   : > { %3613 = vpow2.f32 %v1667_v25  ;;  %v1234_v10 = vmul.f32 0.3275911, %v1202_v54  ;;  %v1242_v26 = vmul.f32 0.3275911, %v4488_v21  ;;  %v925_v39 = vmul.f32 %v4193_v27, %v892_v28  ;;  %5616 = vst [vmem:[#allocation47_spill] sm:$0xff] %v4504_v61  ;;  %v4507_v55 = vpop.eup %3601  ;;  %v4511_v25 = vpop.permute.xlu1 %896 }
 0x106   : > { %3615 = vpow2.f32 %v1683_v32  ;;  %v1250_v63 = vadd.f32 1.0, %v1218_v48  ;;  %v1602_v6 = vsub.f32 0.0, %v1186_v51  ;;  %v933_v52 = vmul.f32 %v4203_v36, %v892_v28  ;;  %5617 = vst [vmem:[#allocation48_spill] sm:$0xff] %v4507_v55  ;;  %v4514_v32 = vpop.eup %3603 }
 0x107   : > { %3617 = vpow2.f32 %v1699_v42  ;;  %v1610_v33 = vsub.f32 0.0, %v1194_v31  ;;  %v949_v13 = vmul.f32 %v4213_v46, %v892_v28  ;;  %v801_v19 = vmul.f32 %v4148_v58, %v768_v29  ;;  %5618 = vst [vmem:[#allocation49_spill] sm:$0xff] %v4514_v32 }
 0x108   : > { %3619 = vpow2.f32 %v1715_v38  ;;  %v1258_v60 = vadd.f32 1.0, %v1226_v14  ;;  %v1618_v24 = vsub.f32 0.0, %v1202_v54  ;;  %v941_v0 = vmul.f32 %v4206_v37, %v892_v28  ;;  %v773_v38 = vpop.permute.xlu0 %772 }
 0x109   : > { %v1266_v48 = vadd.f32 1.0, %v1234_v10  ;;  %v4516_v61 = vadd.f32 1.0, %v1242_v26  ;;  %v809_v55 = vmul.f32 %v4159_v41, %v768_v29  ;;  %v817_v42 = vmul.f32 %v4114_v40, %v768_v29 }
 0x10a   : > { %3621 = vrcp.f32 %v1250_v63  ;;  %v1626_v5 = vsub.f32 0.0, %v4488_v21  ;;  %v825_v20 = vmul.f32 %v4118_v45, %v768_v29  ;;  %v833_v56 = vadd.f32 %v801_v19, %v709_v30 }
 0x10b   : > { %v4522_v14 = vpop.eup %3605  ;;  %v1634_v22 = vmul.f32 %v1602_v6, %v1186_v51  ;;  %v1642_v28 = vmul.f32 %v1610_v33, %v1194_v31  ;;  %v841_v16 = vadd.f32 %v809_v55, %v717_v8  ;;  %v849_v10 = vadd.f32 %v817_v42, %v4380_v62 }
 0x10c   : > { %v4525_v26 = vpop.eup %3607  ;;  %v1650_v32 = vmul.f32 %v1618_v24, %v1202_v54  ;;  %v857_v18 = vadd.f32 %v825_v20, %v4395_v57  ;;  %v4530_v63 = vmul.f32 %v4206_v37, %v4511_v25  ;;  %v4534_v30 = vmul.f32 %v4213_v46, %v4511_v25  ;;  %v1016_v24 = vpop.permute.xlu1 %1015 }
 0x10d   : > { %v4536_v29 = vpop.eup %3609  ;;  %3623 = vrcp.f32 %v1258_v60  ;;  %v802_v51 = vmul.f32 %v4148_v58, %v773_v38  ;;  %v810_v62 = vmul.f32 %v4159_v41, %v773_v38  ;;  %v818_v31 = vmul.f32 %v4114_v40, %v773_v38 }
 0x10e   : > { %5619 = vst [vmem:[#allocation50_spill] sm:$0xff] %v4536_v29  ;;  %v4541_v54 = vpop.eup %3611  ;;  %v826_v57 = vmul.f32 %v4118_v45, %v773_v38  ;;  %v957_v37 = vadd.f32 %v925_v39, %v833_v56  ;;  %v965_v20 = vadd.f32 %v933_v52, %v841_v16  ;;  %v973_v8 = vadd.f32 %v941_v0, %v849_v10  ;;  %v1006_v56 = vpop.permute.xlu0 %1005 }
 0x10f   : > { %5620 = vst [vmem:[#allocation51_spill] sm:$0xff] %v4541_v54  ;;  %v4544_v6 = vpop.eup %3613  ;;  %v4546_v46 = vadd.f32 %v802_v51, %v710_v34  ;;  %v4548_v55 = vadd.f32 %v810_v62, %v718_v2  ;;  %v4551_v58 = vadd.f32 %v818_v31, %v4422_v43  ;;  %v981_v41 = vadd.f32 %v949_v13, %v857_v18 }
 0x110   : > { %v4553_v60 = vpop.eup %3615  ;;  %v4556_v40 = vadd.f32 %v826_v57, %v4437_v35  ;;  %v4558_v33 = vadd.f32 %v1016_v24, %v957_v37  ;;  %v4560_v45 = vadd.f32 %v1016_v24, %v965_v20  ;;  %v4562_v16 = vadd.f32 %v1016_v24, %v973_v8 }
 0x111   : > { %v4564_v0 = vpop.eup %3617  ;;  %v4566_v52 = vadd.f32 %v1016_v24, %v981_v41  ;;  %v955_v43 = vadd.f32 %v4336_v15, %v4352_v11  ;;  %v963_v18 = vadd.f32 %v4415_v49, %v4354_v44  ;;  %v971_v35 = vadd.f32 %v4340_v47, %v4357_v50 }
 0x112   : > { %5621 = vst [vmem:[#allocation52_spill] sm:$0xff] %v4560_v45  ;;  %5622 = vst [vmem:[#allocation53_spill] sm:$0xff] %v4562_v16  ;;  %v4574_v34 = vpop.eup %3619  ;;  %v4577_v2 = vmul.f32 0.70710677, %v4558_v33  ;;  %v4580_v39 = vmul.f32 0.70710677, %v4560_v45  ;;  %v979_v11 = vadd.f32 %v4346_v17, %v4360_v9  ;;  %3625 = vrcp.f32 %v1266_v48 }
 0x113   : > { %5623 = vst [vmem:[#allocation54_spill] sm:$0xff] %v4564_v0  ;;  %5624 = vst [vmem:[#allocation55_spill] sm:$0xff] %v4566_v52  ;;  %v4583_v13 = vmul.f32 0.70710677, %v4562_v16  ;;  %v1658_v15 = vmul.f32 %v1626_v5, %v4488_v21  ;;  %v4589_v44 = vmul.f32 0.70710677, %v4566_v52  ;;  %v4591_v50 = vadd.f32 %v1006_v56, %v955_v43 }
 0x114   : > { %5625 = vst [vmem:[#allocation56_spill] sm:$0xff] %v4574_v34  ;;  %5626 = vst [vmem:[#allocation57_spill] sm:$0xff] %v4580_v39  ;;  %v4593_v47 = vpop.eup %3621  ;;  %v1189_v49 = vand.u32 2147483647, %v4577_v2  ;;  %v1197_v19 = vand.u32 2147483647, %v4580_v39  ;;  %v4598_v38 = vadd.f32 %v1006_v56, %v979_v11  ;;  %v4601_v17 = vadd.f32 %v1006_v56, %v963_v18 }
 0x115   : > { %5627 = vst [vmem:[#allocation58_spill] sm:$0xff] %v4583_v13  ;;  %5628 = vst [vmem:[#allocation59_spill] sm:$0xff] %v4589_v44  ;;  %v1205_v42 = vand.u32 2147483647, %v4583_v13  ;;  %v1669_v10 = vmul.f32 1.442695, %v1634_v22  ;;  %v956_v21 = vadd.f32 %v4472_v23, %v4386_v53  ;;  %v4607_v62 = vadd.f32 %v4482_v4, %v4388_v12 }
 0x116   : > { %5629 = vst [vmem:[#allocation60_spill] sm:$0xff] %v4598_v38  ;;  %v1213_v9 = vand.u32 2147483647, %v4589_v44  ;;  %v1685_v5 = vmul.f32 1.442695, %v1642_v28  ;;  %v1605_v57 = vsub.f32 0.0, %v1189_v49  ;;  %v4611_v22 = vadd.f32 %v1006_v56, %v971_v35 }
 0x117   : > { %v1701_v48 = vmul.f32 1.442695, %v1650_v32  ;;  %v1221_v51 = vmul.f32 0.3275911, %v1189_v49  ;;  %v4609_v31 = vpop.eup %3623  ;;  %v1229_v24 = vmul.f32 0.3275911, %v1197_v19  ;;  %3627 = vrcp.f32 %v4516_v61 }
 0x118   : > { %v1613_v37 = vsub.f32 0.0, %v1197_v19  ;;  %5630 = vst [vmem:[#allocation61_spill] sm:$0xff] %v4611_v22  ;;  %v1237_v20 = vmul.f32 0.3275911, %v1205_v42  ;;  %v1621_v8 = vsub.f32 0.0, %v1205_v42  ;;  %3629 = vpow2.f32 %v1669_v10 }
 0x119   : > { %v4615_v53 = vmul.f32 0.70710677, %v4591_v50  ;;  %v1717_v23 = vmul.f32 1.442695, %v1658_v15  ;;  %v1245_v32 = vmul.f32 0.3275911, %v1213_v9  ;;  %3631 = vpow2.f32 %v1685_v5 }
 0x11a   : > { %v4618_v12 = vmul.f32 0.70710677, %v4601_v17  ;;  %v1253_v4 = vadd.f32 1.0, %v1221_v51  ;;  %v1629_v28 = vsub.f32 0.0, %v1213_v9  ;;  %v1637_v41 = vmul.f32 %v1605_v57, %v1189_v49 }
 0x11b   : > { %3633 = vpow2.f32 %v1701_v48  ;;  %v1261_v56 = vadd.f32 1.0, %v1229_v24  ;;  %v1645_v43 = vmul.f32 %v1613_v37, %v1197_v19  ;;  %v4621_v61 = vmul.f32 0.70710677, %v4611_v22 }
 0x11c   : > { %v1269_v18 = vadd.f32 1.0, %v1237_v20  ;;  %v1653_v35 = vmul.f32 %v1621_v8, %v1205_v42  ;;  %v4624_v11 = vmul.f32 0.70710677, %v4598_v38  ;;  %v1187_v15 = vand.u32 2147483647, %v4615_v53  ;;  %v4627_v10 = vpop.eup %3625  ;;  %v1011_v8 = vpop.permute.xlu0 %1010 }
 0x11d   : > { %5631 = vst [vmem:[#allocation62_spill] sm:$0xff] %v4621_v61  ;;  %5633 = vst [vmem:[#allocation64_spill] sm:$0xff] %v4627_v10  ;;  %3635 = vpow2.f32 %v1717_v23  ;;  %v1277_v5 = vadd.f32 1.0, %v1245_v32  ;;  %v1195_v51 = vand.u32 2147483647, %v4618_v12  ;;  %v972_v49 = vadd.f32 %v4364_v1, %v4391_v59 }
 0x11e   : > { %5632 = vst [vmem:[#allocation63_spill] sm:$0xff] %v4624_v11  ;;  %3637 = vrcp.f32 %v1253_v4  ;;  %v1661_v19 = vmul.f32 %v1629_v28, %v1213_v9  ;;  %v1675_v48 = vmul.f32 1.442695, %v1637_v41  ;;  %v1691_v24 = vmul.f32 1.442695, %v1645_v43  ;;  %v5635_v43 = vld [vmem:[#allocation23_spill] sm:$0xff] }
 0x11f   : > { %3639 = vrcp.f32 %v1261_v56  ;;  %v1203_v42 = vand.u32 2147483647, %v4621_v61  ;;  %v1707_v57 = vmul.f32 1.442695, %v1653_v35  ;;  %v1211_v37 = vand.u32 2147483647, %v4624_v11 }
 0x120   : > { %3641 = vrcp.f32 %v1269_v18  ;;  %v1219_v20 = vmul.f32 0.3275911, %v1187_v15  ;;  %v926_v23 = vmul.f32 %v4193_v27, %v4511_v25  ;;  %v1227_v32 = vmul.f32 0.3275911, %v1195_v51  ;;  %v5636_v27 = vld [vmem:[#allocation19_spill] sm:$0xff] }
 0x121   : > { %3643 = vrcp.f32 %v1277_v5  ;;  %v4638_v1 = vadd.f32 %v4265_v3, %v4229_v7  ;;  %v4640_v59 = vpop.eup %3627  ;;  %v934_v9 = vmul.f32 %v4203_v36, %v4511_v25  ;;  %v1723_v4 = vmul.f32 1.442695, %v1661_v19 }
 0x122   : > { %5634 = vst [vmem:[#allocation65_spill] sm:$0xff] %v4640_v59  ;;  %3645 = vpow2.f32 %v1675_v48  ;;  %v1603_v28 = vsub.f32 0.0, %v1187_v15  ;;  %v4644_v41 = vpop.eup %3629  ;;  %v1235_v56 = vmul.f32 0.3275911, %v1203_v42  ;;  %v980_v18 = vadd.f32 %v5636_v27, %v5635_v43 }
 0x123   : > { %3647 = vpow2.f32 %v1691_v24  ;;  %v4648_v35 = vadd.f32 %v1011_v8, %v956_v21  ;;  %v4650_v5 = vpop.eup %3631  ;;  %v1243_v7 = vmul.f32 0.3275911, %v1211_v37  ;;  %v1251_v3 = vadd.f32 1.0, %v1219_v20 }
 0x124   : > { %3649 = vpow2.f32 %v1707_v57  ;;  %v1611_v52 = vsub.f32 0.0, %v1195_v51  ;;  %v1259_v36 = vadd.f32 1.0, %v1227_v32  ;;  %v1619_v25 = vsub.f32 0.0, %v1203_v42 }
 0x125   : > { %v4652_v44 = vpop.eup %3633  ;;  %v4655_v19 = vadd.f32 %v1011_v8, %v4607_v62  ;;  %v4657_v48 = vadd.f32 %v1011_v8, %v972_v49  ;;  %v1627_v24 = vsub.f32 0.0, %v1211_v37  ;;  %v4659_v38 = vadd.f32 %v1011_v8, %v980_v18 }
 0x126   : > { %5637 = vst [vmem:[#allocation23_spill] sm:$0xff] %v4652_v44  ;;  %v4662_v21 = vmul.f32 0.70710677, %v4648_v35  ;;  %v958_v57 = vadd.f32 %v926_v23, %v4546_v46  ;;  %v1635_v20 = vmul.f32 %v1603_v28, %v1187_v15  ;;  %v966_v62 = vadd.f32 %v934_v9, %v4548_v55 }
 0x127   : > { %5638 = vst [vmem:[#allocation19_spill] sm:$0xff] %v4655_v19  ;;  %5639 = vst [vmem:[#allocation66_spill] sm:$0xff] %v4657_v48  ;;  %v4665_v43 = vpop.eup %3635  ;;  %v4668_v27 = vmul.f32 0.70710677, %v4655_v19  ;;  %v4671_v32 = vmul.f32 0.70710677, %v4657_v48  ;;  %3651 = vpow2.f32 %v1723_v4  ;;  %v974_v46 = vadd.f32 %v4530_v63, %v4551_v58 }
 0x128   : > { %5640 = vst [vmem:[#allocation67_spill] sm:$0xff] %v4659_v38  ;;  %5641 = vst [vmem:[#allocation68_spill] sm:$0xff] %v4665_v43  ;;  %v4674_v49 = vpop.eup %3637  ;;  %v1267_v8 = vadd.f32 1.0, %v1235_v56  ;;  %v4677_v18 = vmul.f32 0.70710677, %v4659_v38  ;;  %v1275_v15 = vadd.f32 1.0, %v1243_v7  ;;  %v1643_v28 = vmul.f32 %v1611_v52, %v1195_v51  ;;  %v1021_v56 = vpop.permute.xlu0 %1020 }
 0x129   : > { %5642 = vst [vmem:[#allocation69_spill] sm:$0xff] %v4671_v32  ;;  %v4681_v23 = vpop.eup %3639  ;;  %v1651_v11 = vmul.f32 %v1619_v25, %v1203_v42  ;;  %v982_v43 = vadd.f32 %v4534_v30, %v4556_v40  ;;  %3653 = vrcp.f32 %v1251_v3  ;;  %v1659_v55 = vmul.f32 %v1627_v24, %v1211_v37 }
 0x12a   : > { %5643 = vst [vmem:[#allocation70_spill] sm:$0xff] %v4677_v18  ;;  %v4685_v34 = vpop.eup %3641  ;;  %v1188_v9 = vand.u32 2147483647, %v4662_v21  ;;  %v1196_v4 = vand.u32 2147483647, %v4668_v27  ;;  %3655 = vrcp.f32 %v1259_v36  ;;  %v4700_v7 = vadd.f32 %v1021_v56, %v958_v57 }
 0x12b   : > { %5644 = vst [vmem:[#allocation71_spill] sm:$0xff] %v4685_v34  ;;  %v4689_v38 = vpop.eup %3643  ;;  %v1671_v63 = vmul.f32 1.442695, %v1635_v20  ;;  %v1204_v58 = vand.u32 2147483647, %v4671_v32  ;;  %3657 = vrcp.f32 %v1267_v8  ;;  %v4706_v54 = vadd.f32 %v1021_v56, %v974_v46 }
 0x12c   : > { %5645 = vst [vmem:[#allocation72_spill] sm:$0xff] %v4689_v38  ;;  %v4692_v52 = vpop.eup %3645  ;;  %v1212_v30 = vand.u32 2147483647, %v4677_v18  ;;  %v4696_v40 = vmul.f32 0.70710677, %v4638_v1  ;;  %3659 = vrcp.f32 %v1275_v15  ;;  %v1604_v24 = vsub.f32 0.0, %v1188_v9 }
 0x12d   : > { %v4698_v51 = vpop.eup %3647  ;;  %v1687_v42 = vmul.f32 1.442695, %v1643_v28  ;;  %v1703_v37 = vmul.f32 1.442695, %v1651_v11  ;;  %v1719_v36 = vmul.f32 1.442695, %v1659_v55  ;;  %3661 = vpow2.f32 %v1671_v63 }
 0x12e   : > { %5646 = vst [vmem:[#allocation73_spill] sm:$0xff] %v4698_v51  ;;  %v4702_v3 = vpop.eup %3649  ;;  %v1220_v25 = vmul.f32 0.3275911, %v1188_v9  ;;  %v1612_v20 = vsub.f32 0.0, %v1196_v4  ;;  %v1228_v8 = vmul.f32 0.3275911, %v1196_v4  ;;  %v4704_v18 = vadd.f32 %v1021_v56, %v966_v62 }
 0x12f   : > { %5647 = vst [vmem:[#allocation74_spill] sm:$0xff] %v4702_v3  ;;  %v1236_v38 = vmul.f32 0.3275911, %v1204_v58  ;;  %v1244_v59 = vmul.f32 0.3275911, %v1212_v30  ;;  %v1620_v16 = vsub.f32 0.0, %v1204_v58  ;;  %v4708_v15 = vadd.f32 %v1021_v56, %v982_v43 }
 0x130   : > { %5648 = vst [vmem:[#allocation75_spill] sm:$0xff] %v4704_v18  ;;  %5649 = vst [vmem:[#allocation76_spill] sm:$0xff] %v4706_v54  ;;  %3663 = vpow2.f32 %v1687_v42  ;;  %v1628_v11 = vsub.f32 0.0, %v1212_v30  ;;  %v4711_v57 = vmul.f32 0.70710677, %v4700_v7  ;;  %v1252_v63 = vadd.f32 1.0, %v1220_v25 }
 0x131   : > { %5650 = vst [vmem:[#allocation77_spill] sm:$0xff] %v4708_v15  ;;  %v4714_v28 = vmul.f32 0.70710677, %v4704_v18  ;;  %v4716_v55 = vpop.eup %3651  ;;  %v1636_v48 = vmul.f32 %v1604_v24, %v1188_v9  ;;  %v1644_v62 = vmul.f32 %v1612_v20, %v1196_v4  ;;  %v4719_v3 = vmul.f32 0.70710677, %v4706_v54 }
 0x132   : > { %5652 = vst [vmem:[#allocation79_spill] sm:$0xff] %v4716_v55  ;;  %3665 = vpow2.f32 %v1703_v37  ;;  %v1260_v46 = vadd.f32 1.0, %v1228_v8  ;;  %v4722_v43 = vmul.f32 0.70710677, %v4708_v15  ;;  %v1190_v56 = vand.u32 2147483647, %v4711_v57 }
 0x133   : > { %5651 = vst [vmem:[#allocation78_spill] sm:$0xff] %v4714_v28  ;;  %5653 = vst [vmem:[#allocation80_spill] sm:$0xff] %v4719_v3  ;;  %v4725_v42 = vpop.eup %3653  ;;  %3667 = vpow2.f32 %v1719_v36  ;;  %v1268_v13 = vadd.f32 1.0, %v1236_v38  ;;  %v1652_v22 = vmul.f32 %v1620_v16, %v1204_v58  ;;  %v1276_v25 = vadd.f32 1.0, %v1244_v59 }
 0x134   : > { %5654 = vst [vmem:[#allocation81_spill] sm:$0xff] %v4722_v43  ;;  %v4727_v32 = vpop.eup %3655  ;;  %v1660_v9 = vmul.f32 %v1628_v11, %v1212_v30  ;;  %v1198_v4 = vand.u32 2147483647, %v4714_v28  ;;  %v1183_v24 = vand.u32 2147483647, %v4696_v40  ;;  %3669 = vrcp.f32 %v1252_v63 }
 0x135   : > { %v4731_v37 = vpop.eup %3657  ;;  %v1673_v20 = vmul.f32 1.442695, %v1636_v48  ;;  %v1689_v8 = vmul.f32 1.442695, %v1644_v62  ;;  %v1206_v15 = vand.u32 2147483647, %v4719_v3  ;;  %3671 = vrcp.f32 %v1260_v46 }
 0x136   : > { %5655 = vst [vmem:[#allocation82_spill] sm:$0xff] %v4731_v37  ;;  %v4734_v55 = vpop.eup %3659  ;;  %v4737_v16 = vand.u32 2147483647, %v4722_v43  ;;  %v1222_v38 = vmul.f32 0.3275911, %v1190_v56  ;;  %vm1119_vm2 = vcmp.ge.f32.partialorder %v4696_v40, 0.0  ;;  %3673 = vrcp.f32 %v1268_v13 }
 0x137   : > { %5656 = vst [vmem:[#allocation83_spill] sm:$0xff] %v4734_v55  ;;  %v1705_v59 = vmul.f32 1.442695, %v1652_v22  ;;  %v1606_v58 = vsub.f32 0.0, %v1190_v56  ;;  %v4741_v30 = vmul.f32 0.5, %v4638_v1  ;;  %v4743_v36 = vpop.eup %3661  ;;  %3675 = vrcp.f32 %v1276_v25  ;;  %v5658_v25 = vld [vmem:[#allocation10_spill] sm:$0xff] }
 0x138   : > { %5657 = vst [vmem:[#allocation84_spill] sm:$0xff] %v4737_v16  ;;  %v1721_v48 = vmul.f32 1.442695, %v1660_v9  ;;  %v1614_v11 = vsub.f32 0.0, %v1198_v4  ;;  %v1215_v63 = vmul.f32 0.3275911, %v1183_v24  ;;  %3677 = vpow2.f32 %v1673_v20 }
 0x139   : > { %v1230_v62 = vmul.f32 0.3275911, %v1198_v4  ;;  %v1622_v46 = vsub.f32 0.0, %v1206_v15  ;;  %v5557_v43 = vmov -1.0   ;;  %3679 = vpow2.f32 %v1689_v8  ;;  %v5659_v3 = vld [vmem:[#allocation33_spill] sm:$0xff] }
 0x13a   : > { %v4746_v55 = vsel %vm1119_vm2, 1.0, %v5557_v43  ;;  %v4748_v40 = vpop.eup %3663  ;;  %v1238_v13 = vmul.f32 0.3275911, %v1206_v15  ;;  %v1246_v22 = vmul.f32 0.3275911, %v4737_v16  ;;  %v1254_v1 = vadd.f32 1.0, %v1222_v38 }
 0x13b   : > { %3681 = vpow2.f32 %v1705_v59  ;;  %v1638_v54 = vmul.f32 %v1606_v58, %v1190_v56  ;;  %v4752_v9 = vmul.f32 0.5, %v5658_v25  ;;  %v1312_v20 = vmul.f32 1.0614054, %v5659_v3 }
 0x13c   : > { %v4755_v44 = vpop.eup %3665  ;;  %v1646_v61 = vmul.f32 %v1614_v11, %v1198_v4  ;;  %v1247_v0 = vadd.f32 1.0, %v1215_v63  ;;  %v1599_v43 = vsub.f32 0.0, %v1183_v24  ;;  %v1313_v34 = vmul.f32 1.0614054, %v4522_v14  ;;  %v5664_v11 = vld [vmem:[#allocation14_spill] sm:$0xff] }
 0x13d   : > { %5660 = vst [vmem:[#allocation10_spill] sm:$0xff] %v4755_v44  ;;  %v4758_v37 = vpop.eup %3667  ;;  %v1262_v8 = vadd.f32 1.0, %v1230_v62  ;;  %v1654_v38 = vmul.f32 %v1622_v46, %v1206_v15  ;;  %v1344_v59 = vadd.f32 -1.4531521, %v1312_v20  ;;  %v4761_v56 = vadd.f32 1.0, %v1238_v13 }
 0x13e   : > { %5661 = vst [vmem:[#allocation33_spill] sm:$0xff] %v4758_v37  ;;  %v4763_v58 = vadd.f32 1.0, %v1246_v22  ;;  %3683 = vrcp.f32 %v1254_v1  ;;  %v1345_v25 = vadd.f32 -1.4531521, %v1313_v34  ;;  %v4765_v18 = vpop.eup %3669  ;;  %v1677_v4 = vmul.f32 1.442695, %v1638_v54 }
 0x13f   : > { %5662 = vst [vmem:[#allocation85_spill] sm:$0xff] %v4761_v56  ;;  %vm1120_vm3 = vcmp.ge.f32.partialorder %v5664_v11, 0.0  ;;  %v1376_v63 = vmul.f32 %v5659_v3, %v1344_v59  ;;  %v1314_v37 = vmul.f32 1.0614054, %v4593_v47  ;;  %v4770_v62 = vpop.eup %3671  ;;  %v1693_v10 = vmul.f32 1.442695, %v1646_v61 }
 0x140   : > { %5663 = vst [vmem:[#allocation86_spill] sm:$0xff] %v4763_v58  ;;  %3685 = vrcp.f32 %v1247_v0  ;;  %v1631_v15 = vmul.f32 %v1599_v43, %v1183_v24  ;;  %v1377_v46 = vmul.f32 %v4522_v14, %v1345_v25  ;;  %v4773_v13 = vpop.eup %3673  ;;  %v4775_v34 = vmul.f32 1.442695, %v1654_v38  ;;  %v5669_v24 = vld [vmem:[#allocation30_spill] sm:$0xff] }
 0x141   : > { %5665 = vst [vmem:[#allocation14_spill] sm:$0xff] %v4773_v13  ;;  %3687 = vpow2.f32 %v1721_v48  ;;  %v1408_v22 = vadd.f32 1.4214138, %v1376_v63  ;;  %v1346_v54 = vadd.f32 -1.4531521, %v1314_v37  ;;  %v4777_v1 = vpop.eup %3675  ;;  %v5668_v20 = vmov -1.0  }
 0x142   : > { %5666 = vst [vmem:[#allocation87_spill] sm:$0xff] %v4775_v34  ;;  %5667 = vst [vmem:[#allocation88_spill] sm:$0xff] %v4777_v1  ;;  %3689 = vrcp.f32 %v1262_v8  ;;  %v4780_v59 = vsel %vm1120_vm3, 1.0, %v5668_v20  ;;  %v1409_v11 = vadd.f32 1.4214138, %v1377_v46  ;;  %v4783_v0 = vpop.eup %3677  ;;  %vm1121_vm4 = vcmp.ge.f32.partialorder %v5669_v24, 0.0 }
 0x143   : > { %v1315_v61 = vmul.f32 1.0614054, %v4725_v42  ;;  %v1440_v43 = vmul.f32 %v5659_v3, %v1408_v22  ;;  %v1378_v48 = vmul.f32 %v4593_v47, %v1346_v54  ;;  %v1316_v38 = vmul.f32 1.0614054, %v4765_v18  ;;  %v4789_v37 = vpop.eup %3679  ;;  %v5670_v8 = vld [vmem:[#allocation24_spill] sm:$0xff] }
 0x144   : > { %v1663_v25 = vmul.f32 1.442695, %v1631_v15  ;;  %v4792_v63 = vmul.f32 0.5, %v5670_v8  ;;  %v1441_v46 = vmul.f32 %v4522_v14, %v1409_v11  ;;  %3691 = vpow2.f32 %v1677_v4  ;;  %v5672_v13 = vld [vmem:[#allocation40_spill] sm:$0xff] }
 0x145   : > { %v1347_v1 = vadd.f32 -1.4531521, %v1315_v61  ;;  %v4795_v58 = vpop.eup %3681  ;;  %v1472_v16 = vadd.f32 -0.28449672, %v1440_v43  ;;  %v1410_v22 = vadd.f32 1.4214138, %v1378_v48  ;;  %3693 = vpow2.f32 %v1693_v10 }
 0x146   : > { %5671 = vst [vmem:[#allocation30_spill] sm:$0xff] %v4795_v58  ;;  %v1348_v34 = vadd.f32 -1.4531521, %v1316_v38  ;;  %v4798_v24 = vsel %vm1121_vm4, 1.0, %v5668_v20  ;;  %v1473_v54 = vadd.f32 -0.28449672, %v1441_v46  ;;  %3695 = vpow2.f32 %v1663_v25 }
 0x147   : > { %v1379_v44 = vmul.f32 %v4725_v42, %v1347_v1  ;;  %v1317_v15 = vmul.f32 1.0614054, %v4674_v49  ;;  %v1504_v8 = vmul.f32 %v5659_v3, %v1472_v16  ;;  %vm1122_vm5 = vcmp.ge.f32.partialorder %v5672_v13, 0.0  ;;  %v5673_v48 = vld [vmem:[#allocation35_spill] sm:$0xff] }
 0x148   : > { %v1442_v11 = vmul.f32 %v4593_v47, %v1410_v22  ;;  %v1380_v61 = vmul.f32 %v4765_v18, %v1348_v34  ;;  %v4806_v4 = vpop.eup %3683  ;;  %v1505_v43 = vmul.f32 %v4522_v14, %v1473_v54  ;;  %v4810_v38 = vmul.f32 0.5, %v5673_v48 }
 0x149   : > { %v1411_v46 = vadd.f32 1.4214138, %v1379_v44  ;;  %v1349_v58 = vadd.f32 -1.4531521, %v1317_v15  ;;  %v1536_v1 = vadd.f32 0.2548296, %v1504_v8 }
 0x14a   : > { %v1474_v56 = vadd.f32 -0.28449672, %v1442_v11  ;;  %v1412_v28 = vadd.f32 1.4214138, %v1380_v61  ;;  %v4812_v16 = vpop.eup %3685  ;;  %v1537_v13 = vadd.f32 0.2548296, %v1505_v43 }
 0x14b   : > { %v1154_v22 = vsel %vm1122_vm5, 1.0, %v5668_v20  ;;  %v1443_v34 = vmul.f32 %v4725_v42, %v1411_v46  ;;  %v1381_v45 = vmul.f32 %v4674_v49, %v1349_v58  ;;  %v4817_v29 = vpop.eup %3687  ;;  %v1311_v54 = vmul.f32 1.0614054, %v4812_v16  ;;  %v5675_v58 = vld [vmem:[#allocation46_spill] sm:$0xff] }
 0x14c   : > { %5674 = vst [vmem:[#allocation24_spill] sm:$0xff] %v4817_v29  ;;  %v1568_v44 = vmul.f32 %v5659_v3, %v1536_v1  ;;  %v1506_v10 = vmul.f32 %v4593_v47, %v1474_v56  ;;  %v1444_v15 = vmul.f32 %v4765_v18, %v1412_v28  ;;  %v4823_v8 = vpop.eup %3689  ;;  %v1569_v11 = vmul.f32 %v4522_v14, %v1537_v13 }
 0x14d   : > { %v1475_v61 = vadd.f32 -0.28449672, %v1443_v34  ;;  %v1413_v43 = vadd.f32 1.4214138, %v1381_v45  ;;  %v1318_v48 = vmul.f32 1.0614054, %v4806_v4 }
 0x14e   : > { %v1343_v46 = vadd.f32 -1.4531521, %v1311_v54  ;;  %v1728_v51 = vmul.f32 %v5675_v58, %v1568_v44  ;;  %v1538_v29 = vadd.f32 0.2548296, %v1506_v10  ;;  %v1476_v19 = vadd.f32 -0.28449672, %v1444_v15  ;;  %v4831_v1 = vpop.eup %3691 }
 0x14f   : > { %v1729_v39 = vmul.f32 %v4544_v6, %v1569_v11  ;;  %v1507_v3 = vmul.f32 %v4725_v42, %v1475_v61  ;;  %v1445_v56 = vmul.f32 %v4674_v49, %v1413_v43  ;;  %v1350_v28 = vadd.f32 -1.4531521, %v1318_v48 }
 0x150   : > { %v1375_v14 = vmul.f32 %v4812_v16, %v1343_v46  ;;  %v1760_v13 = vsub.f32 1.0, %v1728_v51  ;;  %v1570_v45 = vmul.f32 %v4593_v47, %v1538_v29  ;;  %v1508_v34 = vmul.f32 %v4765_v18, %v1476_v19  ;;  %v4841_v29 = vpop.eup %3693 }
 0x151   : > { %vm1123_vm6 = vcmp.ge.f32.partialorder %v4615_v53, 0.0  ;;  %v1539_v54 = vadd.f32 0.2548296, %v1507_v3  ;;  %v1477_v44 = vadd.f32 -0.28449672, %v1445_v56  ;;  %v1382_v6 = vmul.f32 %v4806_v4, %v1350_v28 }
 0x152   : > { %v1407_v10 = vadd.f32 1.4214138, %v1375_v14  ;;  %v1730_v15 = vmul.f32 %v4644_v41, %v1570_v45  ;;  %v1540_v11 = vadd.f32 0.2548296, %v1508_v34  ;;  %v1761_v61 = vsub.f32 1.0, %v1729_v39 }
 0x153   : > { %v1571_v43 = vmul.f32 %v4725_v42, %v1539_v54  ;;  %v1509_v51 = vmul.f32 %v4674_v49, %v1477_v44  ;;  %v1414_v48 = vadd.f32 1.4214138, %v1382_v6  ;;  %v1792_v19 = vmul.f32 %v1760_v13, %v4780_v59 }
 0x154   : > { %v1439_v47 = vmul.f32 %v4812_v16, %v1407_v10  ;;  %vm1124_vm7 = vcmp.ge.f32.partialorder %v4662_v21, 0.0  ;;  %v1572_v46 = vmul.f32 %v4765_v18, %v1540_v11  ;;  %v1762_v25 = vsub.f32 1.0, %v1730_v15  ;;  %v5676_v10 = vld [vmem:[#allocation18_spill] sm:$0xff]  ;;  %v3696_v15 = vpop.eup %3695 }
 0x155   : > { %v1731_v41 = vmul.f32 %v4743_v36, %v1571_v43  ;;  %v1541_v58 = vadd.f32 0.2548296, %v1509_v51  ;;  %v1446_v39 = vmul.f32 %v4806_v4, %v1414_v48  ;;  %v1059_v3 = vmul.f32 0.5, %v4591_v50 }
 0x156   : > { %v1471_v42 = vadd.f32 -0.28449672, %v1439_v47  ;;  %v1155_v56 = vsel %vm1123_vm6, 1.0, %v5668_v20  ;;  %vm1125_vm8 = vcmp.ge.f32.partialorder %v4577_v2, 0.0  ;;  %v1793_v59 = vmul.f32 %v1761_v61, %v4798_v24 }
 0x157   : > { %v1732_v28 = vmul.f32 %v4783_v0, %v1572_v46  ;;  %v1573_v18 = vmul.f32 %v4674_v49, %v1541_v58  ;;  %v1478_v14 = vadd.f32 -0.28449672, %v1446_v39  ;;  %v1824_v13 = vadd.f32 1.0, %v1792_v19  ;;  %v5677_v19 = vld [vmem:[#allocation7_spill] sm:$0xff]  ;;  %v5678_v46 = vld [vmem:[#allocation38_spill] sm:$0xff] }
 0x158   : > { %v1503_v36 = vmul.f32 %v4812_v16, %v1471_v42  ;;  %v1060_v45 = vmul.f32 0.5, %v4648_v35  ;;  %v1156_v50 = vsel %vm1124_vm7, 1.0, %v5668_v20  ;;  %v1794_v53 = vmul.f32 %v1762_v25, %v1154_v22 }
 0x159   : > { %v1763_v34 = vsub.f32 1.0, %v1731_v41  ;;  %vm1126_vm9 = vcmp.ge.f32.partialorder %v4711_v57, 0.0  ;;  %v1510_v2 = vmul.f32 %v4806_v4, %v1478_v14  ;;  %v4865_v0 = vmul.f32 0.5, %v4558_v33 }
 0x15a   : > { %v1535_v24 = vadd.f32 0.2548296, %v1503_v36  ;;  %v1157_v49 = vsel %vm1125_vm8, 1.0, %v5668_v20  ;;  %v1733_v54 = vmul.f32 %v4692_v52, %v1573_v18  ;;  %v1825_v44 = vadd.f32 1.0, %v1793_v59 }
 0x15b   : > { %v1764_v35 = vsub.f32 1.0, %v1732_v28  ;;  %v1542_v6 = vadd.f32 0.2548296, %v1510_v2  ;;  %v1319_v21 = vmul.f32 1.0614054, %v5676_v10  ;;  %v1856_v57 = vmul.f32 %v1824_v13, %v4752_v9  ;;  %v5679_v9 = vld [vmem:[#allocation4_spill] sm:$0xff] }
 0x15c   : > { %v1567_v22 = vmul.f32 %v4812_v16, %v1535_v24  ;;  %v4873_v11 = vmul.f32 0.5, %v4700_v7  ;;  %v1158_v33 = vsel %vm1126_vm9, 1.0, %v5668_v20  ;;  %v1826_v61 = vadd.f32 1.0, %v1794_v53 }
 0x15d   : > { %v1795_v43 = vmul.f32 %v1763_v34, %v1155_v56  ;;  %v1574_v51 = vmul.f32 %v4806_v4, %v1542_v6  ;;  %v1351_v52 = vadd.f32 -1.4531521, %v1319_v21  ;;  %v1765_v47 = vsub.f32 1.0, %v1733_v54 }
 0x15e   : > { %v1727_v48 = vmul.f32 %v3696_v15, %v1567_v22  ;;  %vm1127_vm10 = vcmp.ge.f32.partialorder %v5677_v19, 0.0  ;;  %v1320_v25 = vmul.f32 1.0614054, %v5678_v46  ;;  %v1857_v16 = vmul.f32 %v1825_v44, %v4792_v63 }
 0x15f   : > { %v1796_v41 = vmul.f32 %v1764_v35, %v1156_v50  ;;  %v4881_v58 = vmul.f32 0.5, %v5679_v9  ;;  %v1383_v7 = vmul.f32 %v5676_v10, %v1351_v52  ;;  %v1734_v42 = vmul.f32 %v4831_v1, %v1574_v51  ;;  %v5680_v1 = vld [vmem:[#allocation11_spill] sm:$0xff] }
 0x160   : > { %v1759_v39 = vsub.f32 1.0, %v1727_v48  ;;  %v1352_v56 = vadd.f32 -1.4531521, %v1320_v25  ;;  %v1321_v4 = vmul.f32 1.0614054, %v4525_v26  ;;  %v1858_v59 = vmul.f32 %v1826_v61, %v4810_v38  ;;  %v5682_v48 = vld [vmem:[#allocation31_spill] sm:$0xff] }
 0x161   : > { %v1827_v28 = vadd.f32 1.0, %v1795_v43  ;;  %v4888_v18 = vsel %vm1127_vm10, 1.0, %v5668_v20  ;;  %v1415_v14 = vadd.f32 1.4214138, %v1383_v7  ;;  %v1797_v36 = vmul.f32 %v1765_v47, %v1157_v49 }
 0x162   : > { %v1791_v63 = vmul.f32 %v1759_v39, %v4746_v55  ;;  %v1384_v13 = vmul.f32 %v5678_v46, %v1352_v56  ;;  %v1353_v50 = vadd.f32 -1.4531521, %v1321_v4  ;;  %v1828_v53 = vadd.f32 1.0, %v1796_v41  ;;  %v5681_v55 = vld [vmem:[#allocation15_spill] sm:$0xff] }
 0x163   : > { %v1447_v34 = vmul.f32 %v5676_v10, %v1415_v14  ;;  %v4894_v2 = vmul.f32 0.5, %v5680_v1  ;;  %v1322_v24 = vmul.f32 1.0614054, %v4609_v31  ;;  %v1766_v54 = vsub.f32 1.0, %v1734_v42 }
 0x164   : > { %v1823_v38 = vadd.f32 1.0, %v1791_v63  ;;  %v1416_v44 = vadd.f32 1.4214138, %v1384_v13  ;;  %v1385_v35 = vmul.f32 %v4525_v26, %v1353_v50  ;;  %v1859_v6 = vmul.f32 %v1827_v28, %v1059_v3  ;;  %v5684_v50 = vld [vmem:[#allocation22_spill] sm:$0xff] }
 0x165   : > { %v1479_v21 = vadd.f32 -0.28449672, %v1447_v34  ;;  %vm1128_vm11 = vcmp.ge.f32.partialorder %v5681_v55, 0.0  ;;  %v1354_v49 = vadd.f32 -1.4531521, %v1322_v24  ;;  %v1829_v22 = vadd.f32 1.0, %v1797_v36 }
 0x166   : > { %v1855_v15 = vmul.f32 %v1823_v38, %v4741_v30  ;;  %v1448_v61 = vmul.f32 %v5678_v46, %v1416_v44  ;;  %v1417_v43 = vadd.f32 1.4214138, %v1385_v35  ;;  %v1860_v51 = vmul.f32 %v1828_v53, %v1060_v45  ;;  %v5683_v45 = vld [vmem:[#allocation25_spill] sm:$0xff] }
 0x167   : > { %v1511_v52 = vmul.f32 %v5676_v10, %v1479_v21  ;;  %vm1129_vm12 = vcmp.ge.f32.partialorder %v5682_v48, 0.0  ;;  %v1386_v47 = vmul.f32 %v4609_v31, %v1354_v49  ;;  %v1798_v19 = vmul.f32 %v1766_v54, %v1158_v33  ;;  %v5685_v54 = vld [vmem:[#allocation36_spill] sm:$0xff] }
 0x168   : > { %3258 = vmatprep.mubr.f32.mxu0 %v1855_v15  ;;  %v1480_v3 = vadd.f32 -0.28449672, %v1448_v61  ;;  %v1449_v25 = vmul.f32 %v4525_v26, %v1417_v43  ;;  %v1323_v41 = vmul.f32 1.0614054, %v4727_v32  ;;  %v1160_v9 = vsel %vm1128_vm11, 1.0, %v5668_v20 }
 0x169   : > { %3259 = vmatmul.mubr.f32.vlgmr.msra.gmra.mrb[0].mxu0 %v1856_v57  ;;  %v1543_v30 = vadd.f32 0.2548296, %v1511_v52  ;;  %v4910_v7 = vmul.f32 0.5, %v5683_v45  ;;  %v1418_v39 = vadd.f32 1.4214138, %v1386_v47  ;;  %v1861_v42 = vmul.f32 %v1829_v22, %v4865_v0  ;;  %v5686_v22 = vld [vmem:[#allocation47_spill] sm:$0xff] }
 0x16a   : > { %3261 = vmatprep.mubr.f32.mxu0 %v1857_v16  ;;  %v1512_v33 = vmul.f32 %v5678_v46, %v1480_v3  ;;  %v1481_v56 = vadd.f32 -0.28449672, %v1449_v25  ;;  %v1355_v4 = vadd.f32 -1.4531521, %v1323_v41  ;;  %v1161_v57 = vsel %vm1129_vm12, 1.0, %v5668_v20  ;;  %v5687_v25 = vld [vmem:[#allocation42_spill] sm:$0xff] }
 0x16b   : > { %v1575_v28 = vmul.f32 %v5676_v10, %v1543_v30  ;;  %v1450_v14 = vmul.f32 %v4609_v31, %v1418_v39  ;;  %v1324_v63 = vmul.f32 1.0614054, %v4770_v62  ;;  %v1830_v36 = vadd.f32 1.0, %v1798_v19 }
 0x16c   : > { %v1544_v13 = vadd.f32 0.2548296, %v1512_v33  ;;  %v1513_v16 = vmul.f32 %v4525_v26, %v1481_v56  ;;  %v1387_v0 = vmul.f32 %v4727_v32, %v1355_v4  ;;  %v1325_v10 = vmul.f32 1.0614054, %v4681_v23 }
 0x16d   : > { %3262 = vmatmul.mubr.f32.gmra.mrb[2].mxu0 %v1858_v59  ;;  %v1735_v53 = vmul.f32 %v5684_v50, %v1575_v28  ;;  %v1482_v34 = vadd.f32 -0.28449672, %v1450_v14  ;;  %v1356_v1 = vadd.f32 -1.4531521, %v1324_v63  ;;  %v4926_v44 = vmul.f32 0.5, %v5685_v54 }
 0x16e   : > { %3264 = vmatprep.mubr.f32.mxu0 %v1859_v6  ;;  %v1576_v24 = vmul.f32 %v5678_v46, %v1544_v13  ;;  %v1545_v38 = vadd.f32 0.2548296, %v1513_v16  ;;  %v1419_v35 = vadd.f32 1.4214138, %v1387_v0  ;;  %v1357_v59 = vadd.f32 -1.4531521, %v1325_v10 }
 0x16f   : > { %v1767_v21 = vsub.f32 1.0, %v1735_v53  ;;  %v1514_v55 = vmul.f32 %v4609_v31, %v1482_v34  ;;  %v1388_v49 = vmul.f32 %v4770_v62, %v1356_v1  ;;  %v1862_v15 = vmul.f32 %v1830_v36, %v4873_v11 }
 0x170   : > { %v1736_v61 = vmul.f32 %v5686_v22, %v1576_v24  ;;  %v1577_v43 = vmul.f32 %v4525_v26, %v1545_v38  ;;  %v1451_v6 = vmul.f32 %v4727_v32, %v1419_v35  ;;  %v1389_v47 = vmul.f32 %v4681_v23, %v1357_v59  ;;  %v5688_v35 = vld [vmem:[#allocation20_spill] sm:$0xff] }
 0x171   : > { %3265 = vmatmul.mubr.f32.gmra.mrb[4].mxu0 %v1860_v51  ;;  %v1799_v46 = vmul.f32 %v1767_v21, %v4888_v18  ;;  %v1546_v52 = vadd.f32 0.2548296, %v1514_v55  ;;  %v1420_v48 = vadd.f32 1.4214138, %v1388_v49  ;;  %vm1130_vm13 = vcmp.ge.f32.partialorder %v5687_v25, 0.0 }
 0x172   : > { %3267 = vmatprep.mubr.f32.mxu0 %v1861_v42  ;;  %v1768_v19 = vsub.f32 1.0, %v1736_v61  ;;  %v1737_v3 = vmul.f32 %v4553_v60, %v1577_v43  ;;  %v1483_v11 = vadd.f32 -0.28449672, %v1451_v6  ;;  %v1421_v45 = vadd.f32 1.4214138, %v1389_v47  ;;  %v5690_v61 = vld [vmem:[#allocation41_spill] sm:$0xff] }
 0x173   : > { %v1831_v41 = vadd.f32 1.0, %v1799_v46  ;;  %v1578_v30 = vmul.f32 %v4609_v31, %v1546_v52  ;;  %v1452_v26 = vmul.f32 %v4770_v62, %v1420_v48  ;;  %v1326_v33 = vmul.f32 1.0614054, %v4823_v8  ;;  %v5691_v6 = vld [vmem:[#allocation19_spill] sm:$0xff]  ;;  %v5692_v48 = vld [vmem:[#allocation73_spill] sm:$0xff] }
 0x174   : > { %v1800_v51 = vmul.f32 %v1768_v19, %v1160_v9  ;;  %v1769_v39 = vsub.f32 1.0, %v1737_v3  ;;  %v1515_v18 = vmul.f32 %v4727_v32, %v1483_v11  ;;  %v1453_v4 = vmul.f32 %v4681_v23, %v1421_v45 }
 0x175   : > { %3268 = vmatmul.mubr.f32.gmra.mrb[6].mxu0 %v1862_v15  ;;  %v1863_v42 = vmul.f32 %v1831_v41, %v4881_v58  ;;  %v1738_v60 = vmul.f32 %v4650_v5, %v1578_v30  ;;  %v1484_v56 = vadd.f32 -0.28449672, %v1452_v26  ;;  %v1358_v63 = vadd.f32 -1.4531521, %v1326_v33 }
 0x176   : > { %v1832_v28 = vadd.f32 1.0, %v1800_v51  ;;  %v1801_v14 = vmul.f32 %v1769_v39, %v1161_v57  ;;  %v1547_v31 = vadd.f32 0.2548296, %v1515_v18  ;;  %v1162_v9 = vsel %vm1130_vm13, 1.0, %v5668_v20  ;;  %v5693_v39 = vld [vmem:[#allocation50_spill] sm:$0xff] }
 0x177   : > { %3270 = vmatprep.mubr.f32.mxu0 %v1863_v42  ;;  %v1770_v36 = vsub.f32 1.0, %v1738_v60  ;;  %v1516_v13 = vmul.f32 %v4770_v62, %v1484_v56  ;;  %v1485_v16 = vadd.f32 -0.28449672, %v1453_v4  ;;  %v1390_v50 = vmul.f32 %v4823_v8, %v1358_v63  ;;  %v5694_v42 = vld [vmem:[#allocation52_spill] sm:$0xff]  ;;  %v5695_v4 = vld [vmem:[#allocation78_spill] sm:$0xff] }
 0x178   : > { %v1864_v58 = vmul.f32 %v1832_v28, %v4894_v2  ;;  %v1833_v0 = vadd.f32 1.0, %v1801_v14  ;;  %v1579_v5 = vmul.f32 %v4727_v32, %v1547_v31  ;;  %vm1131_vm14 = vcmp.ge.f32.partialorder %v4618_v12, 0.0 }
 0x179   : > { %v1802_v53 = vmul.f32 %v1770_v36, %v1162_v9  ;;  %v1548_v57 = vadd.f32 0.2548296, %v1516_v13  ;;  %v1517_v34 = vmul.f32 %v4681_v23, %v1485_v16  ;;  %v1067_v10 = vmul.f32 0.5, %v4601_v17  ;;  %v5696_v36 = vld [vmem:[#allocation75_spill] sm:$0xff] }
 0x17a   : > { %3271 = vmatmul.mubr.f32.gmra.mrb[8].mxu0 %v1864_v58  ;;  %v1865_v1 = vmul.f32 %v1833_v0, %v4910_v7  ;;  %v1739_v24 = vmul.f32 %v4748_v40, %v1579_v5  ;;  %v1422_v38 = vadd.f32 1.4214138, %v1390_v50  ;;  %v1327_v21 = vmul.f32 1.0614054, %v5688_v35  ;;  %v5697_v50 = vld [vmem:[#allocation64_spill] sm:$0xff] }
 0x17b   : > { %v1834_v2 = vadd.f32 1.0, %v1802_v53  ;;  %v1580_v54 = vmul.f32 %v4770_v62, %v1548_v57  ;;  %v1549_v32 = vadd.f32 0.2548296, %v1517_v34  ;;  %v1163_v12 = vsel %vm1131_vm14, 1.0, %v5668_v20  ;;  %v5689_v62 = vld [vmem:[#allocation57_spill] sm:$0xff] }
 0x17c   : > { %3273 = vmatprep.mubr.f32.mxu0 %v1865_v1  ;;  %v1771_v55 = vsub.f32 1.0, %v1739_v24  ;;  %vm1132_vm15 = vcmp.ge.f32.partialorder %v4668_v27, 0.0  ;;  %v1454_v49 = vmul.f32 %v4823_v8, %v1422_v38  ;;  %v1359_v59 = vadd.f32 -1.4531521, %v1327_v21  ;;  %v5699_v24 = vld [vmem:[#allocation5_spill] sm:$0xff] }
 0x17d   : > { %v1866_v7 = vmul.f32 %v1834_v2, %v4926_v44  ;;  %v1740_v17 = vmul.f32 %v4789_v37, %v1580_v54  ;;  %v1581_v40 = vmul.f32 %v4681_v23, %v1549_v32  ;;  %vm1133_vm0 = vcmp.ge.f32.partialorder %v5689_v62, 0.0 }
 0x17e   : > { %v1803_v15 = vmul.f32 %v1771_v55, %v1163_v12  ;;  %v1486_v22 = vadd.f32 -0.28449672, %v1454_v49  ;;  %v1328_v43 = vmul.f32 1.0614054, %v5690_v61  ;;  %v1068_v46 = vmul.f32 0.5, %v5691_v6  ;;  %v5701_v12 = vld [vmem:[#allocation82_spill] sm:$0xff] }
 0x17f   : > { %3274 = vmatmul.mubr.f32.gmra.mrb[10].mxu0 %v1866_v7  ;;  %v1772_v52 = vsub.f32 1.0, %v1740_v17  ;;  %v1741_v47 = vmul.f32 %v5692_v48, %v1581_v40  ;;  %v1391_v19 = vmul.f32 %v5688_v35, %v1359_v59  ;;  %v1164_v23 = vsel %vm1132_vm15, 1.0, %v5668_v20  ;;  %v5703_v6 = vld [vmem:[#allocation12_spill] sm:$0xff] }
 0x180   : > { %v1835_v44 = vadd.f32 1.0, %v1803_v15  ;;  %v1518_v37 = vmul.f32 %v4823_v8, %v1486_v22  ;;  %v1360_v3 = vadd.f32 -1.4531521, %v1328_v43  ;;  %v1165_v11 = vsel %vm1133_vm0, 1.0, %v5668_v20  ;;  %v5702_v15 = vld [vmem:[#allocation16_spill] sm:$0xff] }
 0x181   : > { %v1804_v25 = vmul.f32 %v1772_v52, %v1164_v23  ;;  %v1773_v41 = vsub.f32 1.0, %v1741_v47  ;;  %v1423_v30 = vadd.f32 1.4214138, %v1391_v19  ;;  %v1329_v18 = vmul.f32 1.0614054, %v5693_v39  ;;  %v5704_v47 = vld [vmem:[#allocation27_spill] sm:$0xff] }
 0x182   : > { %v1867_v26 = vmul.f32 %v1835_v44, %v1067_v10  ;;  %v1550_v45 = vadd.f32 0.2548296, %v1518_v37  ;;  %v1392_v51 = vmul.f32 %v5690_v61, %v1360_v3  ;;  %v1069_v60 = vmul.f32 0.5, %v5694_v42  ;;  %v5705_v37 = vld [vmem:[#allocation14_spill] sm:$0xff]  ;;  %v5707_v42 = vld [vmem:[#allocation32_spill] sm:$0xff] }
 0x183   : > { %v1836_v33 = vadd.f32 1.0, %v1804_v25  ;;  %v1805_v56 = vmul.f32 %v1773_v41, %v1165_v11  ;;  %v1455_v27 = vmul.f32 %v5688_v35, %v1423_v30  ;;  %vm1134_vm1 = vcmp.ge.f32.partialorder %v5695_v4, 0.0 }
 0x184   : > { %3276 = vmatprep.mubr.f32.mxu0 %v1867_v26  ;;  %v1582_v28 = vmul.f32 %v4823_v8, %v1550_v45  ;;  %v1424_v14 = vadd.f32 1.4214138, %v1392_v51  ;;  %v1361_v31 = vadd.f32 -1.4531521, %v1329_v18  ;;  %v1070_v13 = vmul.f32 0.5, %v5696_v36  ;;  %v5698_v8 = vld [vmem:[#allocation8_spill] sm:$0xff] }
 0x185   : > { %v1868_v63 = vmul.f32 %v1836_v33, %v1068_v46  ;;  %v1837_v9 = vadd.f32 1.0, %v1805_v56  ;;  %v1487_v16 = vadd.f32 -0.28449672, %v1455_v27  ;;  %v1330_v53 = vmul.f32 1.0614054, %v5697_v50  ;;  %v5706_v18 = vld [vmem:[#allocation48_spill] sm:$0xff] }
 0x186   : > { %v1742_v58 = vmul.f32 %v4841_v29, %v1582_v28  ;;  %v1456_v0 = vmul.f32 %v5690_v61, %v1424_v14  ;;  %v1393_v5 = vmul.f32 %v5693_v39, %v1361_v31  ;;  %v1166_v34 = vsel %vm1134_vm1, 1.0, %v5668_v20  ;;  %v5700_v29 = vld [vmem:[#allocation85_spill] sm:$0xff]  ;;  %v5708_v56 = vld [vmem:[#allocation71_spill] sm:$0xff] }
 0x187   : > { %3277 = vmatmul.mubr.f32.gmra.mrb[12].mxu0 %v1868_v63  ;;  %v1869_v57 = vmul.f32 %v1837_v9, %v1069_v60  ;;  %vm1135_vm2 = vcmp.ge.f32.partialorder %v5698_v8, 0.0  ;;  %v1519_v1 = vmul.f32 %v5688_v35, %v1487_v16  ;;  %v1071_v38 = vmul.f32 0.5, %v5699_v24  ;;  %v5709_v63 = vld [vmem:[#allocation26_spill] sm:$0xff] }
 0x188   : > { %v1774_v10 = vsub.f32 1.0, %v1742_v58  ;;  %v1488_v2 = vadd.f32 -0.28449672, %v1456_v0  ;;  %v1425_v54 = vadd.f32 1.4214138, %v1393_v5  ;;  %3697 = vrcp.f32 %v5700_v29  ;;  %v5710_v8 = vld [vmem:[#allocation54_spill] sm:$0xff] }
 0x189   : > { %3279 = vmatprep.mubr.f32.mxu0 %v1869_v57  ;;  %v1551_v32 = vadd.f32 0.2548296, %v1519_v1  ;;  %v1362_v21 = vadd.f32 -1.4531521, %v1330_v53  ;;  %v1331_v55 = vmul.f32 1.0614054, %v5701_v12 }
 0x18a   : > { %v1806_v49 = vmul.f32 %v1774_v10, %v1166_v34  ;;  %v1167_v7 = vsel %vm1135_vm2, 1.0, %v5668_v20  ;;  %v1520_v17 = vmul.f32 %v5690_v61, %v1488_v2  ;;  %v1457_v40 = vmul.f32 %v5693_v39, %v1425_v54 }
 0x18b   : > { %v1583_v59 = vmul.f32 %v5688_v35, %v1551_v32  ;;  %vm1136_vm3 = vcmp.ge.f32.partialorder %v5702_v15, 0.0  ;;  %v1394_v62 = vmul.f32 %v5697_v50, %v1362_v21  ;;  %v1363_v22 = vadd.f32 -1.4531521, %v1331_v55  ;;  %v5711_v21 = vld [vmem:[#allocation43_spill] sm:$0xff] }
 0x18c   : > { %v1838_v43 = vadd.f32 1.0, %v1806_v49  ;;  %v1072_v46 = vmul.f32 0.5, %v5703_v6  ;;  %v1552_v52 = vadd.f32 0.2548296, %v1520_v17  ;;  %v1489_v48 = vadd.f32 -0.28449672, %v1457_v40 }
 0x18d   : > { %v1743_v19 = vmul.f32 %v5704_v47, %v1583_v59  ;;  %v1426_v44 = vadd.f32 1.4214138, %v1394_v62  ;;  %v1395_v23 = vmul.f32 %v5701_v12, %v1363_v22  ;;  %v1332_v3 = vmul.f32 1.0614054, %v5705_v37  ;;  %v5713_v22 = vld [vmem:[#allocation37_spill] sm:$0xff]  ;;  %v5714_v6 = vld [vmem:[#allocation23_spill] sm:$0xff] }
 0x18e   : > { %v1870_v25 = vmul.f32 %v1838_v43, %v1070_v13  ;;  %v1168_v35 = vsel %vm1136_vm3, 1.0, %v5668_v20  ;;  %v1584_v11 = vmul.f32 %v5690_v61, %v1552_v52  ;;  %v1521_v41 = vmul.f32 %v5693_v39, %v1489_v48 }
 0x18f   : > { %v1775_v30 = vsub.f32 1.0, %v1743_v19  ;;  %v1458_v26 = vmul.f32 %v5697_v50, %v1426_v44  ;;  %v1427_v45 = vadd.f32 1.4214138, %v1395_v23  ;;  %v1364_v51 = vadd.f32 -1.4531521, %v1332_v3 }
 0x190   : > { %3280 = vmatmul.mubr.f32.gmra.mrb[14].mxu0 %v1870_v25  ;;  %v1744_v33 = vmul.f32 %v5706_v18, %v1584_v11  ;;  %vm1137_vm4 = vcmp.ge.f32.partialorder %v5707_v42, 0.0  ;;  %v1553_v60 = vadd.f32 0.2548296, %v1521_v41  ;;  %v1333_v27 = vmul.f32 1.0614054, %v5708_v56  ;;  %v5715_v25 = vld [vmem:[#allocation10_spill] sm:$0xff] }
 0x191   : > { %v1807_v4 = vmul.f32 %v1775_v30, %v1167_v7  ;;  %v1490_v28 = vadd.f32 -0.28449672, %v1458_v26  ;;  %v1459_v14 = vmul.f32 %v5701_v12, %v1427_v45  ;;  %v1396_v61 = vmul.f32 %v5705_v37, %v1364_v51  ;;  %v5712_v7 = vld [vmem:[#allocation62_spill] sm:$0xff]  ;;  %v5716_v26 = vld [vmem:[#allocation21_spill] sm:$0xff] }
 0x192   : > { %v1776_v31 = vsub.f32 1.0, %v1744_v33  ;;  %v1073_v9 = vmul.f32 0.5, %v5709_v63  ;;  %v1585_v36 = vmul.f32 %v5693_v39, %v1553_v60  ;;  %v1365_v13 = vadd.f32 -1.4531521, %v1333_v27  ;;  %v5013_v16 = vpop.eup %3697  ;;  %v5717_v33 = vld [vmem:[#allocation69_spill] sm:$0xff]  ;;  %v5718_v60 = vld [vmem:[#allocation87_spill] sm:$0xff] }
 0x193   : > { %v1839_v58 = vadd.f32 1.0, %v1807_v4  ;;  %v1522_v0 = vmul.f32 %v5697_v50, %v1490_v28  ;;  %v1491_v5 = vadd.f32 -0.28449672, %v1459_v14  ;;  %v1428_v53 = vadd.f32 1.4214138, %v1396_v61  ;;  %v5719_v61 = vld [vmem:[#allocation61_spill] sm:$0xff] }
 0x194   : > { %v1808_v57 = vmul.f32 %v1776_v31, %v1168_v35  ;;  %v1169_v34 = vsel %vm1137_vm4, 1.0, %v5668_v20  ;;  %v1745_v1 = vmul.f32 %v5710_v8, %v1585_v36  ;;  %v1397_v10 = vmul.f32 %v5708_v56, %v1365_v13 }
 0x195   : > { %v1871_v24 = vmul.f32 %v1839_v58, %v1071_v38  ;;  %v1554_v2 = vadd.f32 0.2548296, %v1522_v0  ;;  %v1523_v39 = vmul.f32 %v5701_v12, %v1491_v5  ;;  %v1460_v54 = vmul.f32 %v5705_v37, %v1428_v53 }
 0x196   : > { %v1840_v29 = vadd.f32 1.0, %v1808_v57  ;;  %v1777_v32 = vsub.f32 1.0, %v1745_v1  ;;  %vm1138_vm5 = vcmp.ge.f32.partialorder %v5711_v21, 0.0  ;;  %v1429_v55 = vadd.f32 1.4214138, %v1397_v10  ;;  %v5722_v1 = vld [vmem:[#allocation58_spill] sm:$0xff] }
 0x197   : > { %3282 = vmatprep.mubr.f32.mxu0 %v1871_v24  ;;  %v1586_v49 = vmul.f32 %v5697_v50, %v1554_v2  ;;  %vm1139_vm6 = vcmp.ge.f32.partialorder %v5712_v7, 0.0  ;;  %v1555_v17 = vadd.f32 0.2548296, %v1523_v39  ;;  %v1492_v40 = vadd.f32 -0.28449672, %v1460_v54  ;;  %v5723_v10 = vld [vmem:[#allocation74_spill] sm:$0xff] }
 0x198   : > { %v1872_v59 = vmul.f32 %v1840_v29, %v1072_v46  ;;  %v1809_v15 = vmul.f32 %v1777_v32, %v1169_v34  ;;  %v1461_v38 = vmul.f32 %v5708_v56, %v1429_v55  ;;  %v1334_v62 = vmul.f32 1.0614054, %v5013_v16  ;;  %v5721_v34 = vld [vmem:[#allocation45_spill] sm:$0xff]  ;;  %v5724_v54 = vld [vmem:[#allocation84_spill] sm:$0xff] }
 0x199   : > { %v1074_v43 = vmul.f32 0.5, %v5713_v22  ;;  %v1746_v52 = vmul.f32 %v5714_v6, %v1586_v49  ;;  %v1587_v48 = vmul.f32 %v5701_v12, %v1555_v17  ;;  %v1524_v47 = vmul.f32 %v5705_v37, %v1492_v40  ;;  %v5726_v49 = vld [vmem:[#allocation66_spill] sm:$0xff]  ;;  %v5727_v22 = vld [vmem:[#allocation51_spill] sm:$0xff]  ;;  %v5728_v6 = vld [vmem:[#allocation53_spill] sm:$0xff] }
 0x19a   : > { %3283 = vmatmul.mubr.f32.gmra.mrb[16].mxu0 %v1872_v59  ;;  %v1841_v50 = vadd.f32 1.0, %v1809_v15  ;;  %v1170_v19 = vsel %vm1138_vm5, 1.0, %v5668_v20  ;;  %v1493_v46 = vadd.f32 -0.28449672, %v1461_v38  ;;  %v1366_v44 = vadd.f32 -1.4531521, %v1334_v62 }
 0x19b   : > { %v1778_v23 = vsub.f32 1.0, %v1746_v52  ;;  %v1171_v3 = vsel %vm1139_vm6, 1.0, %v5668_v20  ;;  %v1747_v35 = vmul.f32 %v5715_v25, %v1587_v48  ;;  %v1556_v11 = vadd.f32 0.2548296, %v1524_v47 }
 0x19c   : > { %v1873_v41 = vmul.f32 %v1841_v50, %v1073_v9  ;;  %v1525_v12 = vmul.f32 %v5708_v56, %v1493_v46  ;;  %v1398_v30 = vmul.f32 %v5013_v16, %v1366_v44  ;;  %v1335_v45 = vmul.f32 1.0614054, %v5716_v26  ;;  %v5720_v9 = vld [vmem:[#allocation30_spill] sm:$0xff]  ;;  %v5729_v46 = vld [vmem:[#allocation80_spill] sm:$0xff] }
 0x19d   : > { %v1810_v51 = vmul.f32 %v1778_v23, %v1170_v19  ;;  %v1779_v18 = vsub.f32 1.0, %v1747_v35  ;;  %vm1140_vm7 = vcmp.ge.f32.partialorder %v5717_v33, 0.0  ;;  %v1588_v42 = vmul.f32 %v5705_v37, %v1556_v11 }
 0x19e   : > { %3699 = vpow2.f32 %v5718_v60  ;;  %3285 = vmatprep.mubr.f32.mxu0 %v1873_v41  ;;  %v1557_v27 = vadd.f32 0.2548296, %v1525_v12  ;;  %v1430_v4 = vadd.f32 1.4214138, %v1398_v30  ;;  %v1367_v28 = vadd.f32 -1.4531521, %v1335_v45 }
 0x19f   : > { %v1842_v14 = vadd.f32 1.0, %v1810_v51  ;;  %v1075_v31 = vmul.f32 0.5, %v5719_v61  ;;  %v1811_v63 = vmul.f32 %v1779_v18, %v1171_v3  ;;  %v1748_v36 = vmul.f32 %v5720_v9, %v1588_v42  ;;  %v5730_v41 = vld [vmem:[#allocation65_spill] sm:$0xff]  ;;  %v5731_v30 = vld [vmem:[#allocation86_spill] sm:$0xff] }
 0x1a0   : > { %v1172_v13 = vsel %vm1140_vm7, 1.0, %v5668_v20  ;;  %v1589_v58 = vmul.f32 %v5708_v56, %v1557_v27  ;;  %v1462_v0 = vmul.f32 %v5013_v16, %v1430_v4  ;;  %v1399_v37 = vmul.f32 %v5716_v26, %v1367_v28  ;;  %v5732_v4 = vld [vmem:[#allocation76_spill] sm:$0xff] }
 0x1a1   : > { %v1874_v5 = vmul.f32 %v1842_v14, %v1074_v43  ;;  %v1843_v53 = vadd.f32 1.0, %v1811_v63  ;;  %v1780_v57 = vsub.f32 1.0, %v1748_v36  ;;  %v1336_v8 = vmul.f32 1.0614054, %v5721_v34  ;;  %v5733_v36 = vld [vmem:[#allocation83_spill] sm:$0xff] }
 0x1a2   : > { %vm1141_vm8 = vcmp.ge.f32.partialorder %v5722_v1, 0.0  ;;  %v1749_v24 = vmul.f32 %v5723_v10, %v1589_v58  ;;  %v1494_v2 = vadd.f32 -0.28449672, %v1462_v0  ;;  %v1431_v39 = vadd.f32 1.4214138, %v1399_v37  ;;  %v5734_v58 = vld [vmem:[#allocation9_spill] sm:$0xff] }
 0x1a3   : > { %v5725_v29 = vsub.f32 0.0, %v5724_v54  ;;  %3286 = vmatmul.mubr.f32.gmra.mrb[18].mxu0 %v1874_v5  ;;  %v1875_v56 = vmul.f32 %v1843_v53, %v1075_v31  ;;  %v1812_v21 = vmul.f32 %v1780_v57, %v1172_v13  ;;  %v1368_v55 = vadd.f32 -1.4531521, %v1336_v8  ;;  %v5735_v5 = vld [vmem:[#allocation88_spill] sm:$0xff]  ;;  %v5736_v8 = vld [vmem:[#allocation29_spill] sm:$0xff] }
 0x1a4   : > { %v1076_v7 = vmul.f32 0.5, %v5726_v49  ;;  %v1781_v17 = vsub.f32 1.0, %v1749_v24  ;;  %v1526_v40 = vmul.f32 %v5013_v16, %v1494_v2  ;;  %v1463_v59 = vmul.f32 %v5716_v26, %v1431_v39  ;;  %v5737_v2 = vld [vmem:[#allocation6_spill] sm:$0xff] }
 0x1a5   : > { %v1662_v32 = vmul.f32 %v5725_v29, %v5724_v54  ;;  %3288 = vmatprep.mubr.f32.mxu0 %v1875_v56  ;;  %v1844_v15 = vadd.f32 1.0, %v1812_v21  ;;  %v1173_v38 = vsel %vm1141_vm8, 1.0, %v5668_v20  ;;  %v1400_v62 = vmul.f32 %v5721_v34, %v1368_v55 }
 0x1a6   : > { %v1337_v43 = vmul.f32 1.0614054, %v5727_v22  ;;  %v1077_v52 = vmul.f32 0.5, %v5728_v6  ;;  %v1813_v48 = vmul.f32 %v1781_v17, %v1173_v38  ;;  %v1558_v47 = vadd.f32 0.2548296, %v1526_v40 }
 0x1a7   : > { %v1495_v50 = vadd.f32 -0.28449672, %v1463_v59  ;;  %v1876_v19 = vmul.f32 %v1844_v15, %v1076_v7  ;;  %vm1142_vm9 = vcmp.ge.f32.partialorder %v5729_v46, 0.0  ;;  %v1432_v44 = vadd.f32 1.4214138, %v1400_v62 }
 0x1a8   : > { %v1369_v23 = vadd.f32 -1.4531521, %v1337_v43  ;;  %v3700_v3 = vpop.eup %3699  ;;  %v1845_v25 = vadd.f32 1.0, %v1813_v48  ;;  %v1590_v35 = vmul.f32 %v5013_v16, %v1558_v47  ;;  %v1338_v12 = vmul.f32 1.0614054, %v5730_v41 }
 0x1a9   : > { %v1527_v11 = vmul.f32 %v5716_v26, %v1495_v50  ;;  %3701 = vrcp.f32 %v5731_v30  ;;  %v5069_v45 = vmul.f32 1.442695, %v1662_v32  ;;  %3289 = vmatmul.mubr.f32.gmra.mrb[20].mxu0 %v1876_v19  ;;  %v1464_v51 = vmul.f32 %v5721_v34, %v1432_v44  ;;  %v5740_v44 = vld [vmem:[#allocation72_spill] sm:$0xff] }
 0x1aa   : > { %v1401_v18 = vmul.f32 %v5727_v22, %v1369_v23  ;;  %v1877_v33 = vmul.f32 %v1845_v25, %v1077_v52  ;;  %v1750_v42 = vmul.f32 %v3700_v3, %v1590_v35  ;;  %v1370_v27 = vadd.f32 -1.4531521, %v1338_v12  ;;  %v5739_v52 = vld [vmem:[#allocation49_spill] sm:$0xff]  ;;  %v5741_v25 = vld [vmem:[#allocation34_spill] sm:$0xff] }
 0x1ab   : > { %v1559_v60 = vadd.f32 0.2548296, %v1527_v11  ;;  %v1078_v28 = vmul.f32 0.5, %v5732_v4  ;;  %v1174_v16 = vsel %vm1142_vm9, 1.0, %v5668_v20  ;;  %v1496_v14 = vadd.f32 -0.28449672, %v1464_v51 }
 0x1ac   : > { %v1433_v61 = vadd.f32 1.4214138, %v1401_v18  ;;  %3291 = vmatprep.mubr.f32.mxu0 %v1877_v33  ;;  %v1782_v31 = vsub.f32 1.0, %v1750_v42  ;;  %v1402_v9 = vmul.f32 %v5730_v41, %v1370_v27  ;;  %v1339_v13 = vmul.f32 1.0614054, %v5733_v36  ;;  %v5742_v33 = vld [vmem:[#allocation13_spill] sm:$0xff] }
 0x1ad   : > { %v1591_v63 = vmul.f32 %v5716_v26, %v1559_v60  ;;  %vm1143_vm10 = vcmp.ge.f32.partialorder %v5734_v58, 0.0  ;;  %v1528_v0 = vmul.f32 %v5721_v34, %v1496_v14  ;;  %v1340_v53 = vmul.f32 1.0614054, %v5735_v5  ;;  %v5738_v26 = vld [vmem:[#allocation17_spill] sm:$0xff]  ;;  %v5743_v27 = vld [vmem:[#allocation56_spill] sm:$0xff] }
 0x1ae   : > { %v1465_v37 = vmul.f32 %v5727_v22, %v1433_v61  ;;  %v1814_v57 = vmul.f32 %v1782_v31, %v1174_v16  ;;  %v1434_v10 = vadd.f32 1.4214138, %v1402_v9  ;;  %v1371_v24 = vadd.f32 -1.4531521, %v1339_v13  ;;  %v5744_v58 = vld [vmem:[#allocation44_spill] sm:$0xff] }
 0x1af   : > { %v1751_v1 = vmul.f32 %v5736_v8, %v1591_v63  ;;  %v1079_v39 = vmul.f32 0.5, %v5737_v2  ;;  %vm1144_vm11 = vcmp.ge.f32.partialorder %v5738_v26, 0.0  ;;  %v1560_v54 = vadd.f32 0.2548296, %v1528_v0  ;;  %v5745_v0 = vld [vmem:[#allocation68_spill] sm:$0xff] }
 0x1b0   : > { %v1497_v29 = vadd.f32 -0.28449672, %v1465_v37  ;;  %v1846_v32 = vadd.f32 1.0, %v1814_v57  ;;  %v1466_v21 = vmul.f32 %v5730_v41, %v1434_v10  ;;  %v1403_v55 = vmul.f32 %v5733_v36, %v1371_v24  ;;  %v5746_v24 = vld [vmem:[#allocation28_spill] sm:$0xff] }
 0x1b1   : > { %v1783_v56 = vsub.f32 1.0, %v1751_v1  ;;  %v1175_v49 = vsel %vm1143_vm10, 1.0, %v5668_v20  ;;  %v1592_v7 = vmul.f32 %v5721_v34, %v1560_v54  ;;  %v1372_v40 = vadd.f32 -1.4531521, %v1340_v53 }
 0x1b2   : > { %v1529_v17 = vmul.f32 %v5727_v22, %v1497_v29  ;;  %v1878_v59 = vmul.f32 %v1846_v32, %v1078_v28  ;;  %v1498_v38 = vadd.f32 -0.28449672, %v1466_v21  ;;  %v1435_v62 = vadd.f32 1.4214138, %v1403_v55 }
 0x1b3   : > { %v1815_v15 = vmul.f32 %v1783_v56, %v1175_v49  ;;  %v5094_v43 = vpop.eup %3701  ;;  %v1176_v6 = vsel %vm1144_vm11, 1.0, %v5668_v20  ;;  %v1752_v48 = vmul.f32 %v5739_v52, %v1592_v7  ;;  %v1404_v50 = vmul.f32 %v5735_v5, %v1372_v40  ;;  %v5747_v49 = vld [vmem:[#allocation63_spill] sm:$0xff]  ;;  %v5748_v7 = vld [vmem:[#allocation33_spill] sm:$0xff] }
 0x1b4   : > { %v1561_v47 = vadd.f32 0.2548296, %v1529_v17  ;;  %3292 = vmatmul.mubr.f32.gmra.mrb[22].mxu0 %v1878_v59  ;;  %v1530_v19 = vmul.f32 %v5730_v41, %v1498_v38  ;;  %v1467_v46 = vmul.f32 %v5733_v36, %v1435_v62  ;;  %v1341_v23 = vmul.f32 1.0614054, %v5740_v44  ;;  %v5749_v38 = vld [vmem:[#allocation39_spill] sm:$0xff] }
 0x1b5   : > { %v1847_v34 = vadd.f32 1.0, %v1815_v15  ;;  %v1784_v3 = vsub.f32 1.0, %v1752_v48  ;;  %vm1145_vm12 = vcmp.ge.f32.partialorder %v5741_v25, 0.0  ;;  %v1436_v11 = vadd.f32 1.4214138, %v1404_v50  ;;  %v5750_v50 = vld [vmem:[#allocation70_spill] sm:$0xff] }
 0x1b6   : > { %v1593_v35 = vmul.f32 %v5727_v22, %v1561_v47  ;;  %v1562_v30 = vadd.f32 0.2548296, %v1530_v19  ;;  %v1499_v51 = vadd.f32 -0.28449672, %v1467_v46  ;;  %v1373_v18 = vadd.f32 -1.4531521, %v1341_v23 }
 0x1b7   : > { %v1879_v12 = vmul.f32 %v1847_v34, %v1079_v39  ;;  %v1080_v42 = vmul.f32 0.5, %v5742_v33  ;;  %v1816_v60 = vmul.f32 %v1784_v3, %v1176_v6  ;;  %v1468_v28 = vmul.f32 %v5735_v5, %v1436_v11  ;;  %v5751_v34 = vld [vmem:[#allocation24_spill] sm:$0xff] }
 0x1b8   : > { %v1753_v4 = vmul.f32 %v5743_v27, %v1593_v35  ;;  %v1177_v16 = vsel %vm1145_vm12, 1.0, %v5668_v20  ;;  %v1594_v14 = vmul.f32 %v5730_v41, %v1562_v30  ;;  %v1531_v61 = vmul.f32 %v5733_v36, %v1499_v51  ;;  %v5752_v35 = vld [vmem:[#allocation60_spill] sm:$0xff]  ;;  %v5754_v27 = vld [vmem:[#allocation79_spill] sm:$0xff] }
 0x1b9   : > { %3294 = vmatprep.mubr.f32.mxu0 %v1879_v12  ;;  %v1405_v22 = vmul.f32 %v5740_v44, %v1373_v18  ;;  %v1848_v31 = vadd.f32 1.0, %v1816_v60  ;;  %v1500_v9 = vadd.f32 -0.28449672, %v1468_v28  ;;  %v1342_v13 = vmul.f32 1.0614054, %v5094_v43  ;;  %v5753_v60 = vld [vmem:[#allocation59_spill] sm:$0xff] }
 0x1ba   : > { %v1785_v63 = vsub.f32 1.0, %v1753_v4  ;;  %vm1146_vm13 = vcmp.ge.f32.partialorder %v5744_v58, 0.0  ;;  %v1754_v37 = vmul.f32 %v5745_v0, %v1594_v14  ;;  %v1563_v53 = vadd.f32 0.2548296, %v1531_v61  ;;  %v5755_v28 = vld [vmem:[#allocation67_spill] sm:$0xff]  ;;  %v5756_v58 = vld [vmem:[#allocation81_spill] sm:$0xff] }
 0x1bb   : > { %v1437_v57 = vadd.f32 1.4214138, %v1405_v22  ;;  %v1880_v8 = vmul.f32 %v1848_v31, %v1080_v42  ;;  %v1532_v10 = vmul.f32 %v5735_v5, %v1500_v9  ;;  %v1374_v41 = vadd.f32 -1.4531521, %v1342_v13 }
 0x1bc   : > { %v1817_v1 = vmul.f32 %v1785_v63, %v1177_v16  ;;  %v1081_v2 = vmul.f32 0.5, %v5746_v24  ;;  %v1786_v39 = vsub.f32 1.0, %v1754_v37  ;;  %v1595_v26 = vmul.f32 %v5733_v36, %v1563_v53  ;;  %v5757_v37 = vld [vmem:[#allocation55_spill] sm:$0xff]  ;;  %v5758_v24 = vld [vmem:[#allocation77_spill] sm:$0xff] }
 0x1bd   : > { %v1469_v54 = vmul.f32 %v5740_v44, %v1437_v57  ;;  %3295 = vmatmul.mubr.f32.gmra.mrb[24].mxu0 %v1880_v8  ;;  %v1178_v32 = vsel %vm1146_vm13, 1.0, %v5668_v20  ;;  %v1564_v56 = vadd.f32 0.2548296, %v1532_v10  ;;  %v1406_v21 = vmul.f32 %v5094_v43, %v1374_v41 }
 0x1be   : > { %v1849_v29 = vadd.f32 1.0, %v1817_v1  ;;  %v1818_v55 = vmul.f32 %v1786_v39, %v1178_v32  ;;  %vm1147_vm14 = vcmp.ge.f32.partialorder %v5747_v49, 0.0  ;;  %v1755_v17 = vmul.f32 %v5748_v7, %v1595_v26 }
 0x1bf   : > { %v1501_v40 = vadd.f32 -0.28449672, %v1469_v54  ;;  %3703 = vpow2.f32 %v5069_v45  ;;  %v1596_v36 = vmul.f32 %v5735_v5, %v1564_v56  ;;  %v1438_v15 = vadd.f32 1.4214138, %v1406_v21 }
 0x1c0   : > { %v1881_v59 = vmul.f32 %v1849_v29, %v1081_v2  ;;  %v1082_v62 = vmul.f32 0.5, %v5749_v38  ;;  %v1850_v6 = vadd.f32 1.0, %v1818_v55  ;;  %v1787_v52 = vsub.f32 1.0, %v1755_v17 }
 0x1c1   : > { %v1533_v48 = vmul.f32 %v5740_v44, %v1501_v40  ;;  %v1179_v47 = vsel %vm1147_vm14, 1.0, %v5668_v20  ;;  %vm1148_vm15 = vcmp.ge.f32.partialorder %v5750_v50, 0.0  ;;  %v1756_v19 = vmul.f32 %v5751_v34, %v1596_v36 }
 0x1c2   : > { %3297 = vmatprep.mubr.f32.mxu0 %v1881_v59  ;;  %v1470_v46 = vmul.f32 %v5094_v43, %v1438_v15  ;;  %v1882_v45 = vmul.f32 %v1850_v6, %v1082_v62  ;;  %v1819_v23 = vmul.f32 %v1787_v52, %v1179_v47  ;;  %v1083_v11 = vmul.f32 0.5, %v5752_v35  ;;  %v5158_v15 = vld [vmem:[%s5149_s14 + $0x8] sm:$0xff]  ;;  %v5161_v62 = vld [vmem:[%s5149_s14 + $0x10] sm:$0xff]  ;;  %v5168_v52 = vld [vmem:[%s5149_s14 + $0x18] sm:$0xff] }
 0x1c3   : > { %v1565_v3 = vadd.f32 0.2548296, %v1533_v48  ;;  %v1788_v5 = vsub.f32 1.0, %v1756_v19  ;;  %v1180_v30 = vsel %vm1148_vm15, 1.0, %v5668_v20  ;;  %vm1149_vm0 = vcmp.ge.f32.partialorder %v5753_v60, 0.0  ;;  %v5171_v47 = vld [vmem:[%s5149_s14 + $0x20] sm:$0xff] }
 0x1c4   : > { %v1502_v25 = vadd.f32 -0.28449672, %v1470_v46  ;;  %3298 = vmatmul.mubr.f32.gmra.mrb[26].mxu0 %v1882_v45  ;;  %v1851_v12 = vadd.f32 1.0, %v1819_v23  ;;  %v1084_v16 = vmul.f32 0.5, %v5755_v28  ;;  %v1181_v9 = vsel %vm1149_vm0, 1.0, %v5668_v20  ;;  %v5178_v19 = vld [vmem:[%s5149_s14 + $0x28] sm:$0xff] }
 0x1c5   : > { %v1597_v51 = vmul.f32 %v5740_v44, %v1565_v3  ;;  %v1820_v18 = vmul.f32 %v1788_v5, %v1180_v30  ;;  %vm1150_vm1 = vcmp.ge.f32.partialorder %v5756_v58, 0.0  ;;  %v1085_v53 = vmul.f32 0.5, %v5757_v37  ;;  %v5181_v46 = vld [vmem:[%s5149_s14 + $0x30] sm:$0xff]  ;;  %v5188_v45 = vld [vmem:[%s5149_s14 + $0x38] sm:$0xff] }
 0x1c6   : > { %v1534_v33 = vmul.f32 %v5094_v43, %v1502_v25  ;;  %v1883_v42 = vmul.f32 %v1851_v12, %v1083_v11  ;;  %v1182_v10 = vsel %vm1150_vm1, 1.0, %v5668_v20  ;;  %vm2184_vm2 = vcmask 523264  }
 0x1c7   : > { %v1757_v4 = vmul.f32 %v5754_v27, %v1597_v51  ;;  %v1852_v14 = vadd.f32 1.0, %v1820_v18  ;;  %v1086_v2 = vmul.f32 0.5, %v5758_v24  ;;  %vm2330_vm3 = vcmask 293888  }
 0x1c8   : > { %v1566_v61 = vadd.f32 0.2548296, %v1534_v33  ;;  %3300 = vmatprep.mubr.f32.mxu0 %v1883_v42 }
 0x1c9   : > { %v1789_v22 = vsub.f32 1.0, %v1757_v4  ;;  %v3704_v31 = vpop.eup %3703  ;;  %v1884_v63 = vmul.f32 %v1852_v14, %v1084_v16 }
 0x1ca   : > { %v1598_v44 = vmul.f32 %v5094_v43, %v1566_v61  ;;  %v5152_v43 = vld [vmem:[%s5149_s14] sm:$0xff] }
 0x1cb   : > { %v1821_v13 = vmul.f32 %v1789_v22, %v1181_v9  ;;  %3301 = vmatmul.mubr.f32.gmra.mrb[28].mxu0 %v1884_v63  ;;  %3322 = vmatprep.mubr.msk.f32.mxu1 %vm2184_vm2, %v5152_v43 }
 0x1cc   : > { %v1758_v0 = vmul.f32 %v3704_v31, %v1598_v44 }
 0x1cd   : > { %v1853_v57 = vadd.f32 1.0, %v1821_v13 }
 0x1ce   : > { %v1790_v8 = vsub.f32 1.0, %v1758_v0 }
 0x1cf   : > { %v1885_v1 = vmul.f32 %v1853_v57, %v1085_v53 }
 0x1d0   : > { %v1822_v41 = vmul.f32 %v1790_v8, %v1182_v10  ;;  %v5241_v8 = vpop.permute.xlu0 %2151 }
 0x1d1   : > { %3303 = vmatprep.mubr.f32.mxu0 %v1885_v1  ;;  %v5243_v1 = vpop.permute.xlu1 %2146 }
 0x1d2   : > { %v1854_v39 = vadd.f32 1.0, %v1822_v41 }
 0x1d4   : > { %v1886_v26 = vmul.f32 %v1854_v39, %v1086_v2  ;;  %v5245_v10 = vpop.permute.xlu0 %2161 }
 0x1d5   : > { %v5250_v24 = vpop.permute.xlu1 %2156 }
 0x1d6   : > { %3304 = vmatmul.mubr.f32.gmra.mrb[30].mxu0 %v1886_v26  ;;  %v2314_v26 = vld [vmem:[%s5247_s15] sm:$0xff] }
 0x23c   : > { %v3260_v20 = vpop.f32.mrb[0].mxu0 }
 0x23d   : > { %v1969_v54 = vpop.f32.mrb[1].mxu0 }
 0x23e   : > { %v3450_v29 = vpack.c.bf16 %v3260_v20, %v1969_v54 }
 0x240   : > { %3451 = vmatprep.subr.bf16.mxu1 %v3450_v29  ;;  %v3263_v32 = vpop.f32.mrb[2].mxu0 }
 0x241   : > { %3453 = vmatpush3.bf16.msra.mxu1 %v3450_v29  ;;  %v1979_v56 = vpop.f32.mrb[3].mxu0 }
 0x242   : > { %v3454_v21 = vpack.c.bf16 %v3263_v32, %v1979_v56  ;;  %v2317_v56 = vld [vmem:[%s5247_s15 + $0x18] sm:$0xff] }
 0x244   : > { %3455 = vmatprep.subr.bf16.mxu1 %v3454_v21  ;;  %v3266_v55 = vpop.f32.mrb[4].mxu0 }
 0x245   : > { %3457 = vmatpush3.bf16.msra.mxu1 %v3454_v21  ;;  %v1989_v49 = vpop.f32.mrb[5].mxu0 }
 0x246   : > { %v3458_v7 = vpack.c.bf16 %v3266_v55, %v1989_v49  ;;  %v2316_v49 = vld [vmem:[%s5247_s15 + $0x10] sm:$0xff] }
 0x248   : > { %v3269_v17 = vpop.f32.mrb[6].mxu0  ;;  %3459 = vmatprep.subr.bf16.mxu1 %v3458_v7 }
 0x249   : > { %v1999_v40 = vpop.f32.mrb[7].mxu0  ;;  %3461 = vmatpush3.bf16.msra.mxu1 %v3458_v7  ;;  %v5262_v7 = vpop.permute.xlu0 %2171 }
 0x24a   : > { %v3462_v59 = vpack.c.bf16 %v3269_v17, %v1999_v40  ;;  %v5267_v40 = vpop.permute.xlu1 %2166 }
 0x24c   : > { %3463 = vmatprep.subr.bf16.mxu1 %v3462_v59 }
 0x24d   : > { %v3272_v36 = vpop.f32.mrb[8].mxu0  ;;  %3465 = vmatpush3.bf16.msra.mxu1 %v3462_v59 }
 0x24e   : > { %v2009_v38 = vpop.f32.mrb[9].mxu0 }
 0x24f   : > { %v3466_v6 = vpack.c.bf16 %v3272_v36, %v2009_v38  ;;  %v2319_v38 = vld [vmem:[%s5247_s15 + $0x28] sm:$0xff] }
 0x250   : > { %3323 = vmatmul.mubr.msk.f32.vlgmr.msra.gmra.mrb[0].mxu1 %vm2184_vm2, %v5158_v15 }
 0x251   : > { %3467 = vmatprep.subr.bf16.mxu1 %v3466_v6  ;;  %3325 = vmatprep.mubr.msk.f32.mxu1 %vm2184_vm2, %v5161_v62 }
 0x252   : > { %v3275_v48 = vpop.f32.mrb[10].mxu0  ;;  %3469 = vmatpush3.bf16.msra.mxu1 %v3466_v6 }
 0x253   : > { %v2019_v50 = vpop.f32.mrb[11].mxu0 }
 0x254   : > { %v3470_v34 = vpack.c.bf16 %v3275_v48, %v2019_v50  ;;  %3326 = vmatmul.mubr.msk.f32.gmra.mrb[2].mxu1 %vm2184_vm2, %v5168_v52  ;;  %v5277_v50 = vpop.permute.xlu0 %2181 }
 0x255   : > { %3328 = vmatprep.mubr.msk.f32.mxu1 %vm2184_vm2, %v5171_v47 }
 0x256   : > { %3471 = vmatprep.subr.bf16.mxu1 %v3470_v34 }
 0x257   : > { %3473 = vmatpush3.bf16.msra.mxu1 %v3470_v34 }
 0x258   : > { %3329 = vmatmul.mubr.msk.f32.gmra.mrb[4].mxu1 %vm2184_vm2, %v5178_v19 }
 0x259   : > { %3331 = vmatprep.mubr.msk.f32.mxu1 %vm2184_vm2, %v5181_v46 }
 0x25a   : > { %v3278_v23 = vpop.f32.mrb[12].mxu0 }
 0x25b   : > { %v2029_v3 = vpop.f32.mrb[13].mxu0 }
 0x25c   : > { %v3474_v5 = vpack.c.bf16 %v3278_v23, %v2029_v3  ;;  %3332 = vmatmul.mubr.msk.f32.gmra.mrb[6].mxu1 %vm2184_vm2, %v5188_v45 }
 0x25d   : > { %3350 = vmatprep.mubr.msk.f32.mxu1 %vm2184_vm2, %v5152_v43 }
 0x25e   : > { %3475 = vmatprep.subr.bf16.mxu1 %v3474_v5 }
 0x25f   : > { %3477 = vmatpush3.bf16.msra.mxu1 %v3474_v5  ;;  %v2320_v5 = vld [vmem:[%s5247_s15 + $0x30] sm:$0xff] }
 0x263   : > { %v3281_v25 = vpop.f32.mrb[14].mxu0 }
 0x264   : > { %v2039_v35 = vpop.f32.mrb[15].mxu0 }
 0x265   : > { %v3478_v11 = vpack.c.bf16 %v3281_v25, %v2039_v35 }
 0x267   : > { %3479 = vmatprep.subr.bf16.mxu1 %v3478_v11 }
 0x268   : > { %3481 = vmatpush3.bf16.msra.mxu1 %v3478_v11 }
 0x26b   : > { %3351 = vmatmul.mubr.msk.f32.vlgmr.msra.gmra.mrb[8].mxu1 %vm2184_vm2, %v5158_v15 }
 0x26c   : > { %3353 = vmatprep.mubr.msk.f32.mxu1 %vm2184_vm2, %v5161_v62 }
 0x26d   : > { %v3284_v12 = vpop.f32.mrb[16].mxu0 }
 0x26e   : > { %v2049_v30 = vpop.f32.mrb[17].mxu0 }
 0x26f   : > { %v3482_v51 = vpack.c.bf16 %v3284_v12, %v2049_v30  ;;  %3354 = vmatmul.mubr.msk.f32.gmra.mrb[10].mxu1 %vm2184_vm2, %v5168_v52  ;;  %v3042_v30 = vld [vmem:[%s5247_s15 + $0x48] sm:$0xff] }
 0x270   : > { %3356 = vmatprep.mubr.msk.f32.mxu1 %vm2184_vm2, %v5171_v47 }
 0x271   : > { %3483 = vmatprep.subr.bf16.mxu1 %v3482_v51 }
 0x272   : > { %3485 = vmatpush3.bf16.msra.mxu1 %v3482_v51 }
 0x273   : > { %3357 = vmatmul.mubr.msk.f32.gmra.mrb[12].mxu1 %vm2184_vm2, %v5178_v19 }
 0x274   : > { %3359 = vmatprep.mubr.msk.f32.mxu1 %vm2184_vm2, %v5181_v46 }
 0x276   : > { %v3287_v18 = vpop.f32.mrb[18].mxu0 }
 0x277   : > { %v2059_v33 = vpop.f32.mrb[19].mxu0  ;;  %3360 = vmatmul.mubr.msk.f32.gmra.mrb[14].mxu1 %vm2184_vm2, %v5188_v45 }
 0x278   : > { %v3486_v42 = vpack.c.bf16 %v3287_v18, %v2059_v33  ;;  %3378 = vmatprep.mubr.msk.f32.mxu1 %vm2184_vm2, %v5152_v43  ;;  %v3041_v33 = vld [vmem:[%s5247_s15 + $0x40] sm:$0xff] }
 0x27a   : > { %3487 = vmatprep.subr.bf16.mxu1 %v3486_v42 }
 0x27b   : > { %3489 = vmatpush3.bf16.msra.mxu1 %v3486_v42 }
 0x27c   : > { %v3290_v60 = vpop.f32.mrb[20].mxu0 }
 0x27d   : > { %v2069_v27 = vpop.f32.mrb[21].mxu0 }
 0x27e   : > { %v3490_v4 = vpack.c.bf16 %v3290_v60, %v2069_v27 }
 0x280   : > { %3491 = vmatprep.subr.bf16.mxu1 %v3490_v4 }
 0x281   : > { %3493 = vmatpush3.bf16.msra.mxu1 %v3490_v4 }
 0x287   : > { %v3293_v28 = vpop.f32.mrb[22].mxu0 }
 0x288   : > { %v2079_v16 = vpop.f32.mrb[23].mxu0 }
 0x289   : > { %v3494_v14 = vpack.c.bf16 %v3293_v28, %v2079_v16  ;;  %v3044_v28 = vld [vmem:[%s5247_s15 + $0x58] sm:$0xff] }
 0x28b   : > { %3495 = vmatprep.subr.bf16.mxu1 %v3494_v14 }
 0x28c   : > { %3497 = vmatpush3.bf16.msra.mxu1 %v3494_v14 }
 0x28f   : > { %3379 = vmatmul.mubr.msk.f32.vlgmr.msra.gmra.mrb[16].mxu1 %vm2184_vm2, %v5158_v15 }
 0x290   : > { %v3296_v61 = vpop.f32.mrb[24].mxu0  ;;  %3381 = vmatprep.mubr.msk.f32.mxu1 %vm2184_vm2, %v5161_v62 }
 0x291   : > { %v2089_v22 = vpop.f32.mrb[25].mxu0 }
 0x292   : > { %v3498_v31 = vpack.c.bf16 %v3296_v61, %v2089_v22  ;;  %v3043_v61 = vld [vmem:[%s5247_s15 + $0x50] sm:$0xff] }
 0x293   : > { %3382 = vmatmul.mubr.msk.f32.gmra.mrb[18].mxu1 %vm2184_vm2, %v5168_v52 }
 0x294   : > { %3499 = vmatprep.subr.bf16.mxu1 %v3498_v31  ;;  %3384 = vmatprep.mubr.msk.f32.mxu1 %vm2184_vm2, %v5171_v47 }
 0x295   : > { %3501 = vmatpush3.bf16.msra.mxu1 %v3498_v31 }
 0x297   : > { %v3299_v63 = vpop.f32.mrb[26].mxu0  ;;  %3385 = vmatmul.mubr.msk.f32.gmra.mrb[20].mxu1 %vm2184_vm2, %v5178_v19 }
 0x298   : > { %v2099_v9 = vpop.f32.mrb[27].mxu0  ;;  %3387 = vmatprep.mubr.msk.f32.mxu1 %vm2184_vm2, %v5181_v46 }
 0x299   : > { %v3502_v44 = vpack.c.bf16 %v3299_v63, %v2099_v9 }
 0x29b   : > { %3503 = vmatprep.subr.bf16.mxu1 %v3502_v44  ;;  %3388 = vmatmul.mubr.msk.f32.gmra.mrb[22].mxu1 %vm2184_vm2, %v5188_v45 }
 0x29c   : > { %3505 = vmatpush3.bf16.msra.mxu1 %v3502_v44  ;;  %3406 = vmatprep.mubr.msk.f32.mxu1 %vm2184_vm2, %v5152_v43  ;;  %v2315_v43 = vld [vmem:[%s5247_s15 + $0x8] sm:$0xff] }
 0x29d   : > { %v3046_v44 = vld [vmem:[%s5247_s15 + $0x68] sm:$0xff] }
 0x29e   : > { %v3302_v13 = vpop.f32.mrb[28].mxu0 }
 0x29f   : > { %v2109_v58 = vpop.f32.mrb[29].mxu0 }
 0x2a0   : > { %v3506_v0 = vpack.c.bf16 %v3302_v13, %v2109_v58 }
 0x2a2   : > { %3507 = vmatprep.subr.bf16.mxu1 %v3506_v0 }
 0x2a3   : > { %3509 = vmatpush3.bf16.msra.mxu1 %v3506_v0  ;;  %v3045_v0 = vld [vmem:[%s5247_s15 + $0x60] sm:$0xff] }
 0x2a9   : > { %v3305_v37 = vpop.f32.mrb[30].mxu0 }
 0x2aa   : > { %v2119_v53 = vpop.f32.mrb[31].mxu0 }
 0x2ab   : > { %v3510_v57 = vpack.c.bf16 %v3305_v37, %v2119_v53 }
 0x2ad   : > { %3511 = vmatprep.subr.bf16.mxu1 %v3510_v57 }
 0x2ae   : > { %3513 = vmatpush3.bf16.msra.mxu1 %v3510_v57 }
 0x2b1   : > { %3407 = vmatmul.mubr.msk.f32.vlgmr.msra.gmra.mrb[24].mxu1 %vm2184_vm2, %v5158_v15 }
 0x2b2   : > { %3409 = vmatprep.mubr.msk.f32.mxu1 %vm2184_vm2, %v5161_v62 }
 0x2b5   : > { %3410 = vmatmul.mubr.msk.f32.gmra.mrb[26].mxu1 %vm2184_vm2, %v5168_v52  ;;  %v2318_v52 = vld [vmem:[%s5247_s15 + $0x20] sm:$0xff] }
 0x2b6   : > { %3412 = vmatprep.mubr.msk.f32.mxu1 %vm2184_vm2, %v5171_v47 }
 0x2b9   : > { %3413 = vmatmul.mubr.msk.f32.gmra.mrb[28].mxu1 %vm2184_vm2, %v5178_v19 }
 0x2ba   : > { %3415 = vmatprep.mubr.msk.f32.mxu1 %vm2184_vm2, %v5181_v46  ;;  %v2321_v46 = vld [vmem:[%s5247_s15 + $0x38] sm:$0xff] }
 0x2bd   : > { %3416 = vmatmul.mubr.msk.f32.gmra.mrb[30].mxu1 %vm2184_vm2, %v5188_v45  ;;  %v5280_v45 = vpop.permute.xlu1 %2176 }
 0x323   : > { %v3324_v41 = vpop.f32.mrb[0].mxu1 }
 0x324   : > { %v2281_v2 = vadd.f32 %v3324_v41, %v5241_v8  ;;  %v2275_v39 = vpop.f32.mrb[1].mxu1 }
 0x325   : > { %v2276_v20 = vadd.f32 %v2275_v39, %v5243_v1 }
 0x326   : > { %v2323_v54 = vadd.f32 %v2315_v43, %v2281_v2  ;;  %v3048_v43 = vld [vmem:[%s5247_s15 + $0x78] sm:$0xff] }
 0x327   : > { %v2322_v29 = vadd.f32 %v2314_v26, %v2276_v20  ;;  %v3327_v32 = vpop.f32.mrb[2].mxu1  ;;  %v3047_v26 = vld [vmem:[%s5247_s15 + $0x70] sm:$0xff] }
 0x328   : > { %2332 = vst.msk [vmem:[%s5256_s24 + $0x8] sm:$0xff] %vm2330_vm3, %v2323_v54  ;;  %v2291_v21 = vadd.f32 %v3327_v32, %v5245_v10  ;;  %v2285_v55 = vpop.f32.mrb[3].mxu1 }
 0x329   : > { %2331 = vst.msk [vmem:[%s5256_s24] sm:$0xff] %vm2330_vm3, %v2322_v29  ;;  %v2286_v17 = vadd.f32 %v2285_v55, %v5250_v24 }
 0x32a   : > { %v2325_v59 = vadd.f32 %v2317_v56, %v2291_v21  ;;  %v3066_v56 = vld [vmem:[%s5247_s15 + $0x88] sm:$0xff] }
 0x32b   : > { %v2324_v36 = vadd.f32 %v2316_v49, %v2286_v17  ;;  %v3330_v15 = vpop.f32.mrb[4].mxu1  ;;  %v3065_v49 = vld [vmem:[%s5247_s15 + $0x80] sm:$0xff] }
 0x32c   : > { %2334 = vst.msk [vmem:[%s5256_s24 + $0x18] sm:$0xff] %vm2330_vm3, %v2325_v59  ;;  %v2301_v62 = vadd.f32 %v3330_v15, %v5262_v7  ;;  %v2295_v6 = vpop.f32.mrb[5].mxu1 }
 0x32d   : > { %2333 = vst.msk [vmem:[%s5256_s24 + $0x10] sm:$0xff] %vm2330_vm3, %v2324_v36  ;;  %v2296_v48 = vadd.f32 %v2295_v6, %v5267_v40 }
 0x32e   : > { %v2327_v47 = vadd.f32 %v2319_v38, %v2301_v62  ;;  %v3068_v38 = vld [vmem:[%s5247_s15 + $0x98] sm:$0xff] }
 0x32f   : > { %v2326_v34 = vadd.f32 %v2318_v52, %v2296_v48  ;;  %v3333_v19 = vpop.f32.mrb[6].mxu1  ;;  %v3067_v52 = vld [vmem:[%s5247_s15 + $0x90] sm:$0xff] }
 0x330   : > { %2336 = vst.msk [vmem:[%s5256_s24 + $0x28] sm:$0xff] %vm2330_vm3, %v2327_v47  ;;  %v2311_v23 = vadd.f32 %v3333_v19, %v5277_v50  ;;  %v2305_v3 = vpop.f32.mrb[7].mxu1 }
 0x331   : > { %2335 = vst.msk [vmem:[%s5256_s24 + $0x20] sm:$0xff] %vm2330_vm3, %v2326_v34  ;;  %v2306_v25 = vadd.f32 %v2305_v3, %v5280_v45 }
 0x332   : > { %v2329_v35 = vadd.f32 %v2321_v46, %v2311_v23  ;;  %v3070_v46 = vld [vmem:[%s5247_s15 + $0xa8] sm:$0xff] }
 0x333   : > { %v2328_v11 = vadd.f32 %v2320_v5, %v2306_v25  ;;  %v3069_v5 = vld [vmem:[%s5247_s15 + $0xa0] sm:$0xff] }
 0x334   : > { %2338 = vst.msk [vmem:[%s5256_s24 + $0x38] sm:$0xff] %vm2330_vm3, %v2329_v35 }
 0x335   : > { %2337 = vst.msk [vmem:[%s5256_s24 + $0x30] sm:$0xff] %vm2330_vm3, %v2328_v11 }
 0x33e   : > { %v3352_v12 = vpop.f32.mrb[8].mxu1 }
 0x33f   : > { %v2411_v51 = vadd.f32 %v3352_v12, %v5241_v8  ;;  %v2405_v18 = vpop.f32.mrb[9].mxu1 }
 0x340   : > { %v2406_v42 = vadd.f32 %v2405_v18, %v5243_v1 }
 0x341   : > { %v2454_v60 = vadd.f32 %v3042_v30, %v2411_v51  ;;  %v3072_v30 = vld [vmem:[%s5247_s15 + $0xb8] sm:$0xff] }
 0x342   : > { %v2453_v27 = vadd.f32 %v3041_v33, %v2406_v42  ;;  %v3355_v4 = vpop.f32.mrb[10].mxu1  ;;  %v3071_v33 = vld [vmem:[%s5247_s15 + $0xb0] sm:$0xff] }
 0x343   : > { %3050 = vst.msk [vmem:[%s5256_s24 + $0x48] sm:$0xff] %vm2330_vm3, %v2454_v60  ;;  %v2421_v16 = vadd.f32 %v3355_v4, %v5245_v10  ;;  %v2415_v14 = vpop.f32.mrb[11].mxu1 }
 0x344   : > { %3049 = vst.msk [vmem:[%s5256_s24 + $0x40] sm:$0xff] %vm2330_vm3, %v2453_v27  ;;  %v2416_v22 = vadd.f32 %v2415_v14, %v5250_v24 }
 0x345   : > { %v2456_v31 = vadd.f32 %v3044_v28, %v2421_v16  ;;  %v3090_v28 = vld [vmem:[%s5247_s15 + $0xc8] sm:$0xff] }
 0x346   : > { %v2455_v63 = vadd.f32 %v3043_v61, %v2416_v22  ;;  %v3358_v9 = vpop.f32.mrb[12].mxu1  ;;  %v3089_v61 = vld [vmem:[%s5247_s15 + $0xc0] sm:$0xff] }
 0x347   : > { %3052 = vst.msk [vmem:[%s5256_s24 + $0x58] sm:$0xff] %vm2330_vm3, %v2456_v31  ;;  %v2431_v13 = vadd.f32 %v3358_v9, %v5262_v7  ;;  %v2425_v58 = vpop.f32.mrb[13].mxu1 }
 0x348   : > { %3051 = vst.msk [vmem:[%s5256_s24 + $0x50] sm:$0xff] %vm2330_vm3, %v2455_v63  ;;  %v2426_v37 = vadd.f32 %v2425_v58, %v5267_v40 }
 0x349   : > { %v2458_v53 = vadd.f32 %v3046_v44, %v2431_v13  ;;  %v3092_v44 = vld [vmem:[%s5247_s15 + $0xd8] sm:$0xff] }
 0x34a   : > { %v2457_v57 = vadd.f32 %v3045_v0, %v2426_v37  ;;  %v3361_v41 = vpop.f32.mrb[14].mxu1  ;;  %v3091_v0 = vld [vmem:[%s5247_s15 + $0xd0] sm:$0xff] }
 0x34b   : > { %3054 = vst.msk [vmem:[%s5256_s24 + $0x68] sm:$0xff] %vm2330_vm3, %v2458_v53  ;;  %v2441_v2 = vadd.f32 %v3361_v41, %v5277_v50  ;;  %v2435_v39 = vpop.f32.mrb[15].mxu1 }
 0x34c   : > { %3053 = vst.msk [vmem:[%s5256_s24 + $0x60] sm:$0xff] %vm2330_vm3, %v2457_v57  ;;  %v2436_v20 = vadd.f32 %v2435_v39, %v5280_v45  ;;  %v3094_v57 = vld [vmem:[%s5247_s15 + $0xe8] sm:$0xff] }
 0x34d   : > { %v2460_v54 = vadd.f32 %v3048_v43, %v2441_v2 }
 0x34e   : > { %v2459_v29 = vadd.f32 %v3047_v26, %v2436_v20  ;;  %v3096_v20 = vld [vmem:[%s5247_s15 + $0xf8] sm:$0xff] }
 0x34f   : > { %3056 = vst.msk [vmem:[%s5256_s24 + $0x78] sm:$0xff] %vm2330_vm3, %v2460_v54 }
 0x350   : > { %3055 = vst.msk [vmem:[%s5256_s24 + $0x70] sm:$0xff] %vm2330_vm3, %v2459_v29 }
 0x362   : > { %v3380_v32 = vpop.f32.mrb[16].mxu1 }
 0x363   : > { %v2542_v21 = vadd.f32 %v3380_v32, %v5241_v8  ;;  %v2536_v55 = vpop.f32.mrb[17].mxu1  ;;  %v3095_v32 = vld [vmem:[%s5247_s15 + $0xf0] sm:$0xff] }
 0x364   : > { %v2537_v17 = vadd.f32 %v2536_v55, %v5243_v1  ;;  %v2840_v55 = vld [vmem:[%s5256_s24 + $0x18] sm:$0xff] (%p3854_p6) }
 0x365   : > { %v2585_v59 = vadd.f32 %v3066_v56, %v2542_v21  ;;  %2841 = vst [vmem:[%s5405_s22 + $0x18] sm:$0xff] (%p3854_p6), %v2840_v55 }
 0x366   : > { %v2584_v36 = vadd.f32 %v3065_v49, %v2537_v17  ;;  %v3383_v15 = vpop.f32.mrb[18].mxu1  ;;  %v2842_v49 = vld [vmem:[%s5256_s24 + $0x20] sm:$0xff] (%p3854_p6)  ;;  %v2844_v17 = vld [vmem:[%s5256_s24 + $0x28] sm:$0xff] (%p3854_p6) }
 0x367   : > { %3074 = vst.msk [vmem:[%s5256_s24 + $0x88] sm:$0xff] %vm2330_vm3, %v2585_v59  ;;  %v2552_v62 = vadd.f32 %v3383_v15, %v5245_v10  ;;  %v2546_v6 = vpop.f32.mrb[19].mxu1  ;;  %v2846_v59 = vld [vmem:[%s5256_s24 + $0x30] sm:$0xff] (%p3854_p6)  ;;  %v2850_v15 = vld [vmem:[%s5256_s24 + $0x40] sm:$0xff] (%p3854_p6)  ;;  %2843 = vst [vmem:[%s5405_s22 + $0x20] sm:$0xff] (%p3854_p6), %v2842_v49 }
 0x368   : > { %3073 = vst.msk [vmem:[%s5256_s24 + $0x80] sm:$0xff] %vm2330_vm3, %v2584_v36  ;;  %v2547_v48 = vadd.f32 %v2546_v6, %v5250_v24  ;;  %v2848_v36 = vld [vmem:[%s5256_s24 + $0x38] sm:$0xff] (%p3854_p6)  ;;  %2845 = vst [vmem:[%s5405_s22 + $0x28] sm:$0xff] (%p3854_p6), %v2844_v17 }
 0x369   : > { %v2587_v47 = vadd.f32 %v3068_v38, %v2552_v62  ;;  %v2852_v38 = vld [vmem:[%s5256_s24 + $0x48] sm:$0xff] (%p3854_p6)  ;;  %v2854_v62 = vld [vmem:[%s5256_s24 + $0x50] sm:$0xff] (%p3854_p6)  ;;  %v2856_v6 = vld [vmem:[%s5256_s24 + $0x58] sm:$0xff] (%p3854_p6)  ;;  %2847 = vst [vmem:[%s5405_s22 + $0x30] sm:$0xff] (%p3854_p6), %v2846_v59 }
 0x36a   : > { %v2586_v34 = vadd.f32 %v3067_v52, %v2547_v48  ;;  %v3386_v19 = vpop.f32.mrb[20].mxu1  ;;  %2849 = vst [vmem:[%s5405_s22 + $0x38] sm:$0xff] (%p3854_p6), %v2848_v36  ;;  %2851 = vst [vmem:[%s5405_s22 + $0x80] sm:$0xff] (%p3854_p6), %v2850_v15  ;;  %v2858_v52 = vld [vmem:[%s5256_s24 + $0x60] sm:$0xff] (%p3854_p6)  ;;  %v2860_v48 = vld [vmem:[%s5256_s24 + $0x68] sm:$0xff] (%p3854_p6) }
 0x36b   : > { %3076 = vst.msk [vmem:[%s5256_s24 + $0x98] sm:$0xff] %vm2330_vm3, %v2587_v47  ;;  %v2562_v23 = vadd.f32 %v3386_v19, %v5262_v7  ;;  %v2556_v3 = vpop.f32.mrb[21].mxu1  ;;  %2853 = vst [vmem:[%s5405_s22 + $0x88] sm:$0xff] (%p3854_p6), %v2852_v38  ;;  %v2862_v47 = vld [vmem:[%s5256_s24 + $0x70] sm:$0xff] (%p3854_p6) }
 0x36c   : > { %3075 = vst.msk [vmem:[%s5256_s24 + $0x90] sm:$0xff] %vm2330_vm3, %v2586_v34  ;;  %v2557_v25 = vadd.f32 %v2556_v3, %v5267_v40  ;;  %2855 = vst [vmem:[%s5405_s22 + $0x90] sm:$0xff] (%p3854_p6), %v2854_v62  ;;  %v2864_v34 = vld [vmem:[%s5256_s24 + $0x78] sm:$0xff] (%p3854_p6) }
 0x36d   : > { %v2589_v35 = vadd.f32 %v3070_v46, %v2562_v23  ;;  %2857 = vst [vmem:[%s5405_s22 + $0x98] sm:$0xff] (%p3854_p6), %v2856_v6  ;;  %2859 = vst [vmem:[%s5405_s22 + $0xa0] sm:$0xff] (%p3854_p6), %v2858_v52 }
 0x36e   : > { %v2588_v11 = vadd.f32 %v3069_v5, %v2557_v25  ;;  %v3389_v12 = vpop.f32.mrb[22].mxu1  ;;  %2861 = vst [vmem:[%s5405_s22 + $0xa8] sm:$0xff] (%p3854_p6), %v2860_v48  ;;  %2863 = vst [vmem:[%s5405_s22 + $0xb0] sm:$0xff] (%p3854_p6), %v2862_v47  ;;  %v2868_v46 = vld [vmem:[%s5256_s24 + $0x88] sm:$0xff] (%p3854_p6) }
 0x36f   : > { %3078 = vst.msk [vmem:[%s5256_s24 + $0xa8] sm:$0xff] %vm2330_vm3, %v2589_v35  ;;  %v2572_v51 = vadd.f32 %v3389_v12, %v5277_v50  ;;  %v2566_v18 = vpop.f32.mrb[23].mxu1  ;;  %v2866_v19 = vld [vmem:[%s5256_s24 + $0x80] sm:$0xff] (%p3854_p6)  ;;  %2865 = vst [vmem:[%s5405_s22 + $0xb8] sm:$0xff] (%p3854_p6), %v2864_v34 }
 0x370   : > { %3077 = vst.msk [vmem:[%s5256_s24 + $0xa0] sm:$0xff] %vm2330_vm3, %v2588_v11  ;;  %v2567_v42 = vadd.f32 %v2566_v18, %v5280_v45  ;;  %2867 = vst [vmem:[%s5405_s22 + $0x100] sm:$0xff] (%p3854_p6), %v2866_v19 }
 0x371   : > { %v2591_v60 = vadd.f32 %v3072_v30, %v2572_v51  ;;  %2869 = vst [vmem:[%s5405_s22 + $0x108] sm:$0xff] (%p3854_p6), %v2868_v46 }
 0x372   : > { %v2590_v27 = vadd.f32 %v3071_v33, %v2567_v42  ;;  %v2872_v3 = vld [vmem:[%s5256_s24 + $0x98] sm:$0xff] (%p3854_p6) }
 0x373   : > { %3080 = vst.msk [vmem:[%s5256_s24 + $0xb8] sm:$0xff] %vm2330_vm3, %v2591_v60  ;;  %v2870_v23 = vld [vmem:[%s5256_s24 + $0x90] sm:$0xff] (%p3854_p6)  ;;  %2873 = vst [vmem:[%s5405_s22 + $0x118] sm:$0xff] (%p3854_p6), %v2872_v3 }
 0x374   : > { %3079 = vst.msk [vmem:[%s5256_s24 + $0xb0] sm:$0xff] %vm2330_vm3, %v2590_v27  ;;  %2871 = vst [vmem:[%s5405_s22 + $0x110] sm:$0xff] (%p3854_p6), %v2870_v23 }
 0x376   : > { %v2876_v25 = vld [vmem:[%s5256_s24 + $0xa8] sm:$0xff] (%p3854_p6) }
 0x377   : > { %v2874_v5 = vld [vmem:[%s5256_s24 + $0xa0] sm:$0xff] (%p3854_p6)  ;;  %2877 = vst [vmem:[%s5405_s22 + $0x128] sm:$0xff] (%p3854_p6), %v2876_v25 }
 0x378   : > { %2875 = vst [vmem:[%s5405_s22 + $0x120] sm:$0xff] (%p3854_p6), %v2874_v5 }
 0x37a   : > { %v2880_v11 = vld [vmem:[%s5256_s24 + $0xb8] sm:$0xff] (%p3854_p6) }
 0x37b   : > { %v2878_v35 = vld [vmem:[%s5256_s24 + $0xb0] sm:$0xff] (%p3854_p6)  ;;  %2881 = vst [vmem:[%s5405_s22 + $0x138] sm:$0xff] (%p3854_p6), %v2880_v11 }
 0x37c   : > { %2879 = vst [vmem:[%s5405_s22 + $0x130] sm:$0xff] (%p3854_p6), %v2878_v35 }
 0x384   : > { %v3408_v4 = vpop.f32.mrb[24].mxu1 }
 0x385   : > { %v2673_v16 = vadd.f32 %v3408_v4, %v5241_v8  ;;  %v2667_v14 = vpop.f32.mrb[25].mxu1 }
 0x386   : > { %v2668_v22 = vadd.f32 %v2667_v14, %v5243_v1 }
 0x387   : > { %v2716_v31 = vadd.f32 %v3090_v28, %v2673_v16 }
 0x388   : > { %v2715_v63 = vadd.f32 %v3089_v61, %v2668_v22  ;;  %v3411_v9 = vpop.f32.mrb[26].mxu1 }
 0x389   : > { %3098 = vst.msk [vmem:[%s5256_s24 + $0xc8] sm:$0xff] %vm2330_vm3, %v2716_v31  ;;  %v2683_v13 = vadd.f32 %v3411_v9, %v5245_v10  ;;  %v2677_v58 = vpop.f32.mrb[27].mxu1  ;;  %v3093_v10 = vld [vmem:[%s5247_s15 + $0xe0] sm:$0xff] }
 0x38a   : > { %3097 = vst.msk [vmem:[%s5256_s24 + $0xc0] sm:$0xff] %vm2330_vm3, %v2715_v63  ;;  %v2678_v8 = vadd.f32 %v2677_v58, %v5250_v24 }
 0x38b   : > { %v2718_v37 = vadd.f32 %v3092_v44, %v2683_v13 }
 0x38c   : > { %v2717_v1 = vadd.f32 %v3091_v0, %v2678_v8  ;;  %v3414_v53 = vpop.f32.mrb[28].mxu1 }
 0x38d   : > { %3100 = vst.msk [vmem:[%s5256_s24 + $0xd8] sm:$0xff] %vm2330_vm3, %v2718_v37  ;;  %v2693_v41 = vadd.f32 %v3414_v53, %v5262_v7  ;;  %v2687_v43 = vpop.f32.mrb[29].mxu1 }
 0x38e   : > { %3099 = vst.msk [vmem:[%s5256_s24 + $0xd0] sm:$0xff] %vm2330_vm3, %v2717_v1  ;;  %v2688_v2 = vadd.f32 %v2687_v43, %v5267_v40  ;;  %v2834_v40 = vld [vmem:[%s5256_s24] sm:$0xff] (%p3854_p6) }
 0x38f   : > { %v2720_v39 = vadd.f32 %v3094_v57, %v2693_v41  ;;  %2835 = vst [vmem:[%s5405_s22] sm:$0xff] (%p3854_p6), %v2834_v40 }
 0x390   : > { %v2719_v24 = vadd.f32 %v3093_v10, %v2688_v2  ;;  %v3417_v26 = vpop.f32.mrb[30].mxu1  ;;  %2738 = sbr.rel (!%p3854_p6) target bundleno = 927 (0x39f), region = 90  ;;  %v2884_v30 = vld [vmem:[%s5256_s24 + $0xc8] sm:$0xff] (%p3854_p6) }
 0x391   : > { %3102 = vst.msk [vmem:[%s5256_s24 + $0xe8] sm:$0xff] %vm2330_vm3, %v2720_v39  ;;  %v2703_v54 = vadd.f32 %v3417_v26, %v5277_v50  ;;  %v2697_v29 = vpop.f32.mrb[31].mxu1  ;;  %v2836_v50 = vld [vmem:[%s5256_s24 + $0x8] sm:$0xff] (%p3854_p6)  ;;  %v2882_v12 = vld [vmem:[%s5256_s24 + $0xc0] sm:$0xff] (%p3854_p6)  ;;  %2885 = vst [vmem:[%s5405_s22 + $0x188] sm:$0xff] (%p3854_p6), %v2884_v30 }
 0x392   : > { %3101 = vst.msk [vmem:[%s5256_s24 + $0xe0] sm:$0xff] %vm2330_vm3, %v2719_v24  ;;  %v2698_v7 = vadd.f32 %v2697_v29, %v5280_v45  ;;  %v2838_v45 = vld [vmem:[%s5256_s24 + $0x10] sm:$0xff] (%p3854_p6)  ;;  %2837 = vst [vmem:[%s5405_s22 + $0x8] sm:$0xff] (%p3854_p6), %v2836_v50 }
 0x393   : > { %v2722_v56 = vadd.f32 %v3096_v20, %v2703_v54  ;;  %2839 = vst [vmem:[%s5405_s22 + $0x10] sm:$0xff] (%p3854_p6), %v2838_v45  ;;  %2883 = vst [vmem:[%s5405_s22 + $0x180] sm:$0xff] (%p3854_p6), %v2882_v12 }
 0x394   : > { %v2721_v21 = vadd.f32 %v3095_v32, %v2698_v7  ;;  %v2888_v18 = vld [vmem:[%s5256_s24 + $0xd8] sm:$0xff] (%p3854_p6) }
 0x395   : > { %3104 = vst.msk [vmem:[%s5256_s24 + $0xf8] sm:$0xff] %vm2330_vm3, %v2722_v56  ;;  %v2886_v51 = vld [vmem:[%s5256_s24 + $0xd0] sm:$0xff] (%p3854_p6)  ;;  %2889 = vst [vmem:[%s5405_s22 + $0x198] sm:$0xff] (%p3854_p6), %v2888_v18 }
 0x396   : > { %3103 = vst.msk [vmem:[%s5256_s24 + $0xf0] sm:$0xff] %vm2330_vm3, %v2721_v21  ;;  %2887 = vst [vmem:[%s5405_s22 + $0x190] sm:$0xff] (%p3854_p6), %v2886_v51 }
 0x398   : > { %v2892_v42 = vld [vmem:[%s5256_s24 + $0xe8] sm:$0xff] }
 0x399   : > { %v2890_v33 = vld [vmem:[%s5256_s24 + $0xe0] sm:$0xff]  ;;  %2893 = vst [vmem:[%s5405_s22 + $0x1a8] sm:$0xff] %v2892_v42 }
 0x39a   : > { %2891 = vst [vmem:[%s5405_s22 + $0x1a0] sm:$0xff] %v2890_v33 }
 0x39c   : > { %v2896_v27 = vld [vmem:[%s5256_s24 + $0xf8] sm:$0xff] }
 0x39d   : > { %v2894_v60 = vld [vmem:[%s5256_s24 + $0xf0] sm:$0xff]  ;;  %2897 = vst [vmem:[%s5405_s22 + $0x1b8] sm:$0xff] %v2896_v27 }
 0x39e   : > { %2895 = vst [vmem:[%s5405_s22 + $0x1b0] sm:$0xff] %v2894_v60 }
 0x39f PF: > { %s17_s30 = sadd.s32 1, %s3759_s30   ;;  %s5759_s24 = smov %s3739_s25 }
 0x3a0   : > { %p14_p0 = scmp.ge.s32.totalorder %s17_s30, 6   ;;  %s5760_s25 = smov %s3862_s16 }
 0x3a1   : > { %s5761_s26 = smov %s3751_s28  ;;  %s5762_s27 = smov %s3755_s29 }
 0x3a2   : > { %s5763_s28 = smov %s5766_s8  ;;  %s5764_s29 = smov %s5770_s9 }
 0x3a3   :  { %16 = sbr.rel (!%p14_p0) target bundleno = 4 (0x4), region = 174 }

</bundles_post_ra>
